<compile_context>
chip_gen: v7x
topology: tpu7x:2x2x1
jax: 0.10.0
libtpu: 0.0.40
codegen_flags: <defaults>
</compile_context>

<pallas_src>
import functools
import numpy as np
import jax
import jax.numpy as jnp
from jax.experimental import pallas as pl
from jax.experimental.pallas import tpu as pltpu


# --------------------- generation-aware VMEM budget ---------------------

def _vmem_capacity_bytes():
    try:
        return int(pltpu.get_tpu_info().vmem_capacity_bytes)
    except Exception:
        return 128 * 1024 * 1024       # v5e/v6e-like default (also interpret mode)


_VMEM_LIMIT = min(_vmem_capacity_bytes() // 2, 64 * 1024 * 1024)   # ~32 MiB on v7x, 64 MiB on v5e/v6e
_TILE_BUDGET = (3 * _VMEM_LIMIT) // 4                               # per-step working set incl. double buffering


def _pick_tile_n(n):
    for t in (512, 256, 128):
        if n % t == 0 and n >= t:
            return t
    return n


def _pick_tile_m(m, row_bytes, fixed_bytes=0):
    for t in (4096, 2048, 1024, 512, 256, 128, 64, 32, 16, 8):
        if m % t == 0 and m >= t and 2 * (t * row_bytes + fixed_bytes) <= _TILE_BUDGET:
            return t
    return m   # tiny M (2 / 6 / 12 in this model) -> single full block


# ---------------------------- Pallas kernels ----------------------------

def _apply_act(y, act):
    if act == "relu":
        return jnp.maximum(y, 0.0)
    if act == "tanh":
        return jnp.tanh(y)
    return y


def _matmul_act_kernel(a_ref, w_ref, o_ref, *, act):
    y = jnp.dot(a_ref[...], w_ref[...], preferred_element_type=jnp.float32)
    o_ref[...] = _apply_act(y, act)


def _matmul_bias_act_kernel(a_ref, w_ref, b_ref, o_ref, *, act):
    y = jnp.dot(a_ref[...], w_ref[...], preferred_element_type=jnp.float32) + b_ref[...]
    o_ref[...] = _apply_act(y, act)


def matmul_act(a, w, bias=None, act="none"):
    """o = act(a @ w [+ bias]);  a:(M,K)  w:(K,N)  bias:(1,N), all f32 -> (M,N) f32."""
    M, K = a.shape
    N = w.shape[1]
    tn = _pick_tile_n(N)
    row_bytes = K * a.dtype.itemsize + tn * 4
    fixed_bytes = K * tn * w.dtype.itemsize + (tn * 4 if bias is not None else 0)
    tm = _pick_tile_m(M, row_bytes, fixed_bytes)
    gm, gn = M // tm, N // tn

    in_specs = [pl.BlockSpec((tm, K), lambda i, j: (i, 0)),
                pl.BlockSpec((K, tn), lambda i, j: (0, j))]
    args = [a, w]
    if bias is not None:
        in_specs.append(pl.BlockSpec((1, tn), lambda i, j: (0, j)))
        args.append(bias)
        kern = functools.partial(_matmul_bias_act_kernel, act=act)
    else:
        kern = functools.partial(_matmul_act_kernel, act=act)

    return pl.pallas_call(
        kern,
        out_shape=jax.ShapeDtypeStruct((M, N), jnp.float32),
        grid_spec=pltpu.PrefetchScalarGridSpec(
            num_scalar_prefetch=0,
            grid=(gm, gn),
            in_specs=in_specs,
            out_specs=pl.BlockSpec((tm, tn), lambda i, j: (i, j)),
        ),
        compiler_params=pltpu.CompilerParams(
            dimension_semantics=("parallel", "parallel"),
            vmem_limit_bytes=_VMEM_LIMIT),
    )(*args)


def _convt_bn_relu_kernel(w_ref, p_ref, g_ref, b_ref, o_ref, *, cout, inv_count, eps):
    # y[(ph,pw,co), (b,h,w)]: sub-pixel conv-transpose output in transposed layout.
    y = jnp.dot(w_ref[...], p_ref[...], preferred_element_type=jnp.float32)
    # per-(parity, channel) batch sums along the lane (spatial) axis
    s = jnp.sum(y, axis=1, keepdims=True)            # (4*Cout, 1)
    q = jnp.sum(y * y, axis=1, keepdims=True)
    # reduce the 4 output parities (rows are parity-major) -> per-channel stats
    s_ch = s[0:cout] + s[cout:2 * cout] + s[2 * cout:3 * cout] + s[3 * cout:4 * cout]
    q_ch = q[0:cout] + q[cout:2 * cout] + q[2 * cout:3 * cout] + q[3 * cout:4 * cout]
    mu = s_ch * inv_count
    # training-mode (biased) batch variance; clamp guards E[y^2]-E[y]^2 cancellation
    var = jnp.maximum(q_ch * inv_count - mu * mu, 0.0)
    scale = g_ref[...] * jax.lax.rsqrt(var + eps)    # (Cout, 1)
    bias = b_ref[...] - mu * scale
    scale4 = jnp.concatenate([scale, scale, scale, scale], axis=0)   # (4*Cout, 1)
    bias4 = jnp.concatenate([bias, bias, bias, bias], axis=0)
    o_ref[...] = jnp.maximum(y * scale4 + bias4, 0.0)


# ------------------------- layer glue (layout only) -------------------------

_TAP = np.array([[3, 1, -1],     # output parity 0: kernel rows {3,1} over window rows {0,1}
                 [-1, 2, 0]],    # output parity 1: kernel rows {2,0} over window rows {1,2}
                np.int32)


def _make_subpixel_selector():
    sel = np.zeros((9, 4, 4, 4), np.float32)     # (tap, parity, kh, kw)
    for ph in range(2):
        for pw in range(2):
            for dh in range(3):
                for dw in range(3):
                    kh, kw = int(_TAP[ph, dh]), int(_TAP[pw, dw])
                    if kh >= 0 and kw >= 0:
                        sel[dh * 3 + dw, ph * 2 + pw, kh, kw] = 1.0
    return sel


_SEL = _make_subpixel_selector()


def _convt_patchesT(x):
    """3x3 windows of the (pad=1) input, transposed: (Cin*9, B*H*W) f32."""
    B, C, H, W = x.shape
    xp = jnp.pad(x, ((0, 0), (0, 0), (1, 1), (1, 1)))
    slabs = [xp[:, :, dh:dh + H, dw:dw + W] for dh in range(3) for dw in range(3)]
    pats = jnp.stack(slabs, axis=2)              # (B, C, 9, H, W), tap = dh*3+dw
    pats = pats.transpose(1, 2, 0, 3, 4)         # (C, 9, B, H, W)
    return pats.reshape(C * 9, B * H * W)


def _convt_weight_matT(wt):
    """PyTorch ConvTranspose2d weight (Cin, Cout, 4, 4) -> (4*Cout, Cin*9).
    Rows ordered (ph, pw, cout); cols ordered (cin, dh, dw)."""
    Cin, Cout = wt.shape[0], wt.shape[1]
    w = jnp.einsum('cokl,tpkl->poct', wt, jnp.asarray(_SEL))   # (4, Cout, Cin, 9)
    return w.reshape(4 * Cout, Cin * 9)


def convt_bn_relu(x, wt, gamma, beta, eps=1e-5):
    """ConvTranspose2d(4,2,1,bias=False) + BatchNorm2d(train) + ReLU, fused."""
    B, Cin, H, W = x.shape
    Cout = wt.shape[1]
    M = B * H * W
    K = Cin * 9
    N = 4 * Cout
    patsT = _convt_patchesT(x)                   # (K, M)
    wmatT = _convt_weight_matT(wt)               # (N, K)

    need = 4 * 2 * (N * K + K * M + N * M)
    if need > _TILE_BUDGET:
        # TODO(synk): tile over M with a two-pass BN (stats then normalize) for large configs.
        raise NotImplementedError("layer too large for single-block fused BN kernel")

    kern = functools.partial(_convt_bn_relu_kernel, cout=Cout,
                             inv_count=1.0 / float(4 * M), eps=eps)
    y = pl.pallas_call(
        kern,
        out_shape=jax.ShapeDtypeStruct((N, M), jnp.float32),
        grid_spec=pltpu.PrefetchScalarGridSpec(
            num_scalar_prefetch=0,
            grid=(1,),
            in_specs=[
                pl.BlockSpec((N, K), lambda i: (0, 0)),
                pl.BlockSpec((K, M), lambda i: (0, 0)),
                pl.BlockSpec((Cout, 1), lambda i: (0, 0)),
                pl.BlockSpec((Cout, 1), lambda i: (0, 0)),
            ],
            out_specs=pl.BlockSpec((N, M), lambda i: (0, 0)),
        ),
        compiler_params=pltpu.CompilerParams(
            dimension_semantics=("arbitrary",),
            vmem_limit_bytes=_VMEM_LIMIT),
    )(wmatT, patsT, gamma.reshape(Cout, 1), beta.reshape(Cout, 1))

    # pixel-shuffle back to NCHW (pure relayout, left to XLA)
    out = y.reshape(2, 2, Cout, B, H, W).transpose(3, 2, 4, 0, 5, 1)
    return out.reshape(B, Cout, 2 * H, 2 * W)


def convt_tanh(x, wt):
    """ConvTranspose2d(4,2,1,bias=False) + Tanh; lanes = B*H*W (lane-dense stores)."""
    B, Cin, H, W = x.shape
    Cout = wt.shape[1]
    patsT = _convt_patchesT(x)                   # (Cin*9, B*H*W)
    wmatT = _convt_weight_matT(wt)               # (4*Cout, Cin*9)
    yT = matmul_act(wmatT, patsT, act="tanh")    # (4*Cout, B*H*W)
    out = yT.reshape(2, 2, Cout, B, H, W).transpose(3, 2, 4, 0, 5, 1)
    return out.reshape(B, Cout, 2 * H, 2 * W)


def _src_index(in_size, out_size):
    """PyTorch bilinear align_corners=False source indices / weights (static)."""
    o = np.arange(out_size, dtype=np.float64)
    src = np.maximum((o + 0.5) * (in_size / out_size) - 0.5, 0.0)
    i0 = np.minimum(np.floor(src).astype(np.int64), in_size - 1)
    i1 = np.minimum(i0 + 1, in_size - 1)
    lam = (src - i0).astype(np.float32)
    return i0, i1, lam


def _interp_matrix(in_size, out_size):
    i0, i1, lam = _src_index(in_size, out_size)
    m = np.zeros((out_size, in_size), np.float32)
    r = np.arange(out_size)
    m[r, i0] += 1.0 - lam
    m[r, i1] += lam
    return m


def bilinear_resize(x, out_h, out_w):
    """(B,C,H,W) -> (B,C,out_h,out_w), bilinear align_corners=False.
    Separable: out = Ry @ x @ Rx^T as two lane-contracting Pallas matmuls."""
    B, C, H, W = x.shape
    if (out_h, out_w) == (H, W):
        return x
    rx_t = jnp.asarray(_interp_matrix(W, out_w).T)        # (W, out_w)
    ry_t = jnp.asarray(_interp_matrix(H, out_h).T)        # (H, out_h)
    t = matmul_act(x.reshape(B * C * H, W), rx_t)         # interp along W
    t = t.reshape(B, C, H, out_w).transpose(0, 1, 3, 2)   # (B,C,OW,H) small XLA relayout
    o = matmul_act(t.reshape(B * C * out_w, H), ry_t)     # interp along H
    return o.reshape(B, C, out_w, out_h).transpose(0, 1, 3, 2)


# ------------------------------ Generator ------------------------------

def init_params(key, num_noises, num_colors, depths, final_size):
    d = depths
    lin_out = d * 8 * final_size * final_size
    ks = jax.random.split(key, 16)
    p = {}
    p["lin_w"] = 0.05 * jax.random.normal(ks[0], (lin_out, num_noises), jnp.float32)
    p["lin_b"] = 0.05 * jax.random.normal(ks[1], (lin_out,), jnp.float32)

    def convw(k, cin, cout):
        return 0.02 * jax.random.normal(k, (cin, cout, 4, 4), jnp.float32)

    p["w1"] = convw(ks[2], d * 8, d * 4)
    p["w2"] = convw(ks[3], d * 4, d * 2)
    p["w3"] = convw(ks[4], d * 2, d)
    p["w4"] = convw(ks[5], d * 2 + d, d)
    p["w5"] = convw(ks[6], d, num_colors)
    for name, c, ki in (("1", d * 4, 7), ("2", d * 2, 8), ("3", d, 9), ("4", d, 10)):
        p["g" + name] = 1.0 + 0.1 * jax.random.normal(ks[ki], (c,), jnp.float32)
        p["b" + name] = 0.1 * jax.random.normal(ks[ki + 4], (c,), jnp.float32)
    return p


def generator_forward(x, p, *, depths, final_size):
    # Linear
    lin = matmul_act(x, p["lin_w"].T, bias=p["lin_b"][None, :], act="none")
    h = lin.reshape(-1, depths * 8, final_size, final_size)
    # ConvTranspose + BN + ReLU chain (each layer = one fused Pallas kernel)
    c1 = convt_bn_relu(h, p["w1"], p["g1"], p["b1"])
    c2 = convt_bn_relu(c1, p["w2"], p["g2"], p["b2"])
    c3 = convt_bn_relu(c2, p["w3"], p["g3"], p["b3"])
    # skip connection: bilinear resize conv2_out to conv3_out spatial size, concat channels
    r2 = bilinear_resize(c2, c3.shape[2], c3.shape[3])
    cat = jnp.concatenate([c3, r2], axis=1)
    c4 = convt_bn_relu(cat, p["w4"], p["g4"], p["b4"])
    c5 = convt_tanh(c4, p["w5"])
    # final interpolate is hardcoded to (64, 64) in the reference module
    return bilinear_resize(c5, 64, 64)


if __name__ == "__main__":
    # Small config consistent with the module's constraints (image_size % 16 == 0).
    num_noises, num_colors, depths, image_size = 16, 3, 8, 16
    final_size = image_size // 16
    batch = 2

    key = jax.random.PRNGKey(0)
    kp, kx = jax.random.split(key)
    params = init_params(kp, num_noises, num_colors, depths, final_size)
    x = jax.random.normal(kx, (batch, num_noises), jnp.float32)

    fwd = jax.jit(functools.partial(generator_forward,
                                    depths=depths, final_size=final_size))
    out = jax.block_until_ready(fwd(x, params))

    assert out.shape == (batch, num_colors, 64, 64), out.shape
    assert bool(jnp.all(jnp.isfinite(out)))
    print("KERNEL_OK")
</pallas_src>

<mosaic_0001>
module attributes {stable_mosaic.version = 11 : i64} {
  func.func @_matmul_bias_act_kernel(%arg0: i32, %arg1: i32, %arg2: memref<2x16xf32, #tpu.memory_space<vmem>>, %arg3: memref<16x64xf32, #tpu.memory_space<vmem>>, %arg4: memref<1x64xf32, #tpu.memory_space<vmem>>, %arg5: memref<2x64xf32, #tpu.memory_space<vmem>>) attributes {dimension_semantics = [#tpu.dimension_semantics<parallel>, #tpu.dimension_semantics<parallel>], iteration_bounds = array<i64: 1, 1>, scalar_prefetch = 0 : i64, scratch_operands = 0 : i64, tpu.core_type = #tpu.core_type<tc>, window_params = [{transform_indices = @transform_0, window_bounds = array<i64: 2, 16>}, {transform_indices = @transform_1, window_bounds = array<i64: 16, 64>}, {transform_indices = @transform_2, window_bounds = array<i64: 1, 64>}, {transform_indices = @transform_3, window_bounds = array<i64: 2, 64>}]} {
    %c0 = arith.constant 0 : index
    %c0_0 = arith.constant 0 : index
    %0 = vector.load %arg2[%c0, %c0_0] : memref<2x16xf32, #tpu.memory_space<vmem>>, vector<2x16xf32>
    %c0_1 = arith.constant 0 : index
    %c0_2 = arith.constant 0 : index
    %1 = vector.load %arg3[%c0_1, %c0_2] : memref<16x64xf32, #tpu.memory_space<vmem>>, vector<16x64xf32>
    %cst = arith.constant dense<0.000000e+00> : vector<2x64xf32>
    %2 = tpu.matmul %0, %1, %cst {dimension_numbers = #tpu.dot_dimension_numbers<[1], [0], [0], [1], [0, 0, 1, 1], [], []>} : vector<2x16xf32>, vector<16x64xf32>, vector<2x64xf32> -> vector<2x64xf32>
    %c0_3 = arith.constant 0 : index
    %c0_4 = arith.constant 0 : index
    %3 = vector.load %arg4[%c0_3, %c0_4] : memref<1x64xf32, #tpu.memory_space<vmem>>, vector<1x64xf32>
    %4 = vector.broadcast %3 : vector<1x64xf32> to vector<2x64xf32>
    %5 = arith.addf %2, %4 : vector<2x64xf32>
    %c0_5 = arith.constant 0 : index
    %c0_6 = arith.constant 0 : index
    %6 = vector.load %arg5[%c0_5, %c0_6] : memref<2x64xf32, #tpu.memory_space<vmem>>, vector<2x64xf32>
    tpu.vector_store %arg5[%c0_5, %c0_6], %5 {strides = array<i32>} : memref<2x64xf32, #tpu.memory_space<vmem>>, vector<2x64xf32>,
    return
  }
  func.func @transform_0(%arg0: i32, %arg1: i32) -> (i32, i32) {
    %c0_i32 = arith.constant 0 : i32
    %c0_i32_0 = arith.constant 0 : i32
    return %arg0, %c0_i32 : i32, i32
  }
  func.func @transform_1(%arg0: i32, %arg1: i32) -> (i32, i32) {
    %c0_i32 = arith.constant 0 : i32
    %c0_i32_0 = arith.constant 0 : i32
    return %c0_i32, %arg1 : i32, i32
  }
  func.func @transform_2(%arg0: i32, %arg1: i32) -> (i32, i32) {
    %c0_i32 = arith.constant 0 : i32
    %c0_i32_0 = arith.constant 0 : i32
    return %c0_i32, %arg1 : i32, i32
  }
  func.func @transform_3(%arg0: i32, %arg1: i32) -> (i32, i32) {
    %c0_i32 = arith.constant 0 : i32
    return %arg0, %arg1 : i32, i32
  }
}

module attributes {stable_mosaic.version = 11 : i64} {
  func.func @_convt_bn_relu_kernel(%arg0: i32, %arg1: memref<128x576xf32, #tpu.memory_space<vmem>>, %arg2: memref<576x2xf32, #tpu.memory_space<vmem>>, %arg3: memref<32x1xf32, #tpu.memory_space<vmem>>, %arg4: memref<32x1xf32, #tpu.memory_space<vmem>>, %arg5: memref<128x2xf32, #tpu.memory_space<vmem>>) attributes {dimension_semantics = [#tpu.dimension_semantics<arbitrary>], iteration_bounds = array<i64: 1>, scalar_prefetch = 0 : i64, scratch_operands = 0 : i64, tpu.core_type = #tpu.core_type<tc>, window_params = [{pipeline_mode = #tpu.pipeline_mode<synchronous>, transform_indices = @transform_0, window_bounds = array<i64: 128, 576>}, {pipeline_mode = #tpu.pipeline_mode<synchronous>, transform_indices = @transform_1, window_bounds = array<i64: 576, 2>}, {pipeline_mode = #tpu.pipeline_mode<synchronous>, transform_indices = @transform_2, window_bounds = array<i64: 32, 1>}, {pipeline_mode = #tpu.pipeline_mode<synchronous>, transform_indices = @transform_3, window_bounds = array<i64: 32, 1>}, {pipeline_mode = #tpu.pipeline_mode<synchronous>, transform_indices = @transform_4, window_bounds = array<i64: 128, 2>}]} {
    %c0 = arith.constant 0 : index
    %c0_0 = arith.constant 0 : index
    %0 = vector.load %arg1[%c0, %c0_0] : memref<128x576xf32, #tpu.memory_space<vmem>>, vector<128x576xf32>
    %c0_1 = arith.constant 0 : index
    %c0_2 = arith.constant 0 : index
    %1 = vector.load %arg2[%c0_1, %c0_2] : memref<576x2xf32, #tpu.memory_space<vmem>>, vector<576x2xf32>
    %cst = arith.constant dense<0.000000e+00> : vector<128x2xf32>
    %2 = tpu.matmul %0, %1, %cst {dimension_numbers = #tpu.dot_dimension_numbers<[1], [0], [0], [1], [0, 0, 1, 1], [], []>} : vector<128x576xf32>, vector<576x2xf32>, vector<128x2xf32> -> vector<128x2xf32>
    %cst_3 = arith.constant dense<0.000000e+00> : vector<128xf32>
    %3 = vector.multi_reduction <add>, %2, %cst_3 [1] : vector<128x2xf32> to vector<128xf32>
    %4 = vector.shape_cast %3 : vector<128xf32> to vector<128x1xf32>
    %5 = arith.mulf %2, %2 : vector<128x2xf32>
    %cst_4 = arith.constant dense<0.000000e+00> : vector<128xf32>
    %6 = vector.multi_reduction <add>, %5, %cst_4 [1] : vector<128x2xf32> to vector<128xf32>
    %7 = vector.shape_cast %6 : vector<128xf32> to vector<128x1xf32>
    %8 = vector.extract_strided_slice %4 {offsets = [0, 0], sizes = [32, 1], strides = [1, 1]} : vector<128x1xf32> to vector<32x1xf32>
    %9 = vector.extract_strided_slice %4 {offsets = [32, 0], sizes = [32, 1], strides = [1, 1]} : vector<128x1xf32> to vector<32x1xf32>
    %10 = arith.addf %8, %9 : vector<32x1xf32>
    %11 = vector.extract_strided_slice %4 {offsets = [64, 0], sizes = [32, 1], strides = [1, 1]} : vector<128x1xf32> to vector<32x1xf32>
    %12 = arith.addf %10, %11 : vector<32x1xf32>
    %13 = vector.extract_strided_slice %4 {offsets = [96, 0], sizes = [32, 1], strides = [1, 1]} : vector<128x1xf32> to vector<32x1xf32>
    %14 = arith.addf %12, %13 : vector<32x1xf32>
    %15 = vector.extract_strided_slice %7 {offsets = [0, 0], sizes = [32, 1], strides = [1, 1]} : vector<128x1xf32> to vector<32x1xf32>
    %16 = vector.extract_strided_slice %7 {offsets = [32, 0], sizes = [32, 1], strides = [1, 1]} : vector<128x1xf32> to vector<32x1xf32>
    %17 = arith.addf %15, %16 : vector<32x1xf32>
    %18 = vector.extract_strided_slice %7 {offsets = [64, 0], sizes = [32, 1], strides = [1, 1]} : vector<128x1xf32> to vector<32x1xf32>
    %19 = arith.addf %17, %18 : vector<32x1xf32>
    %20 = vector.extract_strided_slice %7 {offsets = [96, 0], sizes = [32, 1], strides = [1, 1]} : vector<128x1xf32> to vector<32x1xf32>
    %21 = arith.addf %19, %20 : vector<32x1xf32>
    %cst_5 = arith.constant 1.250000e-01 : f32
    %22 = vector.broadcast %cst_5 : f32 to vector<32x1xf32>
    %23 = arith.mulf %14, %22 : vector<32x1xf32>
    %cst_6 = arith.constant 1.250000e-01 : f32
    %24 = vector.broadcast %cst_6 : f32 to vector<32x1xf32>
    %25 = arith.mulf %21, %24 : vector<32x1xf32>
    %26 = arith.mulf %23, %23 : vector<32x1xf32>
    %27 = arith.subf %25, %26 : vector<32x1xf32>
    %cst_7 = arith.constant 0.000000e+00 : f32
    %28 = vector.broadcast %cst_7 : f32 to vector<32x1xf32>
    %29 = arith.maximumf %27, %28 : vector<32x1xf32>
    %c0_8 = arith.constant 0 : index
    %c0_9 = arith.constant 0 : index
    %30 = vector.load %arg3[%c0_8, %c0_9] : memref<32x1xf32, #tpu.memory_space<vmem>>, vector<32x1xf32>
    %cst_10 = arith.constant 9.99999974E-6 : f32
    %31 = vector.broadcast %cst_10 : f32 to vector<32x1xf32>
    %32 = arith.addf %29, %31 : vector<32x1xf32>
    %33 = math.rsqrt %32 : vector<32x1xf32>
    %34 = arith.mulf %30, %33 : vector<32x1xf32>
    %c0_11 = arith.constant 0 : index
    %c0_12 = arith.constant 0 : index
    %35 = vector.load %arg4[%c0_11, %c0_12] : memref<32x1xf32, #tpu.memory_space<vmem>>, vector<32x1xf32>
    %36 = arith.mulf %23, %34 : vector<32x1xf32>
    %37 = arith.subf %35, %36 : vector<32x1xf32>
    %38 = tpu.concatenate %34, %34, %34, %34 in 0 : vector<32x1xf32>, vector<32x1xf32>, vector<32x1xf32>, vector<32x1xf32> -> vector<128x1xf32>
    %39 = tpu.concatenate %37, %37, %37, %37 in 0 : vector<32x1xf32>, vector<32x1xf32>, vector<32x1xf32>, vector<32x1xf32> -> vector<128x1xf32>
    %40 = vector.broadcast %38 : vector<128x1xf32> to vector<128x2xf32>
    %41 = arith.mulf %2, %40 : vector<128x2xf32>
    %42 = vector.broadcast %39 : vector<128x1xf32> to vector<128x2xf32>
    %43 = arith.addf %41, %42 : vector<128x2xf32>
    %cst_13 = arith.constant 0.000000e+00 : f32
    %44 = vector.broadcast %cst_13 : f32 to vector<128x2xf32>
    %45 = arith.maximumf %43, %44 : vector<128x2xf32>
    %c0_14 = arith.constant 0 : index
    %c0_15 = arith.constant 0 : index
    %46 = vector.load %arg5[%c0_14, %c0_15] : memref<128x2xf32, #tpu.memory_space<vmem>>, vector<128x2xf32>
    tpu.vector_store %arg5[%c0_14, %c0_15], %45 {strides = array<i32>} : memref<128x2xf32, #tpu.memory_space<vmem>>, vector<128x2xf32>,
    return
  }
  func.func @transform_0(%arg0: i32) -> (i32, i32) {
    %c0_i32 = arith.constant 0 : i32
    %c0_i32_0 = arith.constant 0 : i32
    %c0_i32_1 = arith.constant 0 : i32
    return %c0_i32, %c0_i32_0 : i32, i32
  }
  func.func @transform_1(%arg0: i32) -> (i32, i32) {
    %c0_i32 = arith.constant 0 : i32
    %c0_i32_0 = arith.constant 0 : i32
    %c0_i32_1 = arith.constant 0 : i32
    return %c0_i32, %c0_i32_0 : i32, i32
  }
  func.func @transform_2(%arg0: i32) -> (i32, i32) {
    %c0_i32 = arith.constant 0 : i32
    %c0_i32_0 = arith.constant 0 : i32
    %c0_i32_1 = arith.constant 0 : i32
    return %c0_i32, %c0_i32_0 : i32, i32
  }
  func.func @transform_3(%arg0: i32) -> (i32, i32) {
    %c0_i32 = arith.constant 0 : i32
    %c0_i32_0 = arith.constant 0 : i32
    %c0_i32_1 = arith.constant 0 : i32
    return %c0_i32, %c0_i32_0 : i32, i32
  }
  func.func @transform_4(%arg0: i32) -> (i32, i32) {
    %c0_i32 = arith.constant 0 : i32
    %c0_i32_0 = arith.constant 0 : i32
    %c0_i32_1 = arith.constant 0 : i32
    return %c0_i32, %c0_i32_0 : i32, i32
  }
}

module attributes {stable_mosaic.version = 11 : i64} {
  func.func @_convt_bn_relu_kernel(%arg0: i32, %arg1: memref<64x288xf32, #tpu.memory_space<vmem>>, %arg2: memref<288x8xf32, #tpu.memory_space<vmem>>, %arg3: memref<16x1xf32, #tpu.memory_space<vmem>>, %arg4: memref<16x1xf32, #tpu.memory_space<vmem>>, %arg5: memref<64x8xf32, #tpu.memory_space<vmem>>) attributes {dimension_semantics = [#tpu.dimension_semantics<arbitrary>], iteration_bounds = array<i64: 1>, scalar_prefetch = 0 : i64, scratch_operands = 0 : i64, tpu.core_type = #tpu.core_type<tc>, window_params = [{pipeline_mode = #tpu.pipeline_mode<synchronous>, transform_indices = @transform_0, window_bounds = array<i64: 64, 288>}, {pipeline_mode = #tpu.pipeline_mode<synchronous>, transform_indices = @transform_1, window_bounds = array<i64: 288, 8>}, {pipeline_mode = #tpu.pipeline_mode<synchronous>, transform_indices = @transform_2, window_bounds = array<i64: 16, 1>}, {pipeline_mode = #tpu.pipeline_mode<synchronous>, transform_indices = @transform_3, window_bounds = array<i64: 16, 1>}, {pipeline_mode = #tpu.pipeline_mode<synchronous>, transform_indices = @transform_4, window_bounds = array<i64: 64, 8>}]} {
    %c0 = arith.constant 0 : index
    %c0_0 = arith.constant 0 : index
    %0 = vector.load %arg1[%c0, %c0_0] : memref<64x288xf32, #tpu.memory_space<vmem>>, vector<64x288xf32>
    %c0_1 = arith.constant 0 : index
    %c0_2 = arith.constant 0 : index
    %1 = vector.load %arg2[%c0_1, %c0_2] : memref<288x8xf32, #tpu.memory_space<vmem>>, vector<288x8xf32>
    %cst = arith.constant dense<0.000000e+00> : vector<64x8xf32>
    %2 = tpu.matmul %0, %1, %cst {dimension_numbers = #tpu.dot_dimension_numbers<[1], [0], [0], [1], [0, 0, 1, 1], [], []>} : vector<64x288xf32>, vector<288x8xf32>, vector<64x8xf32> -> vector<64x8xf32>
    %cst_3 = arith.constant dense<0.000000e+00> : vector<64xf32>
    %3 = vector.multi_reduction <add>, %2, %cst_3 [1] : vector<64x8xf32> to vector<64xf32>
    %4 = vector.shape_cast %3 : vector<64xf32> to vector<64x1xf32>
    %5 = arith.mulf %2, %2 : vector<64x8xf32>
    %cst_4 = arith.constant dense<0.000000e+00> : vector<64xf32>
    %6 = vector.multi_reduction <add>, %5, %cst_4 [1] : vector<64x8xf32> to vector<64xf32>
    %7 = vector.shape_cast %6 : vector<64xf32> to vector<64x1xf32>
    %8 = vector.extract_strided_slice %4 {offsets = [0, 0], sizes = [16, 1], strides = [1, 1]} : vector<64x1xf32> to vector<16x1xf32>
    %9 = vector.extract_strided_slice %4 {offsets = [16, 0], sizes = [16, 1], strides = [1, 1]} : vector<64x1xf32> to vector<16x1xf32>
    %10 = arith.addf %8, %9 : vector<16x1xf32>
    %11 = vector.extract_strided_slice %4 {offsets = [32, 0], sizes = [16, 1], strides = [1, 1]} : vector<64x1xf32> to vector<16x1xf32>
    %12 = arith.addf %10, %11 : vector<16x1xf32>
    %13 = vector.extract_strided_slice %4 {offsets = [48, 0], sizes = [16, 1], strides = [1, 1]} : vector<64x1xf32> to vector<16x1xf32>
    %14 = arith.addf %12, %13 : vector<16x1xf32>
    %15 = vector.extract_strided_slice %7 {offsets = [0, 0], sizes = [16, 1], strides = [1, 1]} : vector<64x1xf32> to vector<16x1xf32>
    %16 = vector.extract_strided_slice %7 {offsets = [16, 0], sizes = [16, 1], strides = [1, 1]} : vector<64x1xf32> to vector<16x1xf32>
    %17 = arith.addf %15, %16 : vector<16x1xf32>
    %18 = vector.extract_strided_slice %7 {offsets = [32, 0], sizes = [16, 1], strides = [1, 1]} : vector<64x1xf32> to vector<16x1xf32>
    %19 = arith.addf %17, %18 : vector<16x1xf32>
    %20 = vector.extract_strided_slice %7 {offsets = [48, 0], sizes = [16, 1], strides = [1, 1]} : vector<64x1xf32> to vector<16x1xf32>
    %21 = arith.addf %19, %20 : vector<16x1xf32>
    %cst_5 = arith.constant 3.125000e-02 : f32
    %22 = vector.broadcast %cst_5 : f32 to vector<16x1xf32>
    %23 = arith.mulf %14, %22 : vector<16x1xf32>
    %cst_6 = arith.constant 3.125000e-02 : f32
    %24 = vector.broadcast %cst_6 : f32 to vector<16x1xf32>
    %25 = arith.mulf %21, %24 : vector<16x1xf32>
    %26 = arith.mulf %23, %23 : vector<16x1xf32>
    %27 = arith.subf %25, %26 : vector<16x1xf32>
    %cst_7 = arith.constant 0.000000e+00 : f32
    %28 = vector.broadcast %cst_7 : f32 to vector<16x1xf32>
    %29 = arith.maximumf %27, %28 : vector<16x1xf32>
    %c0_8 = arith.constant 0 : index
    %c0_9 = arith.constant 0 : index
    %30 = vector.load %arg3[%c0_8, %c0_9] : memref<16x1xf32, #tpu.memory_space<vmem>>, vector<16x1xf32>
    %cst_10 = arith.constant 9.99999974E-6 : f32
    %31 = vector.broadcast %cst_10 : f32 to vector<16x1xf32>
    %32 = arith.addf %29, %31 : vector<16x1xf32>
    %33 = math.rsqrt %32 : vector<16x1xf32>
    %34 = arith.mulf %30, %33 : vector<16x1xf32>
    %c0_11 = arith.constant 0 : index
    %c0_12 = arith.constant 0 : index
    %35 = vector.load %arg4[%c0_11, %c0_12] : memref<16x1xf32, #tpu.memory_space<vmem>>, vector<16x1xf32>
    %36 = arith.mulf %23, %34 : vector<16x1xf32>
    %37 = arith.subf %35, %36 : vector<16x1xf32>
    %38 = tpu.concatenate %34, %34, %34, %34 in 0 : vector<16x1xf32>, vector<16x1xf32>, vector<16x1xf32>, vector<16x1xf32> -> vector<64x1xf32>
    %39 = tpu.concatenate %37, %37, %37, %37 in 0 : vector<16x1xf32>, vector<16x1xf32>, vector<16x1xf32>, vector<16x1xf32> -> vector<64x1xf32>
    %40 = vector.broadcast %38 : vector<64x1xf32> to vector<64x8xf32>
    %41 = arith.mulf %2, %40 : vector<64x8xf32>
    %42 = vector.broadcast %39 : vector<64x1xf32> to vector<64x8xf32>
    %43 = arith.addf %41, %42 : vector<64x8xf32>
    %cst_13 = arith.constant 0.000000e+00 : f32
    %44 = vector.broadcast %cst_13 : f32 to vector<64x8xf32>
    %45 = arith.maximumf %43, %44 : vector<64x8xf32>
    %c0_14 = arith.constant 0 : index
    %c0_15 = arith.constant 0 : index
    %46 = vector.load %arg5[%c0_14, %c0_15] : memref<64x8xf32, #tpu.memory_space<vmem>>, vector<64x8xf32>
    tpu.vector_store %arg5[%c0_14, %c0_15], %45 {strides = array<i32>} : memref<64x8xf32, #tpu.memory_space<vmem>>, vector<64x8xf32>,
    return
  }
  func.func @transform_0(%arg0: i32) -> (i32, i32) {
    %c0_i32 = arith.constant 0 : i32
    %c0_i32_0 = arith.constant 0 : i32
    %c0_i32_1 = arith.constant 0 : i32
    return %c0_i32, %c0_i32_0 : i32, i32
  }
  func.func @transform_1(%arg0: i32) -> (i32, i32) {
    %c0_i32 = arith.constant 0 : i32
    %c0_i32_0 = arith.constant 0 : i32
    %c0_i32_1 = arith.constant 0 : i32
    return %c0_i32, %c0_i32_0 : i32, i32
  }
  func.func @transform_2(%arg0: i32) -> (i32, i32) {
    %c0_i32 = arith.constant 0 : i32
    %c0_i32_0 = arith.constant 0 : i32
    %c0_i32_1 = arith.constant 0 : i32
    return %c0_i32, %c0_i32_0 : i32, i32
  }
  func.func @transform_3(%arg0: i32) -> (i32, i32) {
    %c0_i32 = arith.constant 0 : i32
    %c0_i32_0 = arith.constant 0 : i32
    %c0_i32_1 = arith.constant 0 : i32
    return %c0_i32, %c0_i32_0 : i32, i32
  }
  func.func @transform_4(%arg0: i32) -> (i32, i32) {
    %c0_i32 = arith.constant 0 : i32
    %c0_i32_0 = arith.constant 0 : i32
    %c0_i32_1 = arith.constant 0 : i32
    return %c0_i32, %c0_i32_0 : i32, i32
  }
}

module attributes {stable_mosaic.version = 11 : i64} {
  func.func @_convt_bn_relu_kernel(%arg0: i32, %arg1: memref<32x144xf32, #tpu.memory_space<vmem>>, %arg2: memref<144x32xf32, #tpu.memory_space<vmem>>, %arg3: memref<8x1xf32, #tpu.memory_space<vmem>>, %arg4: memref<8x1xf32, #tpu.memory_space<vmem>>, %arg5: memref<32x32xf32, #tpu.memory_space<vmem>>) attributes {dimension_semantics = [#tpu.dimension_semantics<arbitrary>], iteration_bounds = array<i64: 1>, scalar_prefetch = 0 : i64, scratch_operands = 0 : i64, tpu.core_type = #tpu.core_type<tc>, window_params = [{pipeline_mode = #tpu.pipeline_mode<synchronous>, transform_indices = @transform_0, window_bounds = array<i64: 32, 144>}, {pipeline_mode = #tpu.pipeline_mode<synchronous>, transform_indices = @transform_1, window_bounds = array<i64: 144, 32>}, {pipeline_mode = #tpu.pipeline_mode<synchronous>, transform_indices = @transform_2, window_bounds = array<i64: 8, 1>}, {pipeline_mode = #tpu.pipeline_mode<synchronous>, transform_indices = @transform_3, window_bounds = array<i64: 8, 1>}, {pipeline_mode = #tpu.pipeline_mode<synchronous>, transform_indices = @transform_4, window_bounds = array<i64: 32, 32>}]} {
    %c0 = arith.constant 0 : index
    %c0_0 = arith.constant 0 : index
    %0 = vector.load %arg1[%c0, %c0_0] : memref<32x144xf32, #tpu.memory_space<vmem>>, vector<32x144xf32>
    %c0_1 = arith.constant 0 : index
    %c0_2 = arith.constant 0 : index
    %1 = vector.load %arg2[%c0_1, %c0_2] : memref<144x32xf32, #tpu.memory_space<vmem>>, vector<144x32xf32>
    %cst = arith.constant dense<0.000000e+00> : vector<32x32xf32>
    %2 = tpu.matmul %0, %1, %cst {dimension_numbers = #tpu.dot_dimension_numbers<[1], [0], [0], [1], [0, 0, 1, 1], [], []>} : vector<32x144xf32>, vector<144x32xf32>, vector<32x32xf32> -> vector<32x32xf32>
    %cst_3 = arith.constant dense<0.000000e+00> : vector<32xf32>
    %3 = vector.multi_reduction <add>, %2, %cst_3 [1] : vector<32x32xf32> to vector<32xf32>
    %4 = vector.shape_cast %3 : vector<32xf32> to vector<32x1xf32>
    %5 = arith.mulf %2, %2 : vector<32x32xf32>
    %cst_4 = arith.constant dense<0.000000e+00> : vector<32xf32>
    %6 = vector.multi_reduction <add>, %5, %cst_4 [1] : vector<32x32xf32> to vector<32xf32>
    %7 = vector.shape_cast %6 : vector<32xf32> to vector<32x1xf32>
    %8 = vector.extract_strided_slice %4 {offsets = [0, 0], sizes = [8, 1], strides = [1, 1]} : vector<32x1xf32> to vector<8x1xf32>
    %9 = vector.extract_strided_slice %4 {offsets = [8, 0], sizes = [8, 1], strides = [1, 1]} : vector<32x1xf32> to vector<8x1xf32>
    %10 = arith.addf %8, %9 : vector<8x1xf32>
    %11 = vector.extract_strided_slice %4 {offsets = [16, 0], sizes = [8, 1], strides = [1, 1]} : vector<32x1xf32> to vector<8x1xf32>
    %12 = arith.addf %10, %11 : vector<8x1xf32>
    %13 = vector.extract_strided_slice %4 {offsets = [24, 0], sizes = [8, 1], strides = [1, 1]} : vector<32x1xf32> to vector<8x1xf32>
    %14 = arith.addf %12, %13 : vector<8x1xf32>
    %15 = vector.extract_strided_slice %7 {offsets = [0, 0], sizes = [8, 1], strides = [1, 1]} : vector<32x1xf32> to vector<8x1xf32>
    %16 = vector.extract_strided_slice %7 {offsets = [8, 0], sizes = [8, 1], strides = [1, 1]} : vector<32x1xf32> to vector<8x1xf32>
    %17 = arith.addf %15, %16 : vector<8x1xf32>
    %18 = vector.extract_strided_slice %7 {offsets = [16, 0], sizes = [8, 1], strides = [1, 1]} : vector<32x1xf32> to vector<8x1xf32>
    %19 = arith.addf %17, %18 : vector<8x1xf32>
    %20 = vector.extract_strided_slice %7 {offsets = [24, 0], sizes = [8, 1], strides = [1, 1]} : vector<32x1xf32> to vector<8x1xf32>
    %21 = arith.addf %19, %20 : vector<8x1xf32>
    %cst_5 = arith.constant 7.812500e-03 : f32
    %22 = vector.broadcast %cst_5 : f32 to vector<8x1xf32>
    %23 = arith.mulf %14, %22 : vector<8x1xf32>
    %cst_6 = arith.constant 7.812500e-03 : f32
    %24 = vector.broadcast %cst_6 : f32 to vector<8x1xf32>
    %25 = arith.mulf %21, %24 : vector<8x1xf32>
    %26 = arith.mulf %23, %23 : vector<8x1xf32>
    %27 = arith.subf %25, %26 : vector<8x1xf32>
    %cst_7 = arith.constant 0.000000e+00 : f32
    %28 = vector.broadcast %cst_7 : f32 to vector<8x1xf32>
    %29 = arith.maximumf %27, %28 : vector<8x1xf32>
    %c0_8 = arith.constant 0 : index
    %c0_9 = arith.constant 0 : index
    %30 = vector.load %arg3[%c0_8, %c0_9] : memref<8x1xf32, #tpu.memory_space<vmem>>, vector<8x1xf32>
    %cst_10 = arith.constant 9.99999974E-6 : f32
    %31 = vector.broadcast %cst_10 : f32 to vector<8x1xf32>
    %32 = arith.addf %29, %31 : vector<8x1xf32>
    %33 = math.rsqrt %32 : vector<8x1xf32>
    %34 = arith.mulf %30, %33 : vector<8x1xf32>
    %c0_11 = arith.constant 0 : index
    %c0_12 = arith.constant 0 : index
    %35 = vector.load %arg4[%c0_11, %c0_12] : memref<8x1xf32, #tpu.memory_space<vmem>>, vector<8x1xf32>
    %36 = arith.mulf %23, %34 : vector<8x1xf32>
    %37 = arith.subf %35, %36 : vector<8x1xf32>
    %38 = tpu.concatenate %34, %34, %34, %34 in 0 : vector<8x1xf32>, vector<8x1xf32>, vector<8x1xf32>, vector<8x1xf32> -> vector<32x1xf32>
    %39 = tpu.concatenate %37, %37, %37, %37 in 0 : vector<8x1xf32>, vector<8x1xf32>, vector<8x1xf32>, vector<8x1xf32> -> vector<32x1xf32>
    %40 = vector.broadcast %38 : vector<32x1xf32> to vector<32x32xf32>
    %41 = arith.mulf %2, %40 : vector<32x32xf32>
    %42 = vector.broadcast %39 : vector<32x1xf32> to vector<32x32xf32>
    %43 = arith.addf %41, %42 : vector<32x32xf32>
    %cst_13 = arith.constant 0.000000e+00 : f32
    %44 = vector.broadcast %cst_13 : f32 to vector<32x32xf32>
    %45 = arith.maximumf %43, %44 : vector<32x32xf32>
    %c0_14 = arith.constant 0 : index
    %c0_15 = arith.constant 0 : index
    %46 = vector.load %arg5[%c0_14, %c0_15] : memref<32x32xf32, #tpu.memory_space<vmem>>, vector<32x32xf32>
    tpu.vector_store %arg5[%c0_14, %c0_15], %45 {strides = array<i32>} : memref<32x32xf32, #tpu.memory_space<vmem>>, vector<32x32xf32>,
    return
  }
  func.func @transform_0(%arg0: i32) -> (i32, i32) {
    %c0_i32 = arith.constant 0 : i32
    %c0_i32_0 = arith.constant 0 : i32
    %c0_i32_1 = arith.constant 0 : i32
    return %c0_i32, %c0_i32_0 : i32, i32
  }
  func.func @transform_1(%arg0: i32) -> (i32, i32) {
    %c0_i32 = arith.constant 0 : i32
    %c0_i32_0 = arith.constant 0 : i32
    %c0_i32_1 = arith.constant 0 : i32
    return %c0_i32, %c0_i32_0 : i32, i32
  }
  func.func @transform_2(%arg0: i32) -> (i32, i32) {
    %c0_i32 = arith.constant 0 : i32
    %c0_i32_0 = arith.constant 0 : i32
    %c0_i32_1 = arith.constant 0 : i32
    return %c0_i32, %c0_i32_0 : i32, i32
  }
  func.func @transform_3(%arg0: i32) -> (i32, i32) {
    %c0_i32 = arith.constant 0 : i32
    %c0_i32_0 = arith.constant 0 : i32
    %c0_i32_1 = arith.constant 0 : i32
    return %c0_i32, %c0_i32_0 : i32, i32
  }
  func.func @transform_4(%arg0: i32) -> (i32, i32) {
    %c0_i32 = arith.constant 0 : i32
    %c0_i32_0 = arith.constant 0 : i32
    %c0_i32_1 = arith.constant 0 : i32
    return %c0_i32, %c0_i32_0 : i32, i32
  }
}

module attributes {stable_mosaic.version = 11 : i64} {
  func.func @_matmul_act_kernel(%arg0: i32, %arg1: i32, %arg2: memref<128x4xf32, #tpu.memory_space<vmem>>, %arg3: memref<4x8xf32, #tpu.memory_space<vmem>>, %arg4: memref<128x8xf32, #tpu.memory_space<vmem>>) attributes {dimension_semantics = [#tpu.dimension_semantics<parallel>, #tpu.dimension_semantics<parallel>], iteration_bounds = array<i64: 1, 1>, scalar_prefetch = 0 : i64, scratch_operands = 0 : i64, tpu.core_type = #tpu.core_type<tc>, window_params = [{transform_indices = @transform_0, window_bounds = array<i64: 128, 4>}, {transform_indices = @transform_1, window_bounds = array<i64: 4, 8>}, {transform_indices = @transform_2, window_bounds = array<i64: 128, 8>}]} {
    %c0 = arith.constant 0 : index
    %c0_0 = arith.constant 0 : index
    %0 = vector.load %arg2[%c0, %c0_0] : memref<128x4xf32, #tpu.memory_space<vmem>>, vector<128x4xf32>
    %c0_1 = arith.constant 0 : index
    %c0_2 = arith.constant 0 : index
    %1 = vector.load %arg3[%c0_1, %c0_2] : memref<4x8xf32, #tpu.memory_space<vmem>>, vector<4x8xf32>
    %cst = arith.constant dense<0.000000e+00> : vector<128x8xf32>
    %2 = tpu.matmul %0, %1, %cst {dimension_numbers = #tpu.dot_dimension_numbers<[1], [0], [0], [1], [0, 0, 1, 1], [], []>} : vector<128x4xf32>, vector<4x8xf32>, vector<128x8xf32> -> vector<128x8xf32>
    %c0_3 = arith.constant 0 : index
    %c0_4 = arith.constant 0 : index
    %3 = vector.load %arg4[%c0_3, %c0_4] : memref<128x8xf32, #tpu.memory_space<vmem>>, vector<128x8xf32>
    tpu.vector_store %arg4[%c0_3, %c0_4], %2 {strides = array<i32>} : memref<128x8xf32, #tpu.memory_space<vmem>>, vector<128x8xf32>,
    return
  }
  func.func @transform_0(%arg0: i32, %arg1: i32) -> (i32, i32) {
    %c0_i32 = arith.constant 0 : i32
    %c0_i32_0 = arith.constant 0 : i32
    return %arg0, %c0_i32 : i32, i32
  }
  func.func @transform_1(%arg0: i32, %arg1: i32) -> (i32, i32) {
    %c0_i32 = arith.constant 0 : i32
    %c0_i32_0 = arith.constant 0 : i32
    return %c0_i32, %arg1 : i32, i32
  }
  func.func @transform_2(%arg0: i32, %arg1: i32) -> (i32, i32) {
    %c0_i32 = arith.constant 0 : i32
    return %arg0, %arg1 : i32, i32
  }
}

module attributes {stable_mosaic.version = 11 : i64} {
  func.func @_matmul_act_kernel(%arg0: i32, %arg1: i32, %arg2: memref<256x4xf32, #tpu.memory_space<vmem>>, %arg3: memref<4x8xf32, #tpu.memory_space<vmem>>, %arg4: memref<256x8xf32, #tpu.memory_space<vmem>>) attributes {dimension_semantics = [#tpu.dimension_semantics<parallel>, #tpu.dimension_semantics<parallel>], iteration_bounds = array<i64: 1, 1>, scalar_prefetch = 0 : i64, scratch_operands = 0 : i64, tpu.core_type = #tpu.core_type<tc>, window_params = [{transform_indices = @transform_0, window_bounds = array<i64: 256, 4>}, {transform_indices = @transform_1, window_bounds = array<i64: 4, 8>}, {transform_indices = @transform_2, window_bounds = array<i64: 256, 8>}]} {
    %c0 = arith.constant 0 : index
    %c0_0 = arith.constant 0 : index
    %0 = vector.load %arg2[%c0, %c0_0] : memref<256x4xf32, #tpu.memory_space<vmem>>, vector<256x4xf32>
    %c0_1 = arith.constant 0 : index
    %c0_2 = arith.constant 0 : index
    %1 = vector.load %arg3[%c0_1, %c0_2] : memref<4x8xf32, #tpu.memory_space<vmem>>, vector<4x8xf32>
    %cst = arith.constant dense<0.000000e+00> : vector<256x8xf32>
    %2 = tpu.matmul %0, %1, %cst {dimension_numbers = #tpu.dot_dimension_numbers<[1], [0], [0], [1], [0, 0, 1, 1], [], []>} : vector<256x4xf32>, vector<4x8xf32>, vector<256x8xf32> -> vector<256x8xf32>
    %c0_3 = arith.constant 0 : index
    %c0_4 = arith.constant 0 : index
    %3 = vector.load %arg4[%c0_3, %c0_4] : memref<256x8xf32, #tpu.memory_space<vmem>>, vector<256x8xf32>
    tpu.vector_store %arg4[%c0_3, %c0_4], %2 {strides = array<i32>} : memref<256x8xf32, #tpu.memory_space<vmem>>, vector<256x8xf32>,
    return
  }
  func.func @transform_0(%arg0: i32, %arg1: i32) -> (i32, i32) {
    %c0_i32 = arith.constant 0 : i32
    %c0_i32_0 = arith.constant 0 : i32
    return %arg0, %c0_i32 : i32, i32
  }
  func.func @transform_1(%arg0: i32, %arg1: i32) -> (i32, i32) {
    %c0_i32 = arith.constant 0 : i32
    %c0_i32_0 = arith.constant 0 : i32
    return %c0_i32, %arg1 : i32, i32
  }
  func.func @transform_2(%arg0: i32, %arg1: i32) -> (i32, i32) {
    %c0_i32 = arith.constant 0 : i32
    return %arg0, %arg1 : i32, i32
  }
}

module attributes {stable_mosaic.version = 11 : i64} {
  func.func @_convt_bn_relu_kernel(%arg0: i32, %arg1: memref<32x216xf32, #tpu.memory_space<vmem>>, %arg2: memref<216x128xf32, #tpu.memory_space<vmem>>, %arg3: memref<8x1xf32, #tpu.memory_space<vmem>>, %arg4: memref<8x1xf32, #tpu.memory_space<vmem>>, %arg5: memref<32x128xf32, #tpu.memory_space<vmem>>) attributes {dimension_semantics = [#tpu.dimension_semantics<arbitrary>], iteration_bounds = array<i64: 1>, scalar_prefetch = 0 : i64, scratch_operands = 0 : i64, tpu.core_type = #tpu.core_type<tc>, window_params = [{pipeline_mode = #tpu.pipeline_mode<synchronous>, transform_indices = @transform_0, window_bounds = array<i64: 32, 216>}, {pipeline_mode = #tpu.pipeline_mode<synchronous>, transform_indices = @transform_1, window_bounds = array<i64: 216, 128>}, {pipeline_mode = #tpu.pipeline_mode<synchronous>, transform_indices = @transform_2, window_bounds = array<i64: 8, 1>}, {pipeline_mode = #tpu.pipeline_mode<synchronous>, transform_indices = @transform_3, window_bounds = array<i64: 8, 1>}, {pipeline_mode = #tpu.pipeline_mode<synchronous>, transform_indices = @transform_4, window_bounds = array<i64: 32, 128>}]} {
    %c0 = arith.constant 0 : index
    %c0_0 = arith.constant 0 : index
    %0 = vector.load %arg1[%c0, %c0_0] : memref<32x216xf32, #tpu.memory_space<vmem>>, vector<32x216xf32>
    %c0_1 = arith.constant 0 : index
    %c0_2 = arith.constant 0 : index
    %1 = vector.load %arg2[%c0_1, %c0_2] : memref<216x128xf32, #tpu.memory_space<vmem>>, vector<216x128xf32>
    %cst = arith.constant dense<0.000000e+00> : vector<32x128xf32>
    %2 = tpu.matmul %0, %1, %cst {dimension_numbers = #tpu.dot_dimension_numbers<[1], [0], [0], [1], [0, 0, 1, 1], [], []>} : vector<32x216xf32>, vector<216x128xf32>, vector<32x128xf32> -> vector<32x128xf32>
    %cst_3 = arith.constant dense<0.000000e+00> : vector<32xf32>
    %3 = vector.multi_reduction <add>, %2, %cst_3 [1] : vector<32x128xf32> to vector<32xf32>
    %4 = vector.shape_cast %3 : vector<32xf32> to vector<32x1xf32>
    %5 = arith.mulf %2, %2 : vector<32x128xf32>
    %cst_4 = arith.constant dense<0.000000e+00> : vector<32xf32>
    %6 = vector.multi_reduction <add>, %5, %cst_4 [1] : vector<32x128xf32> to vector<32xf32>
    %7 = vector.shape_cast %6 : vector<32xf32> to vector<32x1xf32>
    %8 = vector.extract_strided_slice %4 {offsets = [0, 0], sizes = [8, 1], strides = [1, 1]} : vector<32x1xf32> to vector<8x1xf32>
    %9 = vector.extract_strided_slice %4 {offsets = [8, 0], sizes = [8, 1], strides = [1, 1]} : vector<32x1xf32> to vector<8x1xf32>
    %10 = arith.addf %8, %9 : vector<8x1xf32>
    %11 = vector.extract_strided_slice %4 {offsets = [16, 0], sizes = [8, 1], strides = [1, 1]} : vector<32x1xf32> to vector<8x1xf32>
    %12 = arith.addf %10, %11 : vector<8x1xf32>
    %13 = vector.extract_strided_slice %4 {offsets = [24, 0], sizes = [8, 1], strides = [1, 1]} : vector<32x1xf32> to vector<8x1xf32>
    %14 = arith.addf %12, %13 : vector<8x1xf32>
    %15 = vector.extract_strided_slice %7 {offsets = [0, 0], sizes = [8, 1], strides = [1, 1]} : vector<32x1xf32> to vector<8x1xf32>
    %16 = vector.extract_strided_slice %7 {offsets = [8, 0], sizes = [8, 1], strides = [1, 1]} : vector<32x1xf32> to vector<8x1xf32>
    %17 = arith.addf %15, %16 : vector<8x1xf32>
    %18 = vector.extract_strided_slice %7 {offsets = [16, 0], sizes = [8, 1], strides = [1, 1]} : vector<32x1xf32> to vector<8x1xf32>
    %19 = arith.addf %17, %18 : vector<8x1xf32>
    %20 = vector.extract_strided_slice %7 {offsets = [24, 0], sizes = [8, 1], strides = [1, 1]} : vector<32x1xf32> to vector<8x1xf32>
    %21 = arith.addf %19, %20 : vector<8x1xf32>
    %cst_5 = arith.constant 0.001953125 : f32
    %22 = vector.broadcast %cst_5 : f32 to vector<8x1xf32>
    %23 = arith.mulf %14, %22 : vector<8x1xf32>
    %cst_6 = arith.constant 0.001953125 : f32
    %24 = vector.broadcast %cst_6 : f32 to vector<8x1xf32>
    %25 = arith.mulf %21, %24 : vector<8x1xf32>
    %26 = arith.mulf %23, %23 : vector<8x1xf32>
    %27 = arith.subf %25, %26 : vector<8x1xf32>
    %cst_7 = arith.constant 0.000000e+00 : f32
    %28 = vector.broadcast %cst_7 : f32 to vector<8x1xf32>
    %29 = arith.maximumf %27, %28 : vector<8x1xf32>
    %c0_8 = arith.constant 0 : index
    %c0_9 = arith.constant 0 : index
    %30 = vector.load %arg3[%c0_8, %c0_9] : memref<8x1xf32, #tpu.memory_space<vmem>>, vector<8x1xf32>
    %cst_10 = arith.constant 9.99999974E-6 : f32
    %31 = vector.broadcast %cst_10 : f32 to vector<8x1xf32>
    %32 = arith.addf %29, %31 : vector<8x1xf32>
    %33 = math.rsqrt %32 : vector<8x1xf32>
    %34 = arith.mulf %30, %33 : vector<8x1xf32>
    %c0_11 = arith.constant 0 : index
    %c0_12 = arith.constant 0 : index
    %35 = vector.load %arg4[%c0_11, %c0_12] : memref<8x1xf32, #tpu.memory_space<vmem>>, vector<8x1xf32>
    %36 = arith.mulf %23, %34 : vector<8x1xf32>
    %37 = arith.subf %35, %36 : vector<8x1xf32>
    %38 = tpu.concatenate %34, %34, %34, %34 in 0 : vector<8x1xf32>, vector<8x1xf32>, vector<8x1xf32>, vector<8x1xf32> -> vector<32x1xf32>
    %39 = tpu.concatenate %37, %37, %37, %37 in 0 : vector<8x1xf32>, vector<8x1xf32>, vector<8x1xf32>, vector<8x1xf32> -> vector<32x1xf32>
    %40 = vector.broadcast %38 : vector<32x1xf32> to vector<32x128xf32>
    %41 = arith.mulf %2, %40 : vector<32x128xf32>
    %42 = vector.broadcast %39 : vector<32x1xf32> to vector<32x128xf32>
    %43 = arith.addf %41, %42 : vector<32x128xf32>
    %cst_13 = arith.constant 0.000000e+00 : f32
    %44 = vector.broadcast %cst_13 : f32 to vector<32x128xf32>
    %45 = arith.maximumf %43, %44 : vector<32x128xf32>
    %c0_14 = arith.constant 0 : index
    %c0_15 = arith.constant 0 : index
    %46 = vector.load %arg5[%c0_14, %c0_15] : memref<32x128xf32, #tpu.memory_space<vmem>>, vector<32x128xf32>
    tpu.vector_store %arg5[%c0_14, %c0_15], %45 {strides = array<i32>} : memref<32x128xf32, #tpu.memory_space<vmem>>, vector<32x128xf32>,
    return
  }
  func.func @transform_0(%arg0: i32) -> (i32, i32) {
    %c0_i32 = arith.constant 0 : i32
    %c0_i32_0 = arith.constant 0 : i32
    %c0_i32_1 = arith.constant 0 : i32
    return %c0_i32, %c0_i32_0 : i32, i32
  }
  func.func @transform_1(%arg0: i32) -> (i32, i32) {
    %c0_i32 = arith.constant 0 : i32
    %c0_i32_0 = arith.constant 0 : i32
    %c0_i32_1 = arith.constant 0 : i32
    return %c0_i32, %c0_i32_0 : i32, i32
  }
  func.func @transform_2(%arg0: i32) -> (i32, i32) {
    %c0_i32 = arith.constant 0 : i32
    %c0_i32_0 = arith.constant 0 : i32
    %c0_i32_1 = arith.constant 0 : i32
    return %c0_i32, %c0_i32_0 : i32, i32
  }
  func.func @transform_3(%arg0: i32) -> (i32, i32) {
    %c0_i32 = arith.constant 0 : i32
    %c0_i32_0 = arith.constant 0 : i32
    %c0_i32_1 = arith.constant 0 : i32
    return %c0_i32, %c0_i32_0 : i32, i32
  }
  func.func @transform_4(%arg0: i32) -> (i32, i32) {
    %c0_i32 = arith.constant 0 : i32
    %c0_i32_0 = arith.constant 0 : i32
    %c0_i32_1 = arith.constant 0 : i32
    return %c0_i32, %c0_i32_0 : i32, i32
  }
}

module attributes {stable_mosaic.version = 11 : i64} {
  func.func @_matmul_act_kernel(%arg0: i32, %arg1: i32, %arg2: memref<12x72xf32, #tpu.memory_space<vmem>>, %arg3: memref<72x512xf32, #tpu.memory_space<vmem>>, %arg4: memref<12x512xf32, #tpu.memory_space<vmem>>) attributes {dimension_semantics = [#tpu.dimension_semantics<parallel>, #tpu.dimension_semantics<parallel>], iteration_bounds = array<i64: 1, 1>, scalar_prefetch = 0 : i64, scratch_operands = 0 : i64, tpu.core_type = #tpu.core_type<tc>, window_params = [{transform_indices = @transform_0, window_bounds = array<i64: 12, 72>}, {transform_indices = @transform_1, window_bounds = array<i64: 72, 512>}, {transform_indices = @transform_2, window_bounds = array<i64: 12, 512>}]} {
    %c0 = arith.constant 0 : index
    %c0_0 = arith.constant 0 : index
    %0 = vector.load %arg2[%c0, %c0_0] : memref<12x72xf32, #tpu.memory_space<vmem>>, vector<12x72xf32>
    %c0_1 = arith.constant 0 : index
    %c0_2 = arith.constant 0 : index
    %1 = vector.load %arg3[%c0_1, %c0_2] : memref<72x512xf32, #tpu.memory_space<vmem>>, vector<72x512xf32>
    %cst = arith.constant dense<0.000000e+00> : vector<12x512xf32>
    %2 = tpu.matmul %0, %1, %cst {dimension_numbers = #tpu.dot_dimension_numbers<[1], [0], [0], [1], [0, 0, 1, 1], [], []>} : vector<12x72xf32>, vector<72x512xf32>, vector<12x512xf32> -> vector<12x512xf32>
    %3 = math.tanh %2 : vector<12x512xf32>
    %c0_3 = arith.constant 0 : index
    %c0_4 = arith.constant 0 : index
    %4 = vector.load %arg4[%c0_3, %c0_4] : memref<12x512xf32, #tpu.memory_space<vmem>>, vector<12x512xf32>
    tpu.vector_store %arg4[%c0_3, %c0_4], %3 {strides = array<i32>} : memref<12x512xf32, #tpu.memory_space<vmem>>, vector<12x512xf32>,
    return
  }
  func.func @transform_0(%arg0: i32, %arg1: i32) -> (i32, i32) {
    %c0_i32 = arith.constant 0 : i32
    %c0_i32_0 = arith.constant 0 : i32
    return %arg0, %c0_i32 : i32, i32
  }
  func.func @transform_1(%arg0: i32, %arg1: i32) -> (i32, i32) {
    %c0_i32 = arith.constant 0 : i32
    %c0_i32_0 = arith.constant 0 : i32
    return %c0_i32, %arg1 : i32, i32
  }
  func.func @transform_2(%arg0: i32, %arg1: i32) -> (i32, i32) {
    %c0_i32 = arith.constant 0 : i32
    return %arg0, %arg1 : i32, i32
  }
}

module attributes {stable_mosaic.version = 11 : i64} {
  func.func @_matmul_act_kernel(%arg0: i32, %arg1: i32, %arg2: memref<64x32xf32, #tpu.memory_space<vmem>>, %arg3: memref<32x64xf32, #tpu.memory_space<vmem>>, %arg4: memref<64x64xf32, #tpu.memory_space<vmem>>) attributes {dimension_semantics = [#tpu.dimension_semantics<parallel>, #tpu.dimension_semantics<parallel>], iteration_bounds = array<i64: 3, 1>, scalar_prefetch = 0 : i64, scratch_operands = 0 : i64, tpu.core_type = #tpu.core_type<tc>, window_params = [{transform_indices = @transform_0, window_bounds = array<i64: 64, 32>}, {transform_indices = @transform_1, window_bounds = array<i64: 32, 64>}, {transform_indices = @transform_2, window_bounds = array<i64: 64, 64>}]} {
    %c0 = arith.constant 0 : index
    %c0_0 = arith.constant 0 : index
    %0 = vector.load %arg2[%c0, %c0_0] : memref<64x32xf32, #tpu.memory_space<vmem>>, vector<64x32xf32>
    %c0_1 = arith.constant 0 : index
    %c0_2 = arith.constant 0 : index
    %1 = vector.load %arg3[%c0_1, %c0_2] : memref<32x64xf32, #tpu.memory_space<vmem>>, vector<32x64xf32>
    %cst = arith.constant dense<0.000000e+00> : vector<64x64xf32>
    %2 = tpu.matmul %0, %1, %cst {dimension_numbers = #tpu.dot_dimension_numbers<[1], [0], [0], [1], [0, 0, 1, 1], [], []>} : vector<64x32xf32>, vector<32x64xf32>, vector<64x64xf32> -> vector<64x64xf32>
    %c0_3 = arith.constant 0 : index
    %c0_4 = arith.constant 0 : index
    %3 = vector.load %arg4[%c0_3, %c0_4] : memref<64x64xf32, #tpu.memory_space<vmem>>, vector<64x64xf32>
    tpu.vector_store %arg4[%c0_3, %c0_4], %2 {strides = array<i32>} : memref<64x64xf32, #tpu.memory_space<vmem>>, vector<64x64xf32>,
    return
  }
  func.func @transform_0(%arg0: i32, %arg1: i32) -> (i32, i32) {
    %c0_i32 = arith.constant 0 : i32
    %c0_i32_0 = arith.constant 0 : i32
    return %arg0, %c0_i32 : i32, i32
  }
  func.func @transform_1(%arg0: i32, %arg1: i32) -> (i32, i32) {
    %c0_i32 = arith.constant 0 : i32
    %c0_i32_0 = arith.constant 0 : i32
    return %c0_i32, %arg1 : i32, i32
  }
  func.func @transform_2(%arg0: i32, %arg1: i32) -> (i32, i32) {
    %c0_i32 = arith.constant 0 : i32
    return %arg0, %arg1 : i32, i32
  }
}

module attributes {stable_mosaic.version = 11 : i64} {
  func.func @_matmul_act_kernel(%arg0: i32, %arg1: i32, %arg2: memref<128x32xf32, #tpu.memory_space<vmem>>, %arg3: memref<32x64xf32, #tpu.memory_space<vmem>>, %arg4: memref<128x64xf32, #tpu.memory_space<vmem>>) attributes {dimension_semantics = [#tpu.dimension_semantics<parallel>, #tpu.dimension_semantics<parallel>], iteration_bounds = array<i64: 3, 1>, scalar_prefetch = 0 : i64, scratch_operands = 0 : i64, tpu.core_type = #tpu.core_type<tc>, window_params = [{transform_indices = @transform_0, window_bounds = array<i64: 128, 32>}, {transform_indices = @transform_1, window_bounds = array<i64: 32, 64>}, {transform_indices = @transform_2, window_bounds = array<i64: 128, 64>}]} {
    %c0 = arith.constant 0 : index
    %c0_0 = arith.constant 0 : index
    %0 = vector.load %arg2[%c0, %c0_0] : memref<128x32xf32, #tpu.memory_space<vmem>>, vector<128x32xf32>
    %c0_1 = arith.constant 0 : index
    %c0_2 = arith.constant 0 : index
    %1 = vector.load %arg3[%c0_1, %c0_2] : memref<32x64xf32, #tpu.memory_space<vmem>>, vector<32x64xf32>
    %cst = arith.constant dense<0.000000e+00> : vector<128x64xf32>
    %2 = tpu.matmul %0, %1, %cst {dimension_numbers = #tpu.dot_dimension_numbers<[1], [0], [0], [1], [0, 0, 1, 1], [], []>} : vector<128x32xf32>, vector<32x64xf32>, vector<128x64xf32> -> vector<128x64xf32>
    %c0_3 = arith.constant 0 : index
    %c0_4 = arith.constant 0 : index
    %3 = vector.load %arg4[%c0_3, %c0_4] : memref<128x64xf32, #tpu.memory_space<vmem>>, vector<128x64xf32>
    tpu.vector_store %arg4[%c0_3, %c0_4], %2 {strides = array<i32>} : memref<128x64xf32, #tpu.memory_space<vmem>>, vector<128x64xf32>,
    return
  }
  func.func @transform_0(%arg0: i32, %arg1: i32) -> (i32, i32) {
    %c0_i32 = arith.constant 0 : i32
    %c0_i32_0 = arith.constant 0 : i32
    return %arg0, %c0_i32 : i32, i32
  }
  func.func @transform_1(%arg0: i32, %arg1: i32) -> (i32, i32) {
    %c0_i32 = arith.constant 0 : i32
    %c0_i32_0 = arith.constant 0 : i32
    return %c0_i32, %arg1 : i32, i32
  }
  func.func @transform_2(%arg0: i32, %arg1: i32) -> (i32, i32) {
    %c0_i32 = arith.constant 0 : i32
    return %arg0, %arg1 : i32, i32
  }
}

</mosaic_0001>

<bundles_post_ra>
// kernel: generator_forward.20
= control target key start
LH: loop header
LB: loop body
LE: loop exit
PB: predicated region body
PF: predicated region fallthrough
CT: control target
= control target key end

     0   :  { %v160_v2 = vmov 0.0|0.0   ;;  %vm161_vm0 = vmmov 0   ;;  %v162_v4 = vmov 0.0   ;;  %vm26_vm1 = vcmask 130048   ;;  %s203_s0 = inlined_call_operand.vmem [shape: f32[2,64,9,1,1], index: 0, kind: input, shape index: {}, may-alias: {0,4}]   ;;  %s204_s1 = inlined_call_operand.vmem [shape: f32[2,16], index: 1, kind: input, shape index: {}]   ;;  %s205_s2 = inlined_call_operand.vmem [shape: f32[16,64], index: 2, kind: input, shape index: {}]   ;;  %s206_s3 = inlined_call_operand.vmem [shape: f32[1,64], index: 3, kind: input, shape index: {}]   ;;  %s207_s4 = inlined_call_operand.vmem [shape: f32[2,64,9,1,1], index: 4, kind: output, shape index: {}, may-alias: {0,4}]  }
   0x1   :  { %v17_v0 = vld [vmem:[%s205_s2] sm:$0xff]  ;;  %v18_v1 = vld [vmem:[%s205_s2 + $0x8] sm:$0xff]  ;;  %154 = vmatprep.subr.bf16.mxu0 %v160_v2  ;;  %151 = vmatprep.mubr.msk.f32.mxu0 %vm161_vm0, %v162_v4  ;;  %vm100_vm2 = vcmask 517120  }
   0x2   :  { %v155_v3 = vpack.c.bf16 %v18_v1, %v17_v0  ;;  %v16_v5 = vld [vmem:[%s204_s1] sm:$0x3] }
   0x3   :  { %v141_v6 = vld [vmem:[%s206_s3] ss:$0 sm:$0xff] }
   0x4   :  { %156 = vmatpush3.bf16.msra.mxu0 %v155_v3 }
   0x7   :  { %152 = vmatmul.mubr.msk.f32.vlgmr.msra.gmra.mrb[0].mxu0 %vm26_vm1, %v16_v5 }
  0xda   :  { %v96_v7 = vpop.f32.mrb[0].mxu0 }
  0xdb   :  { %v97_v8 = vadd.f32 %v141_v6, %v96_v7  ;;  %v153_v9 = vpop.f32.mrb[1].mxu0 }
  0xdd   :  { %101 = vst.msk [vmem:[#allocation2] sm:$0x3] %vm100_vm2, %v97_v8 }
  0xe4   :  { %v119_v10 = vld [vmem:[#allocation2] sm:$0x3] }
  0xe5   :  { %143 = vst [vmem:[%s207_s4 + $0x8] sm:$0x3] %v119_v10 }

// kernel: generator_forward.11
= control target key start
LH: loop header
LB: loop body
LE: loop exit
PB: predicated region body
PF: predicated region fallthrough
CT: control target
= control target key end

     0   :  { %9 = vsyncpa [#allocation3], 0  ;;  %s1791_s0 = inlined_call_operand.hbm [shape: f32[128,576], index: 0, kind: input, shape index: {}]   ;;  %s1792_s1 = inlined_call_operand.hbm [shape: f32[576,2], index: 1, kind: input, shape index: {}]   ;;  %s1793_s2 = inlined_call_operand.hbm [shape: f32[32,1], index: 2, kind: input, shape index: {}]   ;;  %s1794_s3 = inlined_call_operand.hbm [shape: f32[32,1], index: 3, kind: input, shape index: {}]   ;;  %s1795_s4 = inlined_call_operand.hbm [shape: f32[128,2], index: 4, kind: output, shape index: {}]  }
   0x1   :  { %10 = vsyncpa [#allocation6], 0 }
   0x2   :  { %11 = vsyncpa [#allocation9], 0 }
   0x3   :  { %12 = vsyncpa [#allocation4], 0  ;;  %s1483_s15 = smov [#allocation5]   ;;  %s1365_s19 = scalar_lea.hbm %s1792_s1, 9216 }
   0x4   :  { %s30_s16 = sshll.u32 %s1483_s15, 4  ;;  %p1366_p0 = scmp.ne.s32.totalorder %s1792_s1, %s1365_s19  ;;  %s31_s16 = int_to_ptr.vmem [resolvable:$true] %s30_s16 }
   0x5   :  { %p1369_p1 = scmp.lt.u32.totalorder %s1365_s19, %s1792_s1 }
   0x7   :  { %p1371_p2 = pnand %p1369_p1, %p1366_p0 }
   0x9   :  { %1374 = shalt.err (!%p1371_p2)
}
   0xa   :  { %s1375_s24 = scalar_lea.vmem %s31_s16, 9216  ;;  %p1380_p4 = scmp.lt.s32.totalorder %s31_s16, %s31_s16 }
   0xb   :  { %p1376_p3 = scmp.ne.s32.totalorder %s31_s16, %s1375_s24  ;;  %p1381_p5 = scmp.lt.s32.totalorder %s1375_s24, %s1375_s24 }
   0xd   :  { %p1382_p6 = por %p1381_p5, %p1380_p4 }
   0xf   :  { %p1383_p7 = pnand %p1382_p6, %p1376_p3 }
  0x11   :  { %1386 = shalt.err (!%p1383_p7)
}
  0x12   :  { %s1484_s25 = smov 128   ;;  %s1485_s26 = smov 8  }
  0x13   :  { %36 = dma.hbm_to_vmem [thread:$0]  %s1792_s1, 9216, %s31_s16, [#allocation6], %s1484_s25, %s1484_s25, %s1485_s26  }
  0x14   :  { %s1486_s29 = smov [#allocation2]   ;;  %s1387_s7 = scalar_lea.hbm %s1791_s0, 10240 }
  0x15   :  { %s18_s30 = sshll.u32 %s1486_s29, 4  ;;  %p1388_p8 = scmp.ne.s32.totalorder %s1791_s0, %s1387_s7  ;;  %s19_s30 = int_to_ptr.vmem [resolvable:$true] %s18_s30 }
  0x16   :  { %p1391_p9 = scmp.lt.u32.totalorder %s1387_s7, %s1791_s0 }
  0x18   :  { %p1393_p10 = pnand %p1391_p9, %p1388_p8 }
  0x1a   :  { %1396 = shalt.err (!%p1393_p10)
}
  0x1b   :  { %s1397_s12 = scalar_lea.vmem %s19_s30, 10240  ;;  %p1402_p12 = scmp.lt.s32.totalorder %s19_s30, %s19_s30 }
  0x1c   :  { %p1398_p11 = scmp.ne.s32.totalorder %s19_s30, %s1397_s12  ;;  %p1403_p13 = scmp.lt.s32.totalorder %s1397_s12, %s1397_s12 }
  0x1e   :  { %p1404_p0 = por %p1403_p13, %p1402_p12 }
  0x20   :  { %p1405_p1 = pnand %p1404_p0, %p1398_p11 }
  0x22   :  { %1408 = shalt.err (!%p1405_p1)
}
  0x23   :  { %s1487_s1 = smov 640   ;;  %s1488_s13 = smov 40  }
  0x24   :  { %24 = dma.hbm_to_vmem [thread:$0]  %s1791_s0, 10240, %s19_s30, [#allocation3], %s1487_s1, %s1487_s1, %s1488_s13  }
  0x25   :  { %s1489_s16 = smov [#allocation7]   ;;  %s1490_s18 = smov [#allocation8]  }
  0x26   :  { %s42_s17 = sshll.u32 %s1489_s16, 4  ;;  %s54_s19 = sshll.u32 %s1490_s18, 4  ;;  %s43_s17 = int_to_ptr.vmem [resolvable:$true] %s42_s17  ;;  %s1545_s19 = int_to_ptr.vmem [resolvable:$true] %s54_s19 }
  0x27   :  { %s1409_s22 = scalar_lea.hbm %s1793_s2, 512 }
  0x28   :  { %p1410_p2 = scmp.ne.s32.totalorder %s1793_s2, %s1409_s22  ;;  %p1413_p3 = scmp.lt.u32.totalorder %s1409_s22, %s1793_s2 }
  0x2a   :  { %p1415_p4 = pnand %p1413_p3, %p1410_p2 }
  0x2c   :  { %1418 = shalt.err (!%p1415_p4)
}
  0x2d   :  { %s1419_s0 = scalar_lea.vmem %s43_s17, 512  ;;  %p1424_p6 = scmp.lt.s32.totalorder %s43_s17, %s43_s17 }
  0x2e   :  { %p1420_p5 = scmp.ne.s32.totalorder %s43_s17, %s1419_s0  ;;  %p1425_p7 = scmp.lt.s32.totalorder %s1419_s0, %s1419_s0 }
  0x30   :  { %p1426_p8 = por %p1425_p7, %p1424_p6 }
  0x32   :  { %p1427_p9 = pnand %p1426_p8, %p1420_p5 }
  0x34   :  { %1430 = shalt.err (!%p1427_p9)
}
  0x35   :  { %48 = dma.hbm_to_vmem [thread:$0]  %s1793_s2, 512, %s43_s17, [#allocation6], %s1484_s25, %s1484_s25, %s1485_s26  }
  0x36   :  { %s1431_s7 = scalar_lea.hbm %s1794_s3, 512 }
  0x37   :  { %p1432_p10 = scmp.ne.s32.totalorder %s1794_s3, %s1431_s7  ;;  %p1435_p11 = scmp.lt.u32.totalorder %s1431_s7, %s1794_s3 }
  0x39   :  { %p1437_p12 = pnand %p1435_p11, %p1432_p10 }
  0x3b   :  { %1440 = shalt.err (!%p1437_p12)
}
  0x3c   :  { %s1441_s12 = scalar_lea.vmem %s1545_s19, 512  ;;  %p1446_p0 = scmp.lt.s32.totalorder %s1545_s19, %s1545_s19 }
  0x3d   :  { %p1442_p13 = scmp.ne.s32.totalorder %s1545_s19, %s1441_s12  ;;  %p1447_p1 = scmp.lt.s32.totalorder %s1441_s12, %s1441_s12 }
  0x3f   :  { %p1448_p2 = por %p1447_p1, %p1446_p0 }
  0x41   :  { %p1449_p3 = pnand %p1448_p2, %p1442_p13 }
  0x43   :  { %1452 = shalt.err (!%p1449_p3)
}
  0x44   :  { %60 = dma.hbm_to_vmem [thread:$0]  %s1794_s3, 512, %s1545_s19, [#allocation9], %s1484_s25, %s1484_s25, %s1485_s26  }
  0x45   :  { %1475 = dma.done.wait [#allocation3], 10240  }
  0x46   :  { %1476 = vsyncadd [#allocation3], 4294957056 }
  0x47   :  { %1477 = dma.done.wait [#allocation6], 9728  }
  0x48   :  { %1478 = vsyncadd [#allocation6], 4294957568 }
  0x49   :  { %1479 = dma.done.wait [#allocation9], 512  }
  0x4a   :  { %1480 = vsyncadd [#allocation9], 4294966784  ;;  %v169_v0 = vld [vmem:[#allocation5 + $0x80] sm:$0xff]  ;;  %v170_v1 = vld [vmem:[#allocation5 + $0x88] sm:$0xff]  ;;  %vm225_vm0 = vcmask 523264   ;;  %vm709_vm1 = vcmask 15360  }
  0x4b   :  { %v201_v2 = vld [vmem:[#allocation5 + $0x180] sm:$0xff]  ;;  %v1257_v3 = vpack.c.bf16 %v170_v1, %v169_v0  ;;  %v202_v4 = vld [vmem:[#allocation5 + $0x188] sm:$0xff]  ;;  %v171_v11 = vld [vmem:[#allocation5 + $0x90] sm:$0xff]  ;;  %s1492_s3 = smov [#allocation10]  }
  0x4c   :  { %v153_v5 = vld [vmem:[#allocation5] sm:$0xff]  ;;  %v154_v6 = vld [vmem:[#allocation5 + $0x8] sm:$0xff]  ;;  %v1289_v7 = vpack.c.bf16 %v202_v4, %v201_v2  ;;  %v172_v13 = vld [vmem:[#allocation5 + $0x98] sm:$0xff]  ;;  %s1003_s13 = sshll.u32 %s1492_s3, 4  ;;  %s1004_s13 = int_to_ptr.vmem [resolvable:$true] %s1003_s13 }
  0x4d   :  { %v1259_v8 = vpack.c.bf16 %v154_v6, %v153_v5  ;;  %v185_v9 = vld [vmem:[#allocation5 + $0x100] sm:$0xff]  ;;  %v186_v10 = vld [vmem:[#allocation5 + $0x108] sm:$0xff]  ;;  %1258 = vmatprep.subr.bf16.mxu0 %v1257_v3  ;;  %v203_v14 = vld [vmem:[#allocation5 + $0x190] sm:$0xff]  ;;  %v1261_v16 = vpack.c.bf16 %v172_v13, %v171_v11  ;;  %s1453_s14 = scalar_lea.vmem %s1004_s13, 2048  ;;  %p1458_p5 = scmp.lt.s32.totalorder %s1004_s13, %s1004_s13 }
  0x4e   :  { %v1291_v12 = vpack.c.bf16 %v186_v10, %v185_v9  ;;  %v204_v15 = vld [vmem:[#allocation5 + $0x198] sm:$0xff]  ;;  %1290 = vmatprep.subr.bf16.mxu1 %v1289_v7  ;;  %v155_v18 = vld [vmem:[#allocation5 + $0x10] sm:$0xff]  ;;  %v173_v23 = vld [vmem:[#allocation5 + $0xa0] sm:$0xff]  ;;  %p1454_p4 = scmp.ne.s32.totalorder %s1004_s13, %s1453_s14  ;;  %p1459_p6 = scmp.lt.s32.totalorder %s1453_s14, %s1453_s14 }
  0x4f   :  { %1260 = vmatpush3.bf16.msra.mxu0 %v1259_v8  ;;  %v1293_v17 = vpack.c.bf16 %v204_v15, %v203_v14  ;;  %v156_v19 = vld [vmem:[#allocation5 + $0x18] sm:$0xff]  ;;  %v187_v20 = vld [vmem:[#allocation5 + $0x110] sm:$0xff]  ;;  %v174_v24 = vld [vmem:[#allocation5 + $0xa8] sm:$0xff] }
  0x50   :  { %1292 = vmatpush3.bf16.msra.mxu1 %v1291_v12  ;;  %v1263_v21 = vpack.c.bf16 %v156_v19, %v155_v18  ;;  %v188_v22 = vld [vmem:[#allocation5 + $0x118] sm:$0xff]  ;;  %1262 = vmatprep.subr.bf16.mxu0 %v1261_v16  ;;  %v1265_v26 = vpack.c.bf16 %v174_v24, %v173_v23  ;;  %v205_v27 = vld [vmem:[#allocation5 + $0x1a0] sm:$0xff]  ;;  %v206_v28 = vld [vmem:[#allocation5 + $0x1a8] sm:$0xff]  ;;  %p1460_p7 = por %p1459_p6, %p1458_p5 }
  0x51   :  { %1294 = vmatprep.subr.bf16.mxu1 %v1293_v17  ;;  %v1295_v25 = vpack.c.bf16 %v188_v22, %v187_v20  ;;  %v157_v29 = vld [vmem:[#allocation5 + $0x20] sm:$0xff]  ;;  %v1297_v30 = vpack.c.bf16 %v206_v28, %v205_v27  ;;  %v158_v31 = vld [vmem:[#allocation5 + $0x28] sm:$0xff]  ;;  %v175_v35 = vld [vmem:[#allocation5 + $0xb0] sm:$0xff] }
  0x52   :  { %v189_v32 = vld [vmem:[#allocation5 + $0x120] sm:$0xff]  ;;  %v190_v33 = vld [vmem:[#allocation5 + $0x128] sm:$0xff]  ;;  %v1267_v34 = vpack.c.bf16 %v158_v31, %v157_v29  ;;  %v176_v36 = vld [vmem:[#allocation5 + $0xb8] sm:$0xff]  ;;  %p1461_p8 = pnand %p1460_p7, %p1454_p4 }
  0x53   :  { %1264 = vmatpush3.bf16.msra.mxu0 %v1263_v21  ;;  %v207_v37 = vld [vmem:[#allocation5 + $0x1b0] sm:$0xff]  ;;  %v1299_v38 = vpack.c.bf16 %v190_v33, %v189_v32  ;;  %v1269_v39 = vpack.c.bf16 %v176_v36, %v175_v35  ;;  %v208_v40 = vld [vmem:[#allocation5 + $0x1b8] sm:$0xff]  ;;  %v177_v46 = vld [vmem:[#allocation5 + $0xc0] sm:$0xff] }
  0x54   :  { %1296 = vmatpush3.bf16.msra.mxu1 %v1295_v25  ;;  %1266 = vmatprep.subr.bf16.mxu0 %v1265_v26  ;;  %v159_v41 = vld [vmem:[#allocation5 + $0x30] sm:$0xff]  ;;  %v160_v42 = vld [vmem:[#allocation5 + $0x38] sm:$0xff]  ;;  %v1301_v43 = vpack.c.bf16 %v208_v40, %v207_v37  ;;  %v178_v47 = vld [vmem:[#allocation5 + $0xc8] sm:$0xff] }
  0x55   :  { %1298 = vmatprep.subr.bf16.mxu1 %v1297_v30  ;;  %v191_v44 = vld [vmem:[#allocation5 + $0x130] sm:$0xff]  ;;  %v192_v45 = vld [vmem:[#allocation5 + $0x138] sm:$0xff]  ;;  %v209_v48 = vld [vmem:[#allocation5 + $0x1c0] sm:$0xff]  ;;  %v1271_v50 = vpack.c.bf16 %v160_v42, %v159_v41  ;;  %v1273_v52 = vpack.c.bf16 %v178_v47, %v177_v46 }
  0x56   :  { %v210_v49 = vld [vmem:[#allocation5 + $0x1c8] sm:$0xff]  ;;  %v1303_v51 = vpack.c.bf16 %v192_v45, %v191_v44  ;;  %v161_v53 = vld [vmem:[#allocation5 + $0x40] sm:$0xff]  ;;  %v179_v58 = vld [vmem:[#allocation5 + $0xd0] sm:$0xff] }
  0x57   :  { %1268 = vmatpush3.bf16.msra.mxu0 %v1267_v34  ;;  %v162_v54 = vld [vmem:[#allocation5 + $0x48] sm:$0xff]  ;;  %v193_v55 = vld [vmem:[#allocation5 + $0x140] sm:$0xff]  ;;  %v1305_v56 = vpack.c.bf16 %v210_v49, %v209_v48  ;;  %v180_v59 = vld [vmem:[#allocation5 + $0xd8] sm:$0xff] }
  0x58   :  { %1300 = vmatpush3.bf16.msra.mxu1 %v1299_v38  ;;  %1270 = vmatprep.subr.bf16.mxu0 %v1269_v39  ;;  %v194_v57 = vld [vmem:[#allocation5 + $0x148] sm:$0xff]  ;;  %v211_v60 = vld [vmem:[#allocation5 + $0x1d0] sm:$0xff]  ;;  %v212_v61 = vld [vmem:[#allocation5 + $0x1d8] sm:$0xff]  ;;  %v1275_v62 = vpack.c.bf16 %v162_v54, %v161_v53  ;;  %v1277_v0 = vpack.c.bf16 %v180_v59, %v179_v58 }
  0x59   :  { %1302 = vmatprep.subr.bf16.mxu1 %v1301_v43  ;;  %v1307_v63 = vpack.c.bf16 %v194_v57, %v193_v55  ;;  %v163_v1 = vld [vmem:[#allocation5 + $0x50] sm:$0xff]  ;;  %v164_v2 = vld [vmem:[#allocation5 + $0x58] sm:$0xff]  ;;  %v1309_v4 = vpack.c.bf16 %v212_v61, %v211_v60  ;;  %v181_v6 = vld [vmem:[#allocation5 + $0xe0] sm:$0xff] }
  0x5a   :  { %v195_v3 = vld [vmem:[#allocation5 + $0x150] sm:$0xff]  ;;  %v196_v5 = vld [vmem:[#allocation5 + $0x158] sm:$0xff]  ;;  %v182_v7 = vld [vmem:[#allocation5 + $0xe8] sm:$0xff]  ;;  %v1279_v10 = vpack.c.bf16 %v164_v2, %v163_v1 }
  0x5b   :  { %1272 = vmatpush3.bf16.msra.mxu0 %v1271_v50  ;;  %v213_v8 = vld [vmem:[#allocation5 + $0x1e0] sm:$0xff]  ;;  %v214_v9 = vld [vmem:[#allocation5 + $0x1e8] sm:$0xff]  ;;  %v1311_v13 = vpack.c.bf16 %v196_v5, %v195_v3  ;;  %v1281_v14 = vpack.c.bf16 %v182_v7, %v181_v6  ;;  %v76_v17 = vld [vmem:[#allocation2 + $0x18] sm:$0xff] }
  0x5c   :  { %1304 = vmatpush3.bf16.msra.mxu1 %v1303_v51  ;;  %1274 = vmatprep.subr.bf16.mxu0 %v1273_v52  ;;  %v165_v11 = vld [vmem:[#allocation5 + $0x60] sm:$0xff]  ;;  %v166_v12 = vld [vmem:[#allocation5 + $0x68] sm:$0xff]  ;;  %v1313_v18 = vpack.c.bf16 %v214_v9, %v213_v8  ;;  %v183_v20 = vld [vmem:[#allocation5 + $0xf0] sm:$0xff] }
  0x5d   :  { %1306 = vmatprep.subr.bf16.mxu1 %v1305_v56  ;;  %v197_v15 = vld [vmem:[#allocation5 + $0x160] sm:$0xff]  ;;  %v74_v16 = vld [vmem:[#allocation2 + $0x8] sm:$0xff]  ;;  %v184_v21 = vld [vmem:[#allocation5 + $0xf8] sm:$0xff]  ;;  %483 = vmatprep.mubr.f32.mxu1 %v76_v17  ;;  %v1283_v24 = vpack.c.bf16 %v166_v12, %v165_v11 }
  0x5e   :  { %v198_v19 = vld [vmem:[#allocation5 + $0x168] sm:$0xff]  ;;  %338 = vmatprep.mubr.f32.mxu0 %v74_v16  ;;  %v215_v22 = vld [vmem:[#allocation5 + $0x1f0] sm:$0xff]  ;;  %v216_v23 = vld [vmem:[#allocation5 + $0x1f8] sm:$0xff]  ;;  %v1285_v26 = vpack.c.bf16 %v184_v21, %v183_v20 }
  0x5f   :  { %1276 = vmatpush3.bf16.msra.mxu0 %v1275_v62  ;;  %v1315_v25 = vpack.c.bf16 %v198_v19, %v197_v15  ;;  %v167_v27 = vld [vmem:[#allocation5 + $0x70] sm:$0xff]  ;;  %v168_v28 = vld [vmem:[#allocation5 + $0x78] sm:$0xff]  ;;  %v1317_v30 = vpack.c.bf16 %v216_v23, %v215_v22  ;;  %v217_v32 = vld [vmem:[#allocation5 + $0x200] sm:$0xff] }
  0x60   :  { %1308 = vmatpush3.bf16.msra.mxu1 %v1307_v63  ;;  %1278 = vmatprep.subr.bf16.mxu0 %v1277_v0  ;;  %v199_v29 = vld [vmem:[#allocation5 + $0x170] sm:$0xff]  ;;  %v200_v31 = vld [vmem:[#allocation5 + $0x178] sm:$0xff]  ;;  %v218_v33 = vld [vmem:[#allocation5 + $0x208] sm:$0xff]  ;;  %v1287_v34 = vpack.c.bf16 %v168_v28, %v167_v27 }
  0x61   :  { %1310 = vmatprep.subr.bf16.mxu1 %v1309_v4  ;;  %v1319_v35 = vpack.c.bf16 %v200_v31, %v199_v29  ;;  %v1321_v36 = vpack.c.bf16 %v218_v33, %v217_v32  ;;  %v219_v37 = vld [vmem:[#allocation5 + $0x210] sm:$0xff]  ;;  %v220_v38 = vld [vmem:[#allocation5 + $0x218] sm:$0xff]  ;;  %v73_v39 = vld [vmem:[#allocation2] sm:$0xff] }
  0x62   :  { %v75_v40 = vld [vmem:[#allocation2 + $0x10] sm:$0xff]  ;;  %v81_v42 = vld [vmem:[#allocation2 + $0x40] sm:$0xff]  ;;  %v1325_v43 = vpack.c.bf16 %v220_v38, %v219_v37  ;;  %v222_v45 = vld [vmem:[#allocation5 + $0x228] sm:$0xff] }
  0x63   :  { %1280 = vmatpush3.bf16.msra.mxu0 %v1279_v10  ;;  %v79_v41 = vld [vmem:[#allocation2 + $0x30] sm:$0xff]  ;;  %v221_v44 = vld [vmem:[#allocation5 + $0x220] sm:$0xff]  ;;  %v78_v46 = vld [vmem:[#allocation2 + $0x28] sm:$0xff] }
  0x64   :  { %1312 = vmatpush3.bf16.msra.mxu1 %v1311_v13  ;;  %1282 = vmatprep.subr.bf16.mxu0 %v1281_v14  ;;  %v80_v47 = vld [vmem:[#allocation2 + $0x38] sm:$0xff]  ;;  %v86_v49 = vld [vmem:[#allocation2 + $0x68] sm:$0xff]  ;;  %v1329_v50 = vpack.c.bf16 %v222_v45, %v221_v44  ;;  %v83_v51 = vld [vmem:[#allocation2 + $0x50] sm:$0xff] }
  0x65   :  { %1314 = vmatprep.subr.bf16.mxu1 %v1313_v18  ;;  %v84_v48 = vld [vmem:[#allocation2 + $0x58] sm:$0xff]  ;;  %v223_v52 = vld [vmem:[#allocation5 + $0x230] sm:$0xff]  ;;  %v85_v53 = vld [vmem:[#allocation2 + $0x60] sm:$0xff] }
  0x66   :  { %v89_v54 = vld [vmem:[#allocation2 + $0x80] sm:$0xff]  ;;  %v224_v55 = vld [vmem:[#allocation5 + $0x238] sm:$0xff]  ;;  %v91_v56 = vld [vmem:[#allocation2 + $0x90] sm:$0xff] }
  0x67   :  { %1284 = vmatpush3.bf16.msra.mxu0 %v1283_v24  ;;  %v1333_v57 = vpack.c.bf16 %v224_v55, %v223_v52  ;;  %v88_v58 = vld [vmem:[#allocation2 + $0x78] sm:$0xff]  ;;  %v90_v59 = vld [vmem:[#allocation2 + $0x88] sm:$0xff]  ;;  %v93_v62 = vld [vmem:[#allocation2 + $0xa0] sm:$0xff] }
  0x68   :  { %1316 = vmatpush3.bf16.msra.mxu1 %v1315_v25  ;;  %1286 = vmatprep.subr.bf16.mxu0 %v1285_v26  ;;  %v94_v60 = vld [vmem:[#allocation2 + $0xa8] sm:$0xff]  ;;  %v96_v61 = vld [vmem:[#allocation2 + $0xb8] sm:$0xff]  ;;  %v95_v63 = vld [vmem:[#allocation2 + $0xb0] sm:$0xff] }
  0x69   :  { %1318 = vmatprep.subr.bf16.mxu1 %v1317_v30  ;;  %v99_v0 = vld [vmem:[#allocation2 + $0xd0] sm:$0xff]  ;;  %v101_v1 = vld [vmem:[#allocation2 + $0xe0] sm:$0xff]  ;;  %v98_v2 = vld [vmem:[#allocation2 + $0xc8] sm:$0xff] }
  0x6a   :  { %v100_v3 = vld [vmem:[#allocation2 + $0xd8] sm:$0xff]  ;;  %v106_v5 = vld [vmem:[#allocation2 + $0x108] sm:$0xff]  ;;  %v103_v6 = vld [vmem:[#allocation2 + $0xf0] sm:$0xff] }
  0x6b   :  { %1288 = vmatpush3.bf16.msra.mxu0 %v1287_v34  ;;  %v104_v4 = vld [vmem:[#allocation2 + $0xf8] sm:$0xff]  ;;  %v105_v7 = vld [vmem:[#allocation2 + $0x100] sm:$0xff]  ;;  %v111_v9 = vld [vmem:[#allocation2 + $0x130] sm:$0xff] }
  0x6c   :  { %1320 = vmatpush3.bf16.msra.mxu1 %v1319_v35  ;;  %1322 = vmatprep.subr.bf16.mxu0 %v1321_v36  ;;  %v109_v8 = vld [vmem:[#allocation2 + $0x120] sm:$0xff]  ;;  %v108_v10 = vld [vmem:[#allocation2 + $0x118] sm:$0xff]  ;;  %v110_v11 = vld [vmem:[#allocation2 + $0x128] sm:$0xff] }
  0x6d   :  { %1337 = vmatprep.subr.bf16.mxu1 %v1321_v36  ;;  %v114_v12 = vld [vmem:[#allocation2 + $0x148] sm:$0xff]  ;;  %v116_v13 = vld [vmem:[#allocation2 + $0x158] sm:$0xff]  ;;  %v113_v14 = vld [vmem:[#allocation2 + $0x140] sm:$0xff] }
  0x6e   :  { %339 = vmatmul.mubr.f32.vlgmr.msra.gmra.mrb[0].mxu0 %v73_v39  ;;  %v115_v15 = vld [vmem:[#allocation2 + $0x150] sm:$0xff]  ;;  %v121_v17 = vld [vmem:[#allocation2 + $0x180] sm:$0xff]  ;;  %v118_v18 = vld [vmem:[#allocation2 + $0x168] sm:$0xff] }
  0x6f   :  { %484 = vmatmul.mubr.f32.vlgmr.msra.gmra.mrb[0].mxu1 %v75_v40  ;;  %343 = vmatprep.mubr.f32.mxu0 %v79_v41  ;;  %v119_v16 = vld [vmem:[#allocation2 + $0x170] sm:$0xff]  ;;  %v120_v19 = vld [vmem:[#allocation2 + $0x178] sm:$0xff]  ;;  %v126_v21 = vld [vmem:[#allocation2 + $0x1a8] sm:$0xff] }
  0x70   :  { %1341 = vmatpush3.bf16.msra.mxu1 %v1321_v36  ;;  %488 = vmatprep.mubr.f32.mxu1 %v81_v42  ;;  %v124_v20 = vld [vmem:[#allocation2 + $0x198] sm:$0xff]  ;;  %v123_v22 = vld [vmem:[#allocation2 + $0x190] sm:$0xff]  ;;  %v125_v23 = vld [vmem:[#allocation2 + $0x1a0] sm:$0xff] }
  0x71   :  { %1324 = vmatpush3.bf16.msra.mxu0 %v1321_v36  ;;  %1338 = vmatprep.subr.bf16.mxu1 %v1325_v43  ;;  %v129_v24 = vld [vmem:[#allocation2 + $0x1c0] sm:$0xff]  ;;  %v131_v25 = vld [vmem:[#allocation2 + $0x1d0] sm:$0xff]  ;;  %v128_v26 = vld [vmem:[#allocation2 + $0x1b8] sm:$0xff] }
  0x72   :  { %344 = vmatmul.mubr.f32.gmra.mrb[2].mxu0 %v78_v46  ;;  %1326 = vmatprep.subr.bf16.mxu0 %v1325_v43  ;;  %v130_v27 = vld [vmem:[#allocation2 + $0x1c8] sm:$0xff]  ;;  %v136_v29 = vld [vmem:[#allocation2 + $0x1f8] sm:$0xff]  ;;  %v133_v30 = vld [vmem:[#allocation2 + $0x1e0] sm:$0xff] }
  0x73   :  { %489 = vmatmul.mubr.f32.gmra.mrb[2].mxu1 %v80_v47  ;;  %348 = vmatprep.mubr.f32.mxu0 %v84_v48  ;;  %v134_v28 = vld [vmem:[#allocation2 + $0x1e8] sm:$0xff]  ;;  %v135_v31 = vld [vmem:[#allocation2 + $0x1f0] sm:$0xff]  ;;  %v141_v33 = vld [vmem:[#allocation2 + $0x220] sm:$0xff] }
  0x74   :  { %493 = vmatprep.mubr.f32.mxu1 %v86_v49  ;;  %1342 = vmatpush3.bf16.msra.mxu1 %v1325_v43  ;;  %v139_v32 = vld [vmem:[#allocation2 + $0x210] sm:$0xff]  ;;  %v138_v34 = vld [vmem:[#allocation2 + $0x208] sm:$0xff]  ;;  %v140_v35 = vld [vmem:[#allocation2 + $0x218] sm:$0xff] }
  0x75   :  { %1328 = vmatpush3.bf16.msra.mxu0 %v1325_v43  ;;  %1339 = vmatprep.subr.bf16.mxu1 %v1329_v50  ;;  %v144_v36 = vld [vmem:[#allocation2 + $0x238] sm:$0xff]  ;;  %v146_v37 = vld [vmem:[#allocation2 + $0x248] sm:$0xff]  ;;  %v143_v38 = vld [vmem:[#allocation2 + $0x230] sm:$0xff] }
  0x76   :  { %349 = vmatmul.mubr.f32.gmra.mrb[4].mxu0 %v83_v51  ;;  %1330 = vmatprep.subr.bf16.mxu0 %v1329_v50  ;;  %v145_v39 = vld [vmem:[#allocation2 + $0x240] sm:$0xff]  ;;  %v151_v41 = vld [vmem:[#allocation2 + $0x270] sm:$0xff]  ;;  %v148_v42 = vld [vmem:[#allocation2 + $0x258] sm:$0xff] }
  0x77   :  { %494 = vmatmul.mubr.f32.gmra.mrb[4].mxu1 %v85_v53  ;;  %353 = vmatprep.mubr.f32.mxu0 %v89_v54  ;;  %v149_v40 = vld [vmem:[#allocation2 + $0x260] sm:$0xff]  ;;  %v150_v43 = vld [vmem:[#allocation2 + $0x268] sm:$0xff]  ;;  %v87_v48 = vld [vmem:[#allocation2 + $0x70] sm:$0xff] }
  0x78   :  { %498 = vmatprep.mubr.f32.mxu1 %v91_v56  ;;  %1343 = vmatpush3.bf16.msra.mxu1 %v1329_v50  ;;  %v77_v44 = vld [vmem:[#allocation2 + $0x20] sm:$0xff]  ;;  %v82_v46 = vld [vmem:[#allocation2 + $0x48] sm:$0xff]  ;;  %v127_v49 = vld [vmem:[#allocation2 + $0x1b0] sm:$0xff] }
  0x79   :  { %1332 = vmatpush3.bf16.msra.mxu0 %v1329_v50  ;;  %1340 = vmatprep.subr.bf16.mxu1 %v1333_v57  ;;  %v117_v45 = vld [vmem:[#allocation2 + $0x160] sm:$0xff]  ;;  %v122_v47 = vld [vmem:[#allocation2 + $0x188] sm:$0xff]  ;;  %v92_v50 = vld [vmem:[#allocation2 + $0x98] sm:$0xff] }
  0x7a   :  { %354 = vmatmul.mubr.f32.gmra.mrb[6].mxu0 %v88_v58  ;;  %1334 = vmatprep.subr.bf16.mxu0 %v1333_v57  ;;  %v132_v51 = vld [vmem:[#allocation2 + $0x1d8] sm:$0xff]  ;;  %v97_v52 = vld [vmem:[#allocation2 + $0xc0] sm:$0xff]  ;;  %v102_v54 = vld [vmem:[#allocation2 + $0xe8] sm:$0xff] }
  0x7b   :  { %499 = vmatmul.mubr.f32.gmra.mrb[6].mxu1 %v90_v59  ;;  %358 = vmatprep.mubr.f32.mxu0 %v94_v60  ;;  %v137_v53 = vld [vmem:[#allocation2 + $0x200] sm:$0xff]  ;;  %v142_v55 = vld [vmem:[#allocation2 + $0x228] sm:$0xff]  ;;  %v107_v56 = vld [vmem:[#allocation2 + $0x110] sm:$0xff] }
  0x7c   :  { %503 = vmatprep.mubr.f32.mxu1 %v96_v61  ;;  %1344 = vmatpush3.bf16.msra.mxu1 %v1333_v57  ;;  %v112_v58 = vld [vmem:[#allocation2 + $0x138] sm:$0xff] }
  0x7d   :  { %1336 = vmatpush3.bf16.msra.mxu0 %v1333_v57  ;;  %v147_v57 = vld [vmem:[#allocation2 + $0x250] sm:$0xff]  ;;  %v152_v59 = vld [vmem:[#allocation2 + $0x278] sm:$0xff] }
  0x7e   :  { %359 = vmatmul.mubr.f32.gmra.mrb[8].mxu0 %v93_v62 }
  0x7f   :  { %504 = vmatmul.mubr.f32.gmra.mrb[8].mxu1 %v95_v63  ;;  %363 = vmatprep.mubr.f32.mxu0 %v99_v0 }
  0x80   :  { %508 = vmatprep.mubr.f32.mxu1 %v101_v1 }
  0x82   :  { %364 = vmatmul.mubr.f32.gmra.mrb[10].mxu0 %v98_v2 }
  0x83   :  { %509 = vmatmul.mubr.f32.gmra.mrb[10].mxu1 %v100_v3  ;;  %368 = vmatprep.mubr.f32.mxu0 %v104_v4 }
  0x84   :  { %513 = vmatprep.mubr.f32.mxu1 %v106_v5 }
  0x86   :  { %369 = vmatmul.mubr.f32.gmra.mrb[12].mxu0 %v103_v6 }
  0x87   :  { %514 = vmatmul.mubr.f32.gmra.mrb[12].mxu1 %v105_v7  ;;  %373 = vmatprep.mubr.f32.mxu0 %v109_v8 }
  0x88   :  { %518 = vmatprep.mubr.f32.mxu1 %v111_v9 }
  0x8a   :  { %374 = vmatmul.mubr.f32.gmra.mrb[14].mxu0 %v108_v10 }
  0x8b   :  { %519 = vmatmul.mubr.f32.gmra.mrb[14].mxu1 %v110_v11  ;;  %378 = vmatprep.mubr.f32.mxu0 %v114_v12 }
  0x8c   :  { %523 = vmatprep.mubr.f32.mxu1 %v116_v13 }
  0x8e   :  { %379 = vmatmul.mubr.f32.gmra.mrb[16].mxu0 %v113_v14 }
  0x8f   :  { %524 = vmatmul.mubr.f32.gmra.mrb[16].mxu1 %v115_v15  ;;  %383 = vmatprep.mubr.f32.mxu0 %v119_v16 }
  0x90   :  { %528 = vmatprep.mubr.f32.mxu1 %v121_v17 }
  0x92   :  { %384 = vmatmul.mubr.f32.gmra.mrb[18].mxu0 %v118_v18 }
  0x93   :  { %529 = vmatmul.mubr.f32.gmra.mrb[18].mxu1 %v120_v19  ;;  %388 = vmatprep.mubr.f32.mxu0 %v124_v20 }
  0x94   :  { %533 = vmatprep.mubr.f32.mxu1 %v126_v21 }
  0x96   :  { %389 = vmatmul.mubr.f32.gmra.mrb[20].mxu0 %v123_v22 }
  0x97   :  { %534 = vmatmul.mubr.f32.gmra.mrb[20].mxu1 %v125_v23  ;;  %393 = vmatprep.mubr.f32.mxu0 %v129_v24 }
  0x98   :  { %538 = vmatprep.mubr.f32.mxu1 %v131_v25 }
  0x9a   :  { %394 = vmatmul.mubr.f32.gmra.mrb[22].mxu0 %v128_v26 }
  0x9b   :  { %539 = vmatmul.mubr.f32.gmra.mrb[22].mxu1 %v130_v27  ;;  %398 = vmatprep.mubr.f32.mxu0 %v134_v28 }
  0x9c   :  { %543 = vmatprep.mubr.f32.mxu1 %v136_v29 }
  0x9e   :  { %399 = vmatmul.mubr.f32.gmra.mrb[24].mxu0 %v133_v30 }
  0x9f   :  { %544 = vmatmul.mubr.f32.gmra.mrb[24].mxu1 %v135_v31  ;;  %403 = vmatprep.mubr.f32.mxu0 %v139_v32 }
  0xa0   :  { %548 = vmatprep.mubr.f32.mxu1 %v141_v33 }
  0xa2   :  { %404 = vmatmul.mubr.f32.gmra.mrb[26].mxu0 %v138_v34 }
  0xa3   :  { %549 = vmatmul.mubr.f32.gmra.mrb[26].mxu1 %v140_v35  ;;  %408 = vmatprep.mubr.f32.mxu0 %v144_v36 }
  0xa4   :  { %553 = vmatprep.mubr.f32.mxu1 %v146_v37 }
  0xa6   :  { %409 = vmatmul.mubr.f32.gmra.mrb[28].mxu0 %v143_v38 }
  0xa7   :  { %554 = vmatmul.mubr.f32.gmra.mrb[28].mxu1 %v145_v39  ;;  %413 = vmatprep.mubr.f32.mxu0 %v149_v40 }
  0xa8   :  { %558 = vmatprep.mubr.f32.mxu1 %v151_v41 }
  0xaa   :  { %414 = vmatmul.mubr.f32.gmra.mrb[30].mxu0 %v148_v42 }
  0xab   :  { %559 = vmatmul.mubr.f32.gmra.mrb[30].mxu1 %v150_v43  ;;  %1233 = vmatprep.mubr.msk.f32.mxu0 %vm225_vm0, %v77_v44 }
  0xac   :  { %1245 = vmatprep.mubr.msk.f32.mxu1 %vm225_vm0, %v117_v45 }
  0xae   :  { %1234 = vmatmul.mubr.msk.f32.vlgmr.msra.gmra.mrb[32].mxu0 %vm225_vm0, %v82_v46 }
  0xaf   :  { %1246 = vmatmul.mubr.msk.f32.vlgmr.msra.gmra.mrb[32].mxu1 %vm225_vm0, %v122_v47  ;;  %1236 = vmatprep.mubr.msk.f32.mxu0 %vm225_vm0, %v87_v48 }
  0xb0   :  { %1248 = vmatprep.mubr.msk.f32.mxu1 %vm225_vm0, %v127_v49 }
  0xb2   :  { %1237 = vmatmul.mubr.msk.f32.gmra.mrb[34].mxu0 %vm225_vm0, %v92_v50 }
  0xb3   :  { %1249 = vmatmul.mubr.msk.f32.gmra.mrb[34].mxu1 %vm225_vm0, %v132_v51  ;;  %1239 = vmatprep.mubr.msk.f32.mxu0 %vm225_vm0, %v97_v52 }
  0xb4   :  { %1251 = vmatprep.mubr.msk.f32.mxu1 %vm225_vm0, %v137_v53 }
  0xb6   :  { %1240 = vmatmul.mubr.msk.f32.gmra.mrb[36].mxu0 %vm225_vm0, %v102_v54 }
  0xb7   :  { %1252 = vmatmul.mubr.msk.f32.gmra.mrb[36].mxu1 %vm225_vm0, %v142_v55  ;;  %1242 = vmatprep.mubr.msk.f32.mxu0 %vm225_vm0, %v107_v56 }
  0xb8   :  { %1254 = vmatprep.mubr.msk.f32.mxu1 %vm225_vm0, %v147_v57 }
  0xba   :  { %1243 = vmatmul.mubr.msk.f32.gmra.mrb[38].mxu0 %vm225_vm0, %v112_v58 }
  0xbb   :  { %1255 = vmatmul.mubr.msk.f32.gmra.mrb[38].mxu1 %vm225_vm0, %v152_v59 }
 0x141   :  { %v1065_v60 = vpop.f32.mrb[0].mxu0 }
 0x142   :  { %v1145_v61 = vpop.f32.mrb[0].mxu1  ;;  %v1066_v62 = vpop.f32.mrb[1].mxu0 }
 0x143   :  { %v1067_v63 = vadd.f32 %v1066_v62, %v1065_v60  ;;  %v1146_v0 = vpop.f32.mrb[1].mxu1 }
 0x144   :  { %v1147_v1 = vadd.f32 %v1146_v0, %v1145_v61 }
 0x145   :  { %v1068_v2 = vpop.f32.mrb[2].mxu0 }
 0x146   :  { %v1148_v3 = vpop.f32.mrb[2].mxu1  ;;  %v1069_v4 = vpop.f32.mrb[3].mxu0  ;;  %v1598_v5 = vadd.f32 %v1147_v1, %v1067_v63 }
 0x147   :  { %v1070_v6 = vadd.f32 %v1069_v4, %v1068_v2  ;;  %v1149_v7 = vpop.f32.mrb[3].mxu1 }
 0x148   :  { %v1150_v8 = vadd.f32 %v1149_v7, %v1148_v3 }
 0x149   :  { %v1071_v9 = vpop.f32.mrb[4].mxu0 }
 0x14a   :  { %v1151_v10 = vpop.f32.mrb[4].mxu1  ;;  %v1072_v11 = vpop.f32.mrb[5].mxu0  ;;  %v1600_v12 = vadd.f32 %v1150_v8, %v1070_v6 }
 0x14b   :  { %v1073_v13 = vadd.f32 %v1072_v11, %v1071_v9  ;;  %v1152_v14 = vpop.f32.mrb[5].mxu1 }
 0x14c   :  { %v1153_v15 = vadd.f32 %v1152_v14, %v1151_v10 }
 0x14d   :  { %v1074_v16 = vpop.f32.mrb[6].mxu0 }
 0x14e   :  { %v1154_v17 = vpop.f32.mrb[6].mxu1  ;;  %v1075_v18 = vpop.f32.mrb[7].mxu0  ;;  %v1602_v19 = vadd.f32 %v1153_v15, %v1073_v13 }
 0x14f   :  { %v1076_v20 = vadd.f32 %v1075_v18, %v1074_v16  ;;  %v1155_v21 = vpop.f32.mrb[7].mxu1 }
 0x150   :  { %v1156_v22 = vadd.f32 %v1155_v21, %v1154_v17 }
 0x151   :  { %v1077_v23 = vpop.f32.mrb[8].mxu0 }
 0x152   :  { %v1157_v24 = vpop.f32.mrb[8].mxu1  ;;  %v1078_v25 = vpop.f32.mrb[9].mxu0  ;;  %v1604_v26 = vadd.f32 %v1156_v22, %v1076_v20 }
 0x153   :  { %v1079_v27 = vadd.f32 %v1078_v25, %v1077_v23  ;;  %v1158_v28 = vpop.f32.mrb[9].mxu1 }
 0x154   :  { %v1159_v29 = vadd.f32 %v1158_v28, %v1157_v24 }
 0x155   :  { %v1080_v30 = vpop.f32.mrb[10].mxu0 }
 0x156   :  { %v1160_v31 = vpop.f32.mrb[10].mxu1  ;;  %v1081_v32 = vpop.f32.mrb[11].mxu0  ;;  %v1606_v33 = vadd.f32 %v1159_v29, %v1079_v27 }
 0x157   :  { %v1082_v34 = vadd.f32 %v1081_v32, %v1080_v30  ;;  %v1161_v35 = vpop.f32.mrb[11].mxu1 }
 0x158   :  { %v1162_v36 = vadd.f32 %v1161_v35, %v1160_v31 }
 0x159   :  { %v1083_v37 = vpop.f32.mrb[12].mxu0 }
 0x15a   :  { %v1163_v38 = vpop.f32.mrb[12].mxu1  ;;  %v1084_v39 = vpop.f32.mrb[13].mxu0  ;;  %v1608_v40 = vadd.f32 %v1162_v36, %v1082_v34 }
 0x15b   :  { %v1085_v41 = vadd.f32 %v1084_v39, %v1083_v37  ;;  %v1164_v42 = vpop.f32.mrb[13].mxu1 }
 0x15c   :  { %v1165_v43 = vadd.f32 %v1164_v42, %v1163_v38 }
 0x15d   :  { %v1086_v44 = vpop.f32.mrb[14].mxu0 }
 0x15e   :  { %v1166_v45 = vpop.f32.mrb[14].mxu1  ;;  %v1087_v46 = vpop.f32.mrb[15].mxu0  ;;  %v1610_v47 = vadd.f32 %v1165_v43, %v1085_v41 }
 0x15f   :  { %v1088_v48 = vadd.f32 %v1087_v46, %v1086_v44  ;;  %v1167_v49 = vpop.f32.mrb[15].mxu1 }
 0x160   :  { %v1168_v50 = vadd.f32 %v1167_v49, %v1166_v45 }
 0x161   :  { %v1089_v51 = vpop.f32.mrb[16].mxu0 }
 0x162   :  { %v1169_v52 = vpop.f32.mrb[16].mxu1  ;;  %v1090_v53 = vpop.f32.mrb[17].mxu0  ;;  %v1612_v54 = vadd.f32 %v1168_v50, %v1088_v48 }
 0x163   :  { %v1091_v55 = vadd.f32 %v1090_v53, %v1089_v51  ;;  %v1170_v56 = vpop.f32.mrb[17].mxu1 }
 0x164   :  { %v1171_v57 = vadd.f32 %v1170_v56, %v1169_v52 }
 0x165   :  { %v1092_v58 = vpop.f32.mrb[18].mxu0 }
 0x166   :  { %v1172_v59 = vpop.f32.mrb[18].mxu1  ;;  %v1093_v60 = vpop.f32.mrb[19].mxu0  ;;  %v526_v61 = vadd.f32 %v1171_v57, %v1091_v55 }
 0x167   :  { %v1094_v62 = vadd.f32 %v1093_v60, %v1092_v58  ;;  %v1173_v63 = vpop.f32.mrb[19].mxu1 }
 0x168   :  { %v1174_v0 = vadd.f32 %v1173_v63, %v1172_v59 }
 0x169   :  { %v1095_v1 = vpop.f32.mrb[20].mxu0 }
 0x16a   :  { %v1175_v2 = vpop.f32.mrb[20].mxu1  ;;  %v1096_v3 = vpop.f32.mrb[21].mxu0  ;;  %v531_v4 = vadd.f32 %v1174_v0, %v1094_v62 }
 0x16b   :  { %v1097_v6 = vadd.f32 %v1096_v3, %v1095_v1  ;;  %v1176_v7 = vpop.f32.mrb[21].mxu1 }
 0x16c   :  { %v1177_v8 = vadd.f32 %v1176_v7, %v1175_v2 }
 0x16d   :  { %v1098_v9 = vpop.f32.mrb[22].mxu0 }
 0x16e   :  { %v1178_v10 = vpop.f32.mrb[22].mxu1  ;;  %v1099_v11 = vpop.f32.mrb[23].mxu0  ;;  %v536_v13 = vadd.f32 %v1177_v8, %v1097_v6 }
 0x16f   :  { %v1100_v14 = vadd.f32 %v1099_v11, %v1098_v9  ;;  %v1179_v15 = vpop.f32.mrb[23].mxu1 }
 0x170   :  { %v1180_v16 = vadd.f32 %v1179_v15, %v1178_v10 }
 0x171   :  { %v1101_v17 = vpop.f32.mrb[24].mxu0 }
 0x172   :  { %v1181_v18 = vpop.f32.mrb[24].mxu1  ;;  %v1102_v20 = vpop.f32.mrb[25].mxu0  ;;  %v541_v21 = vadd.f32 %v1180_v16, %v1100_v14 }
 0x173   :  { %v1103_v22 = vadd.f32 %v1102_v20, %v1101_v17  ;;  %v1182_v23 = vpop.f32.mrb[25].mxu1 }
 0x174   :  { %v1183_v24 = vadd.f32 %v1182_v23, %v1181_v18 }
 0x175   :  { %v1104_v25 = vpop.f32.mrb[26].mxu0 }
 0x176   :  { %v1184_v27 = vpop.f32.mrb[26].mxu1  ;;  %v1105_v28 = vpop.f32.mrb[27].mxu0  ;;  %v546_v29 = vadd.f32 %v1183_v24, %v1103_v22 }
 0x177   :  { %v1106_v30 = vadd.f32 %v1105_v28, %v1104_v25  ;;  %v1185_v31 = vpop.f32.mrb[27].mxu1 }
 0x178   :  { %v1186_v32 = vadd.f32 %v1185_v31, %v1184_v27 }
 0x179   :  { %v1107_v34 = vpop.f32.mrb[28].mxu0 }
 0x17a   :  { %v1187_v35 = vpop.f32.mrb[28].mxu1  ;;  %v1108_v36 = vpop.f32.mrb[29].mxu0  ;;  %v551_v37 = vadd.f32 %v1186_v32, %v1106_v30 }
 0x17b   :  { %v1109_v38 = vadd.f32 %v1108_v36, %v1107_v34  ;;  %v1188_v39 = vpop.f32.mrb[29].mxu1 }
 0x17c   :  { %v1189_v41 = vadd.f32 %v1188_v39, %v1187_v35 }
 0x17d   :  { %v1110_v42 = vpop.f32.mrb[30].mxu0 }
 0x17e   :  { %v1190_v43 = vpop.f32.mrb[30].mxu1  ;;  %v1111_v44 = vpop.f32.mrb[31].mxu0  ;;  %v556_v45 = vadd.f32 %v1189_v41, %v1109_v38 }
 0x17f   :  { %v1112_v46 = vadd.f32 %v1111_v44, %v1110_v42  ;;  %v1191_v48 = vpop.f32.mrb[31].mxu1 }
 0x180   :  { %v1192_v49 = vadd.f32 %v1191_v48, %v1190_v43 }
 0x181   :  { %v1235_v50 = vpop.f32.mrb[32].mxu0 }
 0x182   :  { %v1615_v51 = vadd.f32 %v1235_v50, %v1600_v12  ;;  %v1247_v52 = vpop.f32.mrb[32].mxu1  ;;  %v630_v53 = vpop.f32.mrb[33].mxu0  ;;  %v561_v55 = vadd.f32 %v1192_v49, %v1112_v46 }
 0x183   :  { %v1617_v56 = vadd.f32 %v1247_v52, %v531_v4  ;;  %v1620_v57 = vadd.f32 %v630_v53, %v1598_v5  ;;  %v670_v58 = vpop.f32.mrb[33].mxu1 }
 0x184   :  { %v1622_v59 = vadd.f32 %v670_v58, %v526_v61  ;;  %v713_v60 = vsel %vm709_vm1, %v1615_v51, 0.0  ;;  %v759_v12 = vmul.f32 %v1615_v51, %v1615_v51 }
 0x185   :  { %v1238_v62 = vpop.f32.mrb[34].mxu0  ;;  %v737_v63 = vsel %vm709_vm1, %v1617_v56, 0.0  ;;  %714 = vadd.xlane.f32.xlu0 %v713_v60  ;;  %v710_v6 = vsel %vm709_vm1, %v1620_v57, 0.0  ;;  %v758_v17 = vmul.f32 %v1620_v57, %v1620_v57 }
 0x186   :  { %v1631_v0 = vadd.f32 %v1238_v62, %v1604_v26  ;;  %v1250_v1 = vpop.f32.mrb[34].mxu1  ;;  %738 = vadd.xlane.f32.xlu1 %v737_v63  ;;  %v640_v5 = vpop.f32.mrb[35].mxu0  ;;  %v777_v8 = vsel %vm709_vm1, %v759_v12, 0.0  ;;  %v767_v26 = vmul.f32 %v1617_v56, %v1617_v56  ;;  %v734_v16 = vsel %vm709_vm1, %v1622_v59, 0.0 }
 0x187   :  { %v1633_v2 = vadd.f32 %v1250_v1, %v541_v21  ;;  %v1636_v61 = vadd.f32 %v640_v5, %v1602_v19  ;;  %v680_v3 = vpop.f32.mrb[35].mxu1  ;;  %v774_v27 = vsel %vm709_vm1, %v758_v17, 0.0  ;;  %v766_v28 = vmul.f32 %v1622_v59, %v1622_v59 }
 0x188   :  { %v1638_v4 = vadd.f32 %v680_v3, %v536_v13  ;;  %v761_v34 = vmul.f32 %v1631_v0, %v1631_v0 }
 0x189   :  { %v1241_v7 = vpop.f32.mrb[36].mxu0  ;;  %711 = vadd.xlane.f32.xlu0 %v710_v6  ;;  %v743_v30 = vsel %vm709_vm1, %v1633_v2, 0.0  ;;  %v760_v31 = vmul.f32 %v1636_v61, %v1636_v61  ;;  %v716_v32 = vsel %vm709_vm1, %v1636_v61, 0.0  ;;  %v769_v38 = vmul.f32 %v1633_v2, %v1633_v2 }
 0x18a   :  { %v1646_v9 = vadd.f32 %v1241_v7, %v1608_v40  ;;  %v1253_v10 = vpop.f32.mrb[36].mxu1  ;;  %778 = vadd.xlane.f32.xlu1 %v777_v8  ;;  %v650_v19 = vpop.f32.mrb[37].mxu0  ;;  %v801_v40 = vsel %vm709_vm1, %v767_v26, 0.0  ;;  %v768_v36 = vmul.f32 %v1638_v4, %v1638_v4 }
 0x18b   :  { %v1648_v11 = vadd.f32 %v1253_v10, %v551_v37  ;;  %v1651_v13 = vadd.f32 %v650_v19, %v1606_v33  ;;  %v690_v14 = vpop.f32.mrb[37].mxu1  ;;  %v780_v35 = vsel %vm709_vm1, %v760_v31, 0.0  ;;  %v783_v37 = vsel %vm709_vm1, %v761_v34, 0.0 }
 0x18c   :  { %v1653_v15 = vadd.f32 %v690_v14, %v546_v29  ;;  %v798_v29 = vsel %vm709_vm1, %v766_v28, 0.0  ;;  %v804_v39 = vsel %vm709_vm1, %v768_v36, 0.0  ;;  %v807_v41 = vsel %vm709_vm1, %v769_v38, 0.0 }
 0x18d   :  { %v1244_v18 = vpop.f32.mrb[38].mxu0  ;;  %735 = vadd.xlane.f32.xlu0 %v734_v16  ;;  %v722_v42 = vsel %vm709_vm1, %v1651_v13, 0.0  ;;  %v725_v43 = vsel %vm709_vm1, %v1646_v9, 0.0  ;;  %v749_v46 = vsel %vm709_vm1, %v1648_v11, 0.0  ;;  %v763_v48 = vmul.f32 %v1646_v9, %v1646_v9 }
 0x18e   :  { %v1661_v20 = vadd.f32 %v1244_v18, %v1612_v54  ;;  %v1256_v21 = vpop.f32.mrb[38].mxu1  ;;  %802 = vadd.xlane.f32.xlu1 %v801_v40  ;;  %v660_v33 = vpop.f32.mrb[39].mxu0  ;;  %v719_v54 = vsel %vm709_vm1, %v1631_v0, 0.0  ;;  %v746_v44 = vsel %vm709_vm1, %v1653_v15, 0.0  ;;  %v770_v50 = vmul.f32 %v1653_v15, %v1653_v15 }
 0x18f   :  { %v1663_v22 = vadd.f32 %v1256_v21, %v561_v55  ;;  %v1666_v23 = vadd.f32 %v660_v33, %v1610_v47  ;;  %v700_v24 = vpop.f32.mrb[39].mxu1  ;;  %v740_v47 = vsel %vm709_vm1, %v1638_v4, 0.0  ;;  %v789_v52 = vsel %vm709_vm1, %v763_v48, 0.0 }
 0x190   :  { %v1668_v25 = vadd.f32 %v700_v24, %v556_v45  ;;  %v762_v45 = vmul.f32 %v1651_v13, %v1651_v13  ;;  %v771_v53 = vmul.f32 %v1648_v11, %v1648_v11  ;;  %v810_v55 = vsel %vm709_vm1, %v770_v50, 0.0 }
 0x191   :  { %775 = vadd.xlane.f32.xlu0 %v774_v27  ;;  %v728_v60 = vsel %vm709_vm1, %v1666_v23, 0.0  ;;  %v731_v62 = vsel %vm709_vm1, %v1661_v20, 0.0  ;;  %v764_v12 = vmul.f32 %v1666_v23, %v1666_v23  ;;  %v755_v1 = vsel %vm709_vm1, %v1663_v22, 0.0 }
 0x192   :  { %720 = vadd.xlane.f32.xlu1 %v719_v54  ;;  %v786_v49 = vsel %vm709_vm1, %v762_v45, 0.0  ;;  %v813_v58 = vsel %vm709_vm1, %v771_v53, 0.0  ;;  %v752_v63 = vsel %vm709_vm1, %v1668_v25, 0.0  ;;  %v765_v5 = vmul.f32 %v1661_v20, %v1661_v20 }
 0x193   :  { %v792_v3 = vsel %vm709_vm1, %v764_v12, 0.0  ;;  %v772_v6 = vmul.f32 %v1668_v25, %v1668_v25  ;;  %v773_v8 = vmul.f32 %v1663_v22, %v1663_v22  ;;  %v1491_v19 = vmov 0  }
 0x194   :  { %v795_v7 = vsel %vm709_vm1, %v765_v5, 0.0  ;;  %1356 = vset.pattern.permute.xlu1 %v1491_v19  ;;  %1355 = vset.pattern.permute.xlu0 %v1491_v19 }
 0x195   :  { %799 = vadd.xlane.f32.xlu0 %v798_v29  ;;  %v816_v26 = vsel %vm709_vm1, %v772_v6, 0.0  ;;  %v819_v10 = vsel %vm709_vm1, %v773_v8, 0.0 }
 0x196   :  { %744 = vadd.xlane.f32.xlu1 %v743_v30 }
 0x199   :  { %741 = vadd.xlane.f32.xlu0 %v740_v47 }
 0x19a   :  { %717 = vadd.xlane.f32.xlu1 %v716_v32 }
 0x19d   :  { %781 = vadd.xlane.f32.xlu0 %v780_v35 }
 0x19e   :  { %784 = vadd.xlane.f32.xlu1 %v783_v37 }
 0x1a1   :  { %805 = vadd.xlane.f32.xlu0 %v804_v39 }
 0x1a2   :  { %808 = vadd.xlane.f32.xlu1 %v807_v41 }
 0x1a5   :  { %723 = vadd.xlane.f32.xlu0 %v722_v42 }
 0x1a6   :  { %726 = vadd.xlane.f32.xlu1 %v725_v43 }
 0x1a9   :  { %747 = vadd.xlane.f32.xlu0 %v746_v44 }
 0x1aa   :  { %750 = vadd.xlane.f32.xlu1 %v749_v46 }
 0x1ad   :  { %787 = vadd.xlane.f32.xlu0 %v786_v49 }
 0x1ae   :  { %790 = vadd.xlane.f32.xlu1 %v789_v52 }
 0x1b1   :  { %811 = vadd.xlane.f32.xlu0 %v810_v55 }
 0x1b2   :  { %814 = vadd.xlane.f32.xlu1 %v813_v58 }
 0x1b5   :  { %729 = vadd.xlane.f32.xlu0 %v728_v60 }
 0x1b6   :  { %732 = vadd.xlane.f32.xlu1 %v731_v62 }
 0x1b9   :  { %753 = vadd.xlane.f32.xlu0 %v752_v63 }
 0x1ba   :  { %756 = vadd.xlane.f32.xlu1 %v755_v1 }
 0x1bd   :  { %793 = vadd.xlane.f32.xlu0 %v792_v3 }
 0x1be   :  { %796 = vadd.xlane.f32.xlu1 %v795_v7 }
 0x1c1   :  { %817 = vadd.xlane.f32.xlu0 %v816_v26 }
 0x1c2   :  { %820 = vadd.xlane.f32.xlu1 %v819_v10 }
 0x212   :  { %v715_v14 = vpop.xlane.xlu0 %714 }
 0x213   :  { %v739_v16 = vpop.xlane.xlu1 %738 }
 0x216   :  { %v712_v17 = vpop.xlane.xlu0 %711 }
 0x217   :  { %v779_v18 = vpop.xlane.xlu1 %778 }
 0x21a   :  { %v736_v40 = vpop.xlane.xlu0 %735 }
 0x21b   :  { %v803_v21 = vpop.xlane.xlu1 %802 }
 0x21e   :  { %v776_v33 = vpop.xlane.xlu0 %775 }
 0x21f   :  { %v721_v24 = vpop.xlane.xlu1 %720 }
 0x222   :  { %v800_v27 = vpop.xlane.xlu0 %799 }
 0x223   :  { %v745_v28 = vpop.xlane.xlu1 %744 }
 0x226   :  { %v742_v54 = vpop.xlane.xlu0 %741 }
 0x227   :  { %v718_v29 = vpop.xlane.xlu1 %717 }
 0x22a   :  { %v782_v30 = vpop.xlane.xlu0 %781 }
 0x22b   :  { %v785_v47 = vpop.xlane.xlu1 %784 }
 0x22e   :  { %v806_v31 = vpop.xlane.xlu0 %805 }
 0x22f   :  { %v809_v32 = vpop.xlane.xlu1 %808 }
 0x232   :  { %v724_v34 = vpop.xlane.xlu0 %723 }
 0x233   :  { %v727_v35 = vpop.xlane.xlu1 %726  ;;  %v822_v36 = vadd.f32 %v724_v34, %v712_v17 }
 0x234   :  { %v823_v37 = vadd.f32 %v727_v35, %v715_v14 }
 0x235   :  { %v826_v38 = vadd.f32 %v822_v36, %v736_v40 }
 0x236   :  { %v827_v39 = vadd.f32 %v823_v37, %v739_v16  ;;  %v748_v41 = vpop.xlane.xlu0 %747 }
 0x237   :  { %v751_v42 = vpop.xlane.xlu1 %750  ;;  %v830_v43 = vadd.f32 %v826_v38, %v748_v41 }
 0x238   :  { %v831_v44 = vadd.f32 %v827_v39, %v751_v42 }
 0x239   :  { %v1734_v50 = vmul.f32 0.125, %v830_v43 }
 0x23a   :  { %v788_v45 = vpop.xlane.xlu0 %787  ;;  %v1736_v53 = vmul.f32 0.125, %v831_v44 }
 0x23b   :  { %v791_v46 = vpop.xlane.xlu1 %790  ;;  %v834_v48 = vadd.f32 %v788_v45, %v776_v33  ;;  %v854_v12 = vmul.f32 %v1734_v50, %v1734_v50 }
 0x23c   :  { %v835_v49 = vadd.f32 %v791_v46, %v779_v18  ;;  %v855_v5 = vmul.f32 %v1736_v53, %v1736_v53  ;;  %v866_v46 = vld [vmem:[#allocation7] sm:$0xff] }
 0x23d   :  { %v838_v52 = vadd.f32 %v834_v48, %v800_v27 }
 0x23e   :  { %v839_v55 = vadd.f32 %v835_v49, %v803_v21  ;;  %v812_v58 = vpop.xlane.xlu0 %811 }
 0x23f   :  { %v815_v60 = vpop.xlane.xlu1 %814  ;;  %v842_v62 = vadd.f32 %v838_v52, %v812_v58 }
 0x240   :  { %v843_v63 = vadd.f32 %v839_v55, %v815_v60  ;;  %v867_v55 = vld [vmem:[#allocation7 + $0x8] sm:$0xff] }
 0x241   :  { %v850_v1 = vmul.f32 0.125, %v842_v62 }
 0x242   :  { %v851_v3 = vmul.f32 0.125, %v843_v63  ;;  %v730_v6 = vpop.xlane.xlu0 %729 }
 0x243   :  { %v858_v7 = vsub.f32 %v850_v1, %v854_v12  ;;  %v733_v8 = vpop.xlane.xlu1 %732  ;;  %v824_v26 = vadd.f32 %v730_v6, %v718_v29 }
 0x244   :  { %v859_v10 = vsub.f32 %v851_v3, %v855_v5  ;;  %v825_v19 = vadd.f32 %v733_v8, %v721_v24  ;;  %v869_v5 = vld [vmem:[#allocation7 + $0x18] sm:$0xff]  ;;  %v883_v8 = vld [vmem:[#allocation8 + $0x8] sm:$0xff] }
 0x245   :  { %v862_v14 = vmax.f32 %v858_v7, 0.0  ;;  %v828_v18 = vadd.f32 %v824_v26, %v742_v54 }
 0x246   :  { %v863_v16 = vmax.f32 %v859_v10, 0.0  ;;  %v829_v17 = vadd.f32 %v825_v19, %v745_v28  ;;  %v754_v40 = vpop.xlane.xlu0 %753  ;;  %v868_v19 = vld [vmem:[#allocation7 + $0x10] sm:$0xff] }
 0x247   :  { %v870_v21 = vadd.f32 1e-05, %v862_v14  ;;  %v757_v33 = vpop.xlane.xlu1 %756  ;;  %v832_v35 = vadd.f32 %v828_v18, %v754_v40 }
 0x248   :  { %v871_v27 = vadd.f32 1e-05, %v863_v16  ;;  %v833_v34 = vadd.f32 %v829_v17, %v757_v33  ;;  %v882_v17 = vld [vmem:[#allocation8] sm:$0xff] }
 0x249   :  { %1357 = vrsqrt.f32 %v870_v21  ;;  %v848_v42 = vmul.f32 0.125, %v832_v35  ;;  %v884_v21 = vld [vmem:[#allocation8 + $0x10] sm:$0xff] }
 0x24a   :  { %1359 = vrsqrt.f32 %v871_v27  ;;  %v794_v36 = vpop.xlane.xlu0 %793  ;;  %v849_v29 = vmul.f32 0.125, %v833_v34  ;;  %v885_v34 = vld [vmem:[#allocation8 + $0x18] sm:$0xff] }
 0x24b   :  { %v797_v37 = vpop.xlane.xlu1 %796  ;;  %v836_v38 = vadd.f32 %v794_v36, %v782_v30  ;;  %v856_v49 = vmul.f32 %v848_v42, %v848_v42 }
 0x24c   :  { %v837_v39 = vadd.f32 %v797_v37, %v785_v47  ;;  %v857_v48 = vmul.f32 %v849_v29, %v849_v29 }
 0x24d   :  { %v840_v41 = vadd.f32 %v836_v38, %v806_v31 }
 0x24e   :  { %v841_v24 = vadd.f32 %v837_v39, %v809_v32  ;;  %v818_v43 = vpop.xlane.xlu0 %817 }
 0x24f   :  { %v821_v44 = vpop.xlane.xlu1 %820  ;;  %v844_v28 = vadd.f32 %v840_v41, %v818_v43 }
 0x250   :  { %v845_v54 = vadd.f32 %v841_v24, %v821_v44 }
 0x251   :  { %v852_v45 = vmul.f32 0.125, %v844_v28 }
 0x252   :  { %v853_v52 = vmul.f32 0.125, %v845_v54 }
 0x253   :  { %v1358_v58 = vpop.eup %1357  ;;  %v860_v63 = vsub.f32 %v852_v45, %v856_v49 }
 0x254   :  { %v1360_v60 = vpop.eup %1359  ;;  %v861_v62 = vsub.f32 %v853_v52, %v857_v48  ;;  %v878_v30 = vmul.f32 %v1358_v58, %v866_v46 }
 0x255   :  { %v879_v47 = vmul.f32 %v1360_v60, %v867_v55  ;;  %v864_v12 = vmax.f32 %v860_v63, 0.0 }
 0x256   :  { %v865_v31 = vmax.f32 %v861_v62, 0.0  ;;  %896 = vperm.xlu0 %1355, %v878_v30   ;;  %v886_v16 = vmul.f32 %v878_v30, %v1734_v50 }
 0x257   :  { %901 = vperm.xlu1 %1356, %v879_v47   ;;  %v872_v1 = vadd.f32 1e-05, %v864_v12  ;;  %v887_v7 = vmul.f32 %v879_v47, %v1736_v53 }
 0x258   :  { %v873_v32 = vadd.f32 1e-05, %v865_v31  ;;  %v890_v18 = vsub.f32 %v882_v17, %v886_v16 }
 0x259   :  { %v891_v26 = vsub.f32 %v883_v8, %v887_v7 }
 0x25a   :  { %1361 = vrsqrt.f32 %v873_v32 }
 0x25b   :  { %1363 = vrsqrt.f32 %v872_v1 }
 0x264   :  { %v1362_v3 = vpop.eup %1361 }
 0x265   :  { %v881_v6 = vmul.f32 %v1362_v3, %v869_v5  ;;  %v1364_v10 = vpop.eup %1363 }
 0x266   :  { %v880_v14 = vmul.f32 %v1364_v10, %v868_v19 }
 0x267   :  { %911 = vperm.xlu1 %1356, %v881_v6   ;;  %v889_v27 = vmul.f32 %v881_v6, %v849_v29 }
 0x268   :  { %v888_v40 = vmul.f32 %v880_v14, %v848_v42 }
 0x269   :  { %v893_v53 = vsub.f32 %v885_v34, %v889_v27 }
 0x26a   :  { %v892_v33 = vsub.f32 %v884_v21, %v888_v40 }
 0x26b   :  { %937 = vperm.xlu1 %1356, %v891_v26  }
 0x26f   :  { %906 = vperm.xlu1 %1356, %v880_v14  }
 0x273   :  { %932 = vperm.xlu1 %1356, %v890_v18  }
 0x277   :  { %942 = vperm.xlu1 %1356, %v892_v33  }
 0x27b   :  { %947 = vperm.xlu1 %1356, %v893_v53  }
 0x2d5   :  { %v897_v46 = vpop.permute.xlu0 %896 }
 0x2d6   :  { %v902_v35 = vpop.permute.xlu1 %901 }
 0x2d7   :  { %v915_v37 = vmul.f32 %v902_v35, %v1615_v51  ;;  %v919_v38 = vmul.f32 %v902_v35, %v1646_v9  ;;  %v923_v50 = vmul.f32 %v902_v35, %v1617_v56  ;;  %v927_v39 = vmul.f32 %v902_v35, %v1648_v11 }
 0x2d8   :  { %v914_v51 = vmul.f32 %v897_v46, %v1620_v57  ;;  %v918_v56 = vmul.f32 %v897_v46, %v1651_v13  ;;  %v922_v9 = vmul.f32 %v897_v46, %v1622_v59  ;;  %v926_v11 = vmul.f32 %v897_v46, %v1653_v15 }
 0x2e6   :  { %v912_v36 = vpop.permute.xlu1 %911 }
 0x2e7   :  { %v925_v1 = vmul.f32 %v912_v36, %v1633_v2  ;;  %v929_v5 = vmul.f32 %v912_v36, %v1663_v22 }
 0x2ea   :  { %v938_v41 = vpop.permute.xlu1 %937 }
 0x2eb   :  { %v951_v42 = vadd.f32 %v938_v41, %v915_v37  ;;  %v955_v24 = vadd.f32 %v938_v41, %v919_v38  ;;  %v959_v43 = vadd.f32 %v938_v41, %v923_v50  ;;  %v963_v44 = vadd.f32 %v938_v41, %v927_v39 }
 0x2ed   :  { %v967_v29 = vmax.f32 %v951_v42, 0.0  ;;  %v971_v28 = vmax.f32 %v955_v24, 0.0  ;;  %v975_v54 = vmax.f32 %v959_v43, 0.0  ;;  %v979_v45 = vmax.f32 %v963_v44, 0.0 }
 0x2ee   :  { %v907_v48 = vpop.permute.xlu1 %906 }
 0x2ef   :  { %983 = vst.msk [vmem:[#allocation10 + $0x8] sm:$0xff] %vm709_vm1, %v967_v29  ;;  %987 = vst.msk [vmem:[#allocation10 + $0x28] sm:$0xff] %vm709_vm1, %v971_v28  ;;  %v916_v62 = vmul.f32 %v907_v48, %v1636_v61  ;;  %v920_v63 = vmul.f32 %v907_v48, %v1666_v23  ;;  %v924_v30 = vmul.f32 %v907_v48, %v1638_v4 }
 0x2f0   :  { %991 = vst.msk [vmem:[#allocation10 + $0x48] sm:$0xff] %vm709_vm1, %v975_v54  ;;  %995 = vst.msk [vmem:[#allocation10 + $0x68] sm:$0xff] %vm709_vm1, %v979_v45  ;;  %v928_v47 = vmul.f32 %v907_v48, %v1668_v25  ;;  %v917_v4 = vmul.f32 %v912_v36, %v1631_v0  ;;  %v921_v25 = vmul.f32 %v912_v36, %v1661_v20 }
 0x2f2   :  { %v933_v49 = vpop.permute.xlu1 %932 }
 0x2f3   :  { %v950_v52 = vadd.f32 %v933_v49, %v914_v51  ;;  %v954_v55 = vadd.f32 %v933_v49, %v918_v56  ;;  %v958_v58 = vadd.f32 %v933_v49, %v922_v9  ;;  %v962_v60 = vadd.f32 %v933_v49, %v926_v11 }
 0x2f5   :  { %v966_v57 = vmax.f32 %v950_v52, 0.0  ;;  %v970_v31 = vmax.f32 %v954_v55, 0.0  ;;  %v974_v13 = vmax.f32 %v958_v58, 0.0  ;;  %v978_v32 = vmax.f32 %v962_v60, 0.0 }
 0x2f6   :  { %v943_v59 = vpop.permute.xlu1 %942 }
 0x2f7   :  { %982 = vst.msk [vmem:[#allocation10] sm:$0xff] %vm709_vm1, %v966_v57  ;;  %986 = vst.msk [vmem:[#allocation10 + $0x20] sm:$0xff] %vm709_vm1, %v970_v31  ;;  %v952_v61 = vadd.f32 %v943_v59, %v916_v62  ;;  %v956_v15 = vadd.f32 %v943_v59, %v920_v63  ;;  %v960_v23 = vadd.f32 %v943_v59, %v924_v30 }
 0x2f8   :  { %990 = vst.msk [vmem:[#allocation10 + $0x40] sm:$0xff] %vm709_vm1, %v974_v13  ;;  %994 = vst.msk [vmem:[#allocation10 + $0x60] sm:$0xff] %vm709_vm1, %v978_v32  ;;  %v964_v12 = vadd.f32 %v943_v59, %v928_v47 }
 0x2f9   :  { %v968_v3 = vmax.f32 %v952_v61, 0.0  ;;  %v972_v6 = vmax.f32 %v956_v15, 0.0  ;;  %v976_v7 = vmax.f32 %v960_v23, 0.0 }
 0x2fa   :  { %v980_v8 = vmax.f32 %v964_v12, 0.0  ;;  %v948_v26 = vpop.permute.xlu1 %947 }
 0x2fb   :  { %984 = vst.msk [vmem:[#allocation10 + $0x10] sm:$0xff] %vm709_vm1, %v968_v3  ;;  %988 = vst.msk [vmem:[#allocation10 + $0x30] sm:$0xff] %vm709_vm1, %v972_v6  ;;  %v953_v0 = vadd.f32 %v948_v26, %v917_v4  ;;  %v957_v20 = vadd.f32 %v948_v26, %v921_v25  ;;  %v961_v2 = vadd.f32 %v948_v26, %v925_v1 }
 0x2fc   :  { %992 = vst.msk [vmem:[#allocation10 + $0x50] sm:$0xff] %vm709_vm1, %v976_v7  ;;  %996 = vst.msk [vmem:[#allocation10 + $0x70] sm:$0xff] %vm709_vm1, %v980_v8  ;;  %v965_v10 = vadd.f32 %v948_v26, %v929_v5 }
 0x2fd   :  { %v969_v22 = vmax.f32 %v953_v0, 0.0  ;;  %v973_v19 = vmax.f32 %v957_v20, 0.0  ;;  %v977_v14 = vmax.f32 %v961_v2, 0.0 }
 0x2fe   :  { %v981_v16 = vmax.f32 %v965_v10, 0.0 }
 0x2ff   :  { %985 = vst.msk [vmem:[#allocation10 + $0x18] sm:$0xff] %vm709_vm1, %v969_v22  ;;  %989 = vst.msk [vmem:[#allocation10 + $0x38] sm:$0xff] %vm709_vm1, %v973_v19 }
 0x300   :  { %993 = vst.msk [vmem:[#allocation10 + $0x58] sm:$0xff] %vm709_vm1, %v977_v14  ;;  %997 = vst.msk [vmem:[#allocation10 + $0x78] sm:$0xff] %vm709_vm1, %v981_v16 }
 0x301   :  { %1464 = shalt.err (!%p1461_p8)
}
 0x302   :  { %s1465_s17 = scalar_lea.hbm %s1795_s4, 2048 }
 0x303   :  { %p1466_p9 = scmp.ne.s32.totalorder %s1795_s4, %s1465_s17  ;;  %p1469_p10 = scmp.lt.u32.totalorder %s1465_s17, %s1795_s4 }
 0x305   :  { %p1471_p11 = pnand %p1469_p10, %p1466_p9 }
 0x307   :  { %1474 = shalt.err (!%p1471_p11)
}
 0x308   :  { %1009 = dma.vmem_to_hbm [thread:$0]  %s1004_s13, 2048, %s1795_s4, [#allocation4], %s1484_s25, %s1484_s25, %s1485_s26  }
 0x309   :  { %1481 = dma.done.wait [#allocation4], 2048  }
 0x30a   :  { %1482 = vsyncadd [#allocation4], 4294965248 }
 0x30b   :  { %1013 = vsyncpa [#allocation3], 1 }
 0x30c   :  { %1014 = vsyncpa [#allocation6], 1 }
 0x30d   :  { %1015 = vsyncpa [#allocation9], 1 }
 0x30e   :  { %1016 = vsyncpa [#allocation4], 1 }

// kernel: generator_forward.12
= control target key start
LH: loop header
LB: loop body
LE: loop exit
PB: predicated region body
PF: predicated region fallthrough
CT: control target
= control target key end

     0   :  { %9 = vsyncpa [#allocation3], 0  ;;  %s1012_s0 = inlined_call_operand.hbm [shape: f32[64,288], index: 0, kind: input, shape index: {}]   ;;  %s1013_s1 = inlined_call_operand.hbm [shape: f32[288,8], index: 1, kind: input, shape index: {}]   ;;  %s1014_s2 = inlined_call_operand.hbm [shape: f32[16,1], index: 2, kind: input, shape index: {}]   ;;  %s1015_s3 = inlined_call_operand.hbm [shape: f32[16,1], index: 3, kind: input, shape index: {}]   ;;  %s1016_s4 = inlined_call_operand.hbm [shape: f32[64,8], index: 4, kind: output, shape index: {}]  }
   0x1   :  { %10 = vsyncpa [#allocation6], 0 }
   0x2   :  { %11 = vsyncpa [#allocation9], 0 }
   0x3   :  { %12 = vsyncpa [#allocation4], 0  ;;  %s818_s15 = smov [#allocation5]   ;;  %s700_s19 = scalar_lea.hbm %s1013_s1, 4608 }
   0x4   :  { %s30_s16 = sshll.u32 %s818_s15, 4  ;;  %p701_p0 = scmp.ne.s32.totalorder %s1013_s1, %s700_s19  ;;  %s31_s16 = int_to_ptr.vmem [resolvable:$true] %s30_s16 }
   0x5   :  { %p704_p1 = scmp.lt.u32.totalorder %s700_s19, %s1013_s1 }
   0x7   :  { %p706_p2 = pnand %p704_p1, %p701_p0 }
   0x9   :  { %709 = shalt.err (!%p706_p2)
}
   0xa   :  { %s710_s24 = scalar_lea.vmem %s31_s16, 4608  ;;  %p715_p4 = scmp.lt.s32.totalorder %s31_s16, %s31_s16 }
   0xb   :  { %p711_p3 = scmp.ne.s32.totalorder %s31_s16, %s710_s24  ;;  %p716_p5 = scmp.lt.s32.totalorder %s710_s24, %s710_s24 }
   0xd   :  { %p717_p6 = por %p716_p5, %p715_p4 }
   0xf   :  { %p718_p7 = pnand %p717_p6, %p711_p3 }
  0x11   :  { %721 = shalt.err (!%p718_p7)
}
  0x12   :  { %s819_s25 = smov 128   ;;  %s820_s26 = smov 8  }
  0x13   :  { %36 = dma.hbm_to_vmem [thread:$0]  %s1013_s1, 4608, %s31_s16, [#allocation6], %s819_s25, %s819_s25, %s820_s26  }
  0x14   :  { %s821_s29 = smov [#allocation2]   ;;  %s722_s7 = scalar_lea.hbm %s1012_s0, 3072 }
  0x15   :  { %s18_s30 = sshll.u32 %s821_s29, 4  ;;  %p723_p8 = scmp.ne.s32.totalorder %s1012_s0, %s722_s7  ;;  %s19_s30 = int_to_ptr.vmem [resolvable:$true] %s18_s30 }
  0x16   :  { %p726_p9 = scmp.lt.u32.totalorder %s722_s7, %s1012_s0 }
  0x18   :  { %p728_p10 = pnand %p726_p9, %p723_p8 }
  0x1a   :  { %731 = shalt.err (!%p728_p10)
}
  0x1b   :  { %s732_s12 = scalar_lea.vmem %s19_s30, 3072  ;;  %p737_p12 = scmp.lt.s32.totalorder %s19_s30, %s19_s30 }
  0x1c   :  { %p733_p11 = scmp.ne.s32.totalorder %s19_s30, %s732_s12  ;;  %p738_p13 = scmp.lt.s32.totalorder %s732_s12, %s732_s12 }
  0x1e   :  { %p739_p0 = por %p738_p13, %p737_p12 }
  0x20   :  { %p740_p1 = pnand %p739_p0, %p733_p11 }
  0x22   :  { %743 = shalt.err (!%p740_p1)
}
  0x23   :  { %s822_s1 = smov 384   ;;  %s823_s13 = smov 24  }
  0x24   :  { %24 = dma.hbm_to_vmem [thread:$0]  %s1012_s0, 3072, %s19_s30, [#allocation3], %s822_s1, %s822_s1, %s823_s13  }
  0x25   :  { %s824_s16 = smov [#allocation7]   ;;  %s825_s18 = smov [#allocation8]  }
  0x26   :  { %s42_s17 = sshll.u32 %s824_s16, 4  ;;  %s54_s19 = sshll.u32 %s825_s18, 4  ;;  %s43_s17 = int_to_ptr.vmem [resolvable:$true] %s42_s17  ;;  %s880_s19 = int_to_ptr.vmem [resolvable:$true] %s54_s19 }
  0x27   :  { %s744_s22 = scalar_lea.hbm %s1014_s2, 256 }
  0x28   :  { %p745_p2 = scmp.ne.s32.totalorder %s1014_s2, %s744_s22  ;;  %p748_p3 = scmp.lt.u32.totalorder %s744_s22, %s1014_s2 }
  0x2a   :  { %p750_p4 = pnand %p748_p3, %p745_p2 }
  0x2c   :  { %753 = shalt.err (!%p750_p4)
}
  0x2d   :  { %s754_s0 = scalar_lea.vmem %s43_s17, 256  ;;  %p759_p6 = scmp.lt.s32.totalorder %s43_s17, %s43_s17 }
  0x2e   :  { %p755_p5 = scmp.ne.s32.totalorder %s43_s17, %s754_s0  ;;  %p760_p7 = scmp.lt.s32.totalorder %s754_s0, %s754_s0 }
  0x30   :  { %p761_p8 = por %p760_p7, %p759_p6 }
  0x32   :  { %p762_p9 = pnand %p761_p8, %p755_p5 }
  0x34   :  { %765 = shalt.err (!%p762_p9)
}
  0x35   :  { %48 = dma.hbm_to_vmem [thread:$0]  %s1014_s2, 256, %s43_s17, [#allocation6], %s819_s25, %s819_s25, %s820_s26  }
  0x36   :  { %s766_s7 = scalar_lea.hbm %s1015_s3, 256 }
  0x37   :  { %p767_p10 = scmp.ne.s32.totalorder %s1015_s3, %s766_s7  ;;  %p770_p11 = scmp.lt.u32.totalorder %s766_s7, %s1015_s3 }
  0x39   :  { %p772_p12 = pnand %p770_p11, %p767_p10 }
  0x3b   :  { %775 = shalt.err (!%p772_p12)
}
  0x3c   :  { %s776_s12 = scalar_lea.vmem %s880_s19, 256  ;;  %p781_p0 = scmp.lt.s32.totalorder %s880_s19, %s880_s19 }
  0x3d   :  { %p777_p13 = scmp.ne.s32.totalorder %s880_s19, %s776_s12  ;;  %p782_p1 = scmp.lt.s32.totalorder %s776_s12, %s776_s12 }
  0x3f   :  { %p783_p2 = por %p782_p1, %p781_p0 }
  0x41   :  { %p784_p3 = pnand %p783_p2, %p777_p13 }
  0x43   :  { %787 = shalt.err (!%p784_p3)
}
  0x44   :  { %60 = dma.hbm_to_vmem [thread:$0]  %s1015_s3, 256, %s880_s19, [#allocation9], %s819_s25, %s819_s25, %s820_s26  }
  0x45   :  { %810 = dma.done.wait [#allocation3], 3072  }
  0x46   :  { %811 = vsyncadd [#allocation3], 4294964224 }
  0x47   :  { %812 = dma.done.wait [#allocation6], 4864  }
  0x48   :  { %813 = vsyncadd [#allocation6], 4294962432 }
  0x49   :  { %814 = dma.done.wait [#allocation9], 256  }
  0x4a   :  { %815 = vsyncadd [#allocation9], 4294967040  ;;  %v113_v0 = vld [vmem:[#allocation5 + $0x80] sm:$0xff]  ;;  %v114_v1 = vld [vmem:[#allocation5 + $0x88] sm:$0xff]  ;;  %vm133_vm0 = vcmask 261120   ;;  %vm368_vm1 = vcmask 64512  }
  0x4b   :  { %v97_v2 = vld [vmem:[#allocation5] sm:$0xff]  ;;  %v628_v3 = vpack.c.bf16 %v114_v1, %v113_v0  ;;  %v98_v4 = vld [vmem:[#allocation5 + $0x8] sm:$0xff]  ;;  %v115_v5 = vld [vmem:[#allocation5 + $0x90] sm:$0xff]  ;;  %s827_s3 = smov [#allocation10]  }
  0x4c   :  { %v116_v6 = vld [vmem:[#allocation5 + $0x98] sm:$0xff]  ;;  %v630_v7 = vpack.c.bf16 %v98_v4, %v97_v2  ;;  %v99_v9 = vld [vmem:[#allocation5 + $0x10] sm:$0xff]  ;;  %v117_v11 = vld [vmem:[#allocation5 + $0xa0] sm:$0xff]  ;;  %s518_s13 = sshll.u32 %s827_s3, 4  ;;  %s519_s13 = int_to_ptr.vmem [resolvable:$true] %s518_s13 }
  0x4d   :  { %v632_v8 = vpack.c.bf16 %v116_v6, %v115_v5  ;;  %v100_v10 = vld [vmem:[#allocation5 + $0x18] sm:$0xff]  ;;  %629 = vmatprep.subr.bf16.mxu0 %v628_v3  ;;  %668 = vmatprep.subr.bf16.mxu1 %v628_v3  ;;  %v118_v12 = vld [vmem:[#allocation5 + $0xa8] sm:$0xff]  ;;  %v101_v15 = vld [vmem:[#allocation5 + $0x20] sm:$0xff]  ;;  %s788_s14 = scalar_lea.vmem %s519_s13, 1024  ;;  %p793_p5 = scmp.lt.s32.totalorder %s519_s13, %s519_s13 }
  0x4e   :  { %631 = vmatpush3.bf16.msra.mxu0 %v630_v7  ;;  %676 = vmatpush3.bf16.msra.mxu1 %v630_v7  ;;  %v634_v13 = vpack.c.bf16 %v100_v10, %v99_v9  ;;  %v636_v14 = vpack.c.bf16 %v118_v12, %v117_v11  ;;  %v102_v16 = vld [vmem:[#allocation5 + $0x28] sm:$0xff]  ;;  %v119_v17 = vld [vmem:[#allocation5 + $0xb0] sm:$0xff]  ;;  %v120_v18 = vld [vmem:[#allocation5 + $0xb8] sm:$0xff]  ;;  %p789_p4 = scmp.ne.s32.totalorder %s519_s13, %s788_s14  ;;  %p794_p6 = scmp.lt.s32.totalorder %s788_s14, %s788_s14 }
  0x4f   :  { %633 = vmatprep.subr.bf16.mxu0 %v632_v8  ;;  %669 = vmatprep.subr.bf16.mxu1 %v632_v8  ;;  %v638_v19 = vpack.c.bf16 %v102_v16, %v101_v15  ;;  %v640_v20 = vpack.c.bf16 %v120_v18, %v119_v17  ;;  %v103_v21 = vld [vmem:[#allocation5 + $0x30] sm:$0xff]  ;;  %v104_v22 = vld [vmem:[#allocation5 + $0x38] sm:$0xff]  ;;  %v121_v23 = vld [vmem:[#allocation5 + $0xc0] sm:$0xff] }
  0x50   :  { %v122_v24 = vld [vmem:[#allocation5 + $0xc8] sm:$0xff]  ;;  %v92_v26 = vld [vmem:[#allocation2 + $0x98] sm:$0xff]  ;;  %v642_v27 = vpack.c.bf16 %v104_v22, %v103_v21  ;;  %v105_v29 = vld [vmem:[#allocation5 + $0x40] sm:$0xff]  ;;  %p795_p7 = por %p794_p6, %p793_p5 }
  0x51   :  { %v74_v25 = vld [vmem:[#allocation2 + $0x8] sm:$0xff]  ;;  %v644_v28 = vpack.c.bf16 %v122_v24, %v121_v23  ;;  %v123_v31 = vld [vmem:[#allocation5 + $0xd0] sm:$0xff]  ;;  %v124_v32 = vld [vmem:[#allocation5 + $0xd8] sm:$0xff]  ;;  %252 = vmatprep.mubr.f32.mxu1 %v92_v26 }
  0x52   :  { %635 = vmatpush3.bf16.msra.mxu0 %v634_v13  ;;  %677 = vmatpush3.bf16.msra.mxu1 %v634_v13  ;;  %v106_v30 = vld [vmem:[#allocation5 + $0x48] sm:$0xff]  ;;  %v648_v34 = vpack.c.bf16 %v124_v32, %v123_v31  ;;  %v107_v35 = vld [vmem:[#allocation5 + $0x50] sm:$0xff]  ;;  %v108_v36 = vld [vmem:[#allocation5 + $0x58] sm:$0xff]  ;;  %p796_p8 = pnand %p795_p7, %p789_p4 }
  0x53   :  { %637 = vmatprep.subr.bf16.mxu0 %v636_v14  ;;  %670 = vmatprep.subr.bf16.mxu1 %v636_v14  ;;  %v646_v33 = vpack.c.bf16 %v106_v30, %v105_v29  ;;  %v125_v37 = vld [vmem:[#allocation5 + $0xe0] sm:$0xff]  ;;  %v126_v38 = vld [vmem:[#allocation5 + $0xe8] sm:$0xff]  ;;  %v650_v39 = vpack.c.bf16 %v108_v36, %v107_v35  ;;  %v127_v43 = vld [vmem:[#allocation5 + $0xf0] sm:$0xff] }
  0x54   :  { %222 = vmatprep.mubr.f32.mxu0 %v74_v25  ;;  %v652_v40 = vpack.c.bf16 %v126_v38, %v125_v37  ;;  %v109_v41 = vld [vmem:[#allocation5 + $0x60] sm:$0xff]  ;;  %v110_v42 = vld [vmem:[#allocation5 + $0x68] sm:$0xff]  ;;  %v128_v44 = vld [vmem:[#allocation5 + $0xf8] sm:$0xff] }
  0x55   :  { %v654_v45 = vpack.c.bf16 %v110_v42, %v109_v41  ;;  %v656_v46 = vpack.c.bf16 %v128_v44, %v127_v43  ;;  %v111_v47 = vld [vmem:[#allocation5 + $0x70] sm:$0xff]  ;;  %v112_v48 = vld [vmem:[#allocation5 + $0x78] sm:$0xff]  ;;  %v129_v49 = vld [vmem:[#allocation5 + $0x100] sm:$0xff] }
  0x56   :  { %639 = vmatpush3.bf16.msra.mxu0 %v638_v19  ;;  %678 = vmatpush3.bf16.msra.mxu1 %v638_v19  ;;  %v130_v50 = vld [vmem:[#allocation5 + $0x108] sm:$0xff]  ;;  %v658_v51 = vpack.c.bf16 %v112_v48, %v111_v47  ;;  %v131_v53 = vld [vmem:[#allocation5 + $0x110] sm:$0xff]  ;;  %v132_v54 = vld [vmem:[#allocation5 + $0x118] sm:$0xff] }
  0x57   :  { %641 = vmatprep.subr.bf16.mxu0 %v640_v20  ;;  %671 = vmatprep.subr.bf16.mxu1 %v640_v20  ;;  %v660_v52 = vpack.c.bf16 %v130_v50, %v129_v49  ;;  %v73_v55 = vld [vmem:[#allocation2] sm:$0xff]  ;;  %v91_v56 = vld [vmem:[#allocation2 + $0x90] sm:$0xff]  ;;  %v664_v58 = vpack.c.bf16 %v132_v54, %v131_v53  ;;  %v76_v60 = vld [vmem:[#allocation2 + $0x18] sm:$0xff] }
  0x58   :  { %v77_v57 = vld [vmem:[#allocation2 + $0x20] sm:$0xff]  ;;  %v95_v59 = vld [vmem:[#allocation2 + $0xb0] sm:$0xff]  ;;  %v94_v61 = vld [vmem:[#allocation2 + $0xa8] sm:$0xff] }
  0x59   :  { %v80_v62 = vld [vmem:[#allocation2 + $0x38] sm:$0xff]  ;;  %v75_v63 = vld [vmem:[#allocation2 + $0x10] sm:$0xff]  ;;  %v78_v1 = vld [vmem:[#allocation2 + $0x28] sm:$0xff] }
  0x5a   :  { %643 = vmatpush3.bf16.msra.mxu0 %v642_v27  ;;  %679 = vmatpush3.bf16.msra.mxu1 %v642_v27  ;;  %v79_v0 = vld [vmem:[#allocation2 + $0x30] sm:$0xff]  ;;  %v81_v3 = vld [vmem:[#allocation2 + $0x40] sm:$0xff]  ;;  %v82_v4 = vld [vmem:[#allocation2 + $0x48] sm:$0xff] }
  0x5b   :  { %645 = vmatprep.subr.bf16.mxu0 %v644_v28  ;;  %672 = vmatprep.subr.bf16.mxu1 %v644_v28  ;;  %v83_v2 = vld [vmem:[#allocation2 + $0x50] sm:$0xff]  ;;  %v84_v5 = vld [vmem:[#allocation2 + $0x58] sm:$0xff]  ;;  %v86_v6 = vld [vmem:[#allocation2 + $0x68] sm:$0xff] }
  0x5c   :  { %v87_v7 = vld [vmem:[#allocation2 + $0x70] sm:$0xff]  ;;  %v85_v8 = vld [vmem:[#allocation2 + $0x60] sm:$0xff]  ;;  %v90_v9 = vld [vmem:[#allocation2 + $0x88] sm:$0xff] }
  0x5d   :  { %v89_v10 = vld [vmem:[#allocation2 + $0x80] sm:$0xff]  ;;  %v88_v12 = vld [vmem:[#allocation2 + $0x78] sm:$0xff] }
  0x5e   :  { %647 = vmatpush3.bf16.msra.mxu0 %v646_v33  ;;  %680 = vmatpush3.bf16.msra.mxu1 %v646_v33  ;;  %v93_v11 = vld [vmem:[#allocation2 + $0xa0] sm:$0xff]  ;;  %v96_v13 = vld [vmem:[#allocation2 + $0xb8] sm:$0xff] }
  0x5f   :  { %649 = vmatprep.subr.bf16.mxu0 %v648_v34  ;;  %673 = vmatprep.subr.bf16.mxu1 %v648_v34 }
  0x62   :  { %651 = vmatpush3.bf16.msra.mxu0 %v650_v39  ;;  %681 = vmatpush3.bf16.msra.mxu1 %v650_v39 }
  0x63   :  { %653 = vmatprep.subr.bf16.mxu0 %v652_v40  ;;  %674 = vmatprep.subr.bf16.mxu1 %v652_v40 }
  0x66   :  { %655 = vmatpush3.bf16.msra.mxu0 %v654_v45  ;;  %682 = vmatpush3.bf16.msra.mxu1 %v654_v45 }
  0x67   :  { %657 = vmatprep.subr.bf16.mxu0 %v656_v46  ;;  %675 = vmatprep.subr.bf16.mxu1 %v656_v46 }
  0x6a   :  { %659 = vmatpush3.bf16.msra.mxu0 %v658_v51  ;;  %683 = vmatpush3.bf16.msra.mxu1 %v658_v51 }
  0x6b   :  { %661 = vmatprep.subr.bf16.mxu1 %v660_v52 }
  0x6d   :  { %223 = vmatmul.mubr.f32.vlgmr.msra.gmra.mrb[0].mxu0 %v73_v55  ;;  %253 = vmatmul.mubr.f32.vlgmr.msra.gmra.mrb[0].mxu1 %v91_v56 }
  0x6e   :  { %663 = vmatpush3.bf16.msra.mxu1 %v660_v52  ;;  %227 = vmatprep.mubr.f32.mxu0 %v77_v57 }
  0x6f   :  { %257 = vmatprep.mubr.f32.mxu1 %v95_v59  ;;  %665 = vmatprep.subr.bf16.mxu1 %v664_v58 }
  0x71   :  { %228 = vmatmul.mubr.f32.gmra.mrb[2].mxu0 %v76_v60  ;;  %258 = vmatmul.mubr.f32.gmra.mrb[2].mxu1 %v94_v61 }
  0x72   :  { %667 = vmatpush3.bf16.msra.mxu1 %v664_v58  ;;  %232 = vmatprep.mubr.f32.mxu0 %v80_v62 }
  0x73   :  { %616 = vmatprep.mubr.msk.f32.mxu1 %vm133_vm0, %v75_v63 }
  0x75   :  { %233 = vmatmul.mubr.f32.gmra.mrb[4].mxu0 %v79_v0  ;;  %617 = vmatmul.mubr.msk.f32.vlgmr.msra.gmra.mrb[4].mxu1 %vm133_vm0, %v78_v1 }
  0x76   :  { %237 = vmatprep.mubr.f32.mxu0 %v83_v2  ;;  %619 = vmatprep.mubr.msk.f32.mxu1 %vm133_vm0, %v81_v3 }
  0x79   :  { %238 = vmatmul.mubr.f32.gmra.mrb[6].mxu0 %v82_v4  ;;  %620 = vmatmul.mubr.msk.f32.gmra.mrb[6].mxu1 %vm133_vm0, %v84_v5 }
  0x7a   :  { %242 = vmatprep.mubr.f32.mxu0 %v86_v6  ;;  %622 = vmatprep.mubr.msk.f32.mxu1 %vm133_vm0, %v87_v7 }
  0x7d   :  { %243 = vmatmul.mubr.f32.gmra.mrb[8].mxu0 %v85_v8  ;;  %623 = vmatmul.mubr.msk.f32.gmra.mrb[8].mxu1 %vm133_vm0, %v90_v9 }
  0x7e   :  { %247 = vmatprep.mubr.f32.mxu0 %v89_v10  ;;  %625 = vmatprep.mubr.msk.f32.mxu1 %vm133_vm0, %v93_v11 }
  0x81   :  { %248 = vmatmul.mubr.f32.gmra.mrb[10].mxu0 %v88_v12  ;;  %626 = vmatmul.mubr.msk.f32.gmra.mrb[10].mxu1 %vm133_vm0, %v96_v13 }
 0x140   :  { %v590_v14 = vpop.f32.mrb[0].mxu1  ;;  %v572_v15 = vpop.f32.mrb[0].mxu0 }
 0x141   :  { %v591_v16 = vpop.f32.mrb[1].mxu1  ;;  %v573_v17 = vpop.f32.mrb[1].mxu0 }
 0x142   :  { %v592_v18 = vadd.f32 %v591_v16, %v590_v14  ;;  %v574_v19 = vadd.f32 %v573_v17, %v572_v15  ;;  %v826_v14 = vmov 0  }
 0x143   :  { %694 = vset.pattern.permute.xlu0 %v826_v14  ;;  %695 = vset.pattern.permute.xlu1 %v826_v14 }
 0x144   :  { %v593_v20 = vpop.f32.mrb[2].mxu1  ;;  %v575_v21 = vpop.f32.mrb[2].mxu0 }
 0x145   :  { %v594_v22 = vpop.f32.mrb[3].mxu1  ;;  %v576_v23 = vpop.f32.mrb[3].mxu0 }
 0x146   :  { %v595_v24 = vadd.f32 %v594_v22, %v593_v20  ;;  %v577_v25 = vadd.f32 %v576_v23, %v575_v21 }
 0x148   :  { %v618_v26 = vpop.f32.mrb[4].mxu1  ;;  %v578_v27 = vpop.f32.mrb[4].mxu0 }
 0x149   :  { %v925_v28 = vadd.f32 %v618_v26, %v577_v25  ;;  %v329_v29 = vpop.f32.mrb[5].mxu1  ;;  %v579_v30 = vpop.f32.mrb[5].mxu0 }
 0x14a   :  { %v927_v31 = vadd.f32 %v574_v19, %v329_v29  ;;  %v580_v32 = vadd.f32 %v579_v30, %v578_v27 }
 0x14b   :  { %v372_v33 = vsel %vm368_vm1, %v925_v28, 0.0  ;;  %v394_v34 = vmul.f32 %v925_v28, %v925_v28 }
 0x14c   :  { %v581_v35 = vpop.f32.mrb[6].mxu0  ;;  %373 = vadd.xlane.f32.xlu0 %v372_v33  ;;  %v621_v36 = vpop.f32.mrb[6].mxu1  ;;  %v369_v42 = vsel %vm368_vm1, %v927_v31, 0.0  ;;  %v393_v43 = vmul.f32 %v927_v31, %v927_v31 }
 0x14d   :  { %v582_v37 = vpop.f32.mrb[7].mxu0  ;;  %v339_v38 = vpop.f32.mrb[7].mxu1  ;;  %v404_v39 = vsel %vm368_vm1, %v394_v34, 0.0 }
 0x14e   :  { %v583_v40 = vadd.f32 %v582_v37, %v581_v35  ;;  %v934_v41 = vadd.f32 %v580_v32, %v339_v38  ;;  %405 = vadd.xlane.f32.xlu1 %v404_v39  ;;  %v401_v51 = vsel %vm368_vm1, %v393_v43, 0.0 }
 0x150   :  { %v940_v44 = vadd.f32 %v621_v36, %v583_v40  ;;  %370 = vadd.xlane.f32.xlu0 %v369_v42  ;;  %v584_v45 = vpop.f32.mrb[8].mxu0  ;;  %v624_v46 = vpop.f32.mrb[8].mxu1  ;;  %v375_v47 = vsel %vm368_vm1, %v934_v41, 0.0  ;;  %v395_v52 = vmul.f32 %v934_v41, %v934_v41 }
 0x151   :  { %v585_v48 = vpop.f32.mrb[9].mxu0  ;;  %v349_v49 = vpop.f32.mrb[9].mxu1 }
 0x152   :  { %376 = vadd.xlane.f32.xlu1 %v375_v47  ;;  %v586_v50 = vadd.f32 %v585_v48, %v584_v45  ;;  %v378_v59 = vsel %vm368_vm1, %v940_v44, 0.0  ;;  %v396_v60 = vmul.f32 %v940_v44, %v940_v44  ;;  %v407_v63 = vsel %vm368_vm1, %v395_v52, 0.0 }
 0x154   :  { %v947_v53 = vadd.f32 %v586_v50, %v349_v49  ;;  %v587_v54 = vpop.f32.mrb[10].mxu0  ;;  %v627_v55 = vpop.f32.mrb[10].mxu1  ;;  %402 = vadd.xlane.f32.xlu0 %v401_v51  ;;  %v410_v1 = vsel %vm368_vm1, %v396_v60, 0.0 }
 0x155   :  { %v949_v56 = vadd.f32 %v627_v55, %v595_v24  ;;  %v588_v57 = vpop.f32.mrb[11].mxu0  ;;  %v359_v58 = vpop.f32.mrb[11].mxu1 }
 0x156   :  { %v589_v61 = vadd.f32 %v588_v57, %v587_v54  ;;  %v955_v62 = vadd.f32 %v592_v18, %v359_v58  ;;  %379 = vadd.xlane.f32.xlu1 %v378_v59  ;;  %v381_v2 = vsel %vm368_vm1, %v947_v53, 0.0  ;;  %v397_v5 = vmul.f32 %v947_v53, %v947_v53 }
 0x157   :  { %v390_v3 = vsel %vm368_vm1, %v949_v56, 0.0  ;;  %v400_v11 = vmul.f32 %v949_v56, %v949_v56 }
 0x158   :  { %v958_v0 = vadd.f32 %v624_v46, %v589_v61  ;;  %408 = vadd.xlane.f32.xlu0 %v407_v63  ;;  %v387_v4 = vsel %vm368_vm1, %v955_v62, 0.0  ;;  %v413_v8 = vsel %vm368_vm1, %v397_v5, 0.0  ;;  %v399_v9 = vmul.f32 %v955_v62, %v955_v62  ;;  %v447_v61 = vld [vmem:[#allocation7] sm:$0xff] }
 0x159   :  { %v422_v13 = vsel %vm368_vm1, %v400_v11, 0.0 }
 0x15a   :  { %411 = vadd.xlane.f32.xlu1 %v410_v1  ;;  %v384_v6 = vsel %vm368_vm1, %v958_v0, 0.0  ;;  %v398_v7 = vmul.f32 %v958_v0, %v958_v0  ;;  %v419_v12 = vsel %vm368_vm1, %v399_v9, 0.0  ;;  %v448_v1 = vld [vmem:[#allocation7 + $0x8] sm:$0xff]  ;;  %v456_v9 = vld [vmem:[#allocation8 + $0x8] sm:$0xff] }
 0x15c   :  { %382 = vadd.xlane.f32.xlu0 %v381_v2  ;;  %v416_v10 = vsel %vm368_vm1, %v398_v7, 0.0 }
 0x15e   :  { %391 = vadd.xlane.f32.xlu1 %v390_v3 }
 0x160   :  { %388 = vadd.xlane.f32.xlu0 %v387_v4 }
 0x162   :  { %385 = vadd.xlane.f32.xlu1 %v384_v6  ;;  %v455_v6 = vld [vmem:[#allocation8] sm:$0xff] }
 0x164   :  { %414 = vadd.xlane.f32.xlu0 %v413_v8 }
 0x166   :  { %417 = vadd.xlane.f32.xlu1 %v416_v10 }
 0x168   :  { %420 = vadd.xlane.f32.xlu0 %v419_v12 }
 0x16a   :  { %423 = vadd.xlane.f32.xlu1 %v422_v13 }
 0x1d9   :  { %v374_v15 = vpop.xlane.xlu0 %373 }
 0x1db   :  { %v406_v16 = vpop.xlane.xlu1 %405 }
 0x1dd   :  { %v371_v17 = vpop.xlane.xlu0 %370 }
 0x1df   :  { %v377_v18 = vpop.xlane.xlu1 %376 }
 0x1e0   :  { %v425_v25 = vadd.f32 %v377_v18, %v371_v17 }
 0x1e1   :  { %v403_v19 = vpop.xlane.xlu0 %402 }
 0x1e3   :  { %v380_v20 = vpop.xlane.xlu1 %379 }
 0x1e4   :  { %v426_v27 = vadd.f32 %v380_v20, %v374_v15 }
 0x1e5   :  { %v409_v21 = vpop.xlane.xlu0 %408 }
 0x1e6   :  { %v431_v35 = vadd.f32 %v409_v21, %v403_v19 }
 0x1e7   :  { %v412_v22 = vpop.xlane.xlu1 %411 }
 0x1e8   :  { %v432_v38 = vadd.f32 %v412_v22, %v406_v16 }
 0x1e9   :  { %v383_v23 = vpop.xlane.xlu0 %382 }
 0x1ea   :  { %v427_v29 = vadd.f32 %v425_v25, %v383_v23 }
 0x1eb   :  { %v392_v24 = vpop.xlane.xlu1 %391 }
 0x1ed   :  { %v389_v26 = vpop.xlane.xlu0 %388 }
 0x1ee   :  { %v429_v32 = vadd.f32 %v427_v29, %v389_v26 }
 0x1ef   :  { %v386_v30 = vpop.xlane.xlu1 %385 }
 0x1f0   :  { %v428_v33 = vadd.f32 %v426_v27, %v386_v30  ;;  %v437_v39 = vmul.f32 0.03125, %v429_v32 }
 0x1f1   :  { %v415_v34 = vpop.xlane.xlu0 %414 }
 0x1f2   :  { %v430_v36 = vadd.f32 %v428_v33, %v392_v24  ;;  %v433_v40 = vadd.f32 %v431_v35, %v415_v34  ;;  %v441_v48 = vmul.f32 %v437_v39, %v437_v39 }
 0x1f3   :  { %v418_v37 = vpop.xlane.xlu1 %417 }
 0x1f4   :  { %v438_v43 = vmul.f32 0.03125, %v430_v36  ;;  %v434_v45 = vadd.f32 %v432_v38, %v418_v37 }
 0x1f5   :  { %v421_v42 = vpop.xlane.xlu0 %420 }
 0x1f6   :  { %v435_v46 = vadd.f32 %v433_v40, %v421_v42  ;;  %v442_v54 = vmul.f32 %v438_v43, %v438_v43 }
 0x1f7   :  { %v424_v47 = vpop.xlane.xlu1 %423 }
 0x1f8   :  { %v439_v49 = vmul.f32 0.03125, %v435_v46  ;;  %v436_v50 = vadd.f32 %v434_v45, %v424_v47 }
 0x1fa   :  { %v443_v51 = vsub.f32 %v439_v49, %v441_v48  ;;  %v440_v52 = vmul.f32 0.03125, %v436_v50 }
 0x1fc   :  { %v445_v55 = vmax.f32 %v443_v51, 0.0  ;;  %v444_v57 = vsub.f32 %v440_v52, %v442_v54 }
 0x1fe   :  { %v449_v58 = vadd.f32 1e-05, %v445_v55  ;;  %v446_v59 = vmax.f32 %v444_v57, 0.0 }
 0x200   :  { %696 = vrsqrt.f32 %v449_v58  ;;  %v450_v60 = vadd.f32 1e-05, %v446_v59 }
 0x202   :  { %698 = vrsqrt.f32 %v450_v60 }
 0x20a   :  { %v697_v63 = vpop.eup %696 }
 0x20b   :  { %v453_v2 = vmul.f32 %v697_v63, %v447_v61 }
 0x20c   :  { %v699_v3 = vpop.eup %698 }
 0x20d   :  { %463 = vperm.xlu0 %694, %v453_v2   ;;  %v454_v4 = vmul.f32 %v699_v3, %v448_v1  ;;  %v457_v5 = vmul.f32 %v453_v2, %v437_v39 }
 0x20f   :  { %468 = vperm.xlu1 %695, %v454_v4   ;;  %v459_v7 = vsub.f32 %v455_v6, %v457_v5  ;;  %v458_v8 = vmul.f32 %v454_v4, %v438_v43 }
 0x211   :  { %v460_v10 = vsub.f32 %v456_v9, %v458_v8 }
 0x213   :  { %481 = vperm.xlu1 %695, %v459_v7  }
 0x217   :  { %486 = vperm.xlu1 %695, %v460_v10  }
 0x28c   :  { %v464_v11 = vpop.permute.xlu0 %463 }
 0x28d   :  { %v471_v13 = vmul.f32 %v464_v11, %v927_v31  ;;  %v473_v14 = vmul.f32 %v464_v11, %v934_v41  ;;  %v475_v15 = vmul.f32 %v464_v11, %v947_v53  ;;  %v477_v16 = vmul.f32 %v464_v11, %v955_v62 }
 0x28e   :  { %v469_v12 = vpop.permute.xlu1 %468 }
 0x28f   :  { %v472_v22 = vmul.f32 %v469_v12, %v925_v28  ;;  %v474_v23 = vmul.f32 %v469_v12, %v940_v44  ;;  %v476_v24 = vmul.f32 %v469_v12, %v958_v0  ;;  %v478_v25 = vmul.f32 %v469_v12, %v949_v56 }
 0x292   :  { %v482_v17 = vpop.permute.xlu1 %481 }
 0x293   :  { %v489_v18 = vadd.f32 %v482_v17, %v471_v13  ;;  %v491_v19 = vadd.f32 %v482_v17, %v473_v14  ;;  %v493_v20 = vadd.f32 %v482_v17, %v475_v15  ;;  %v495_v21 = vadd.f32 %v482_v17, %v477_v16 }
 0x295   :  { %v497_v31 = vmax.f32 %v489_v18, 0.0  ;;  %v499_v26 = vmax.f32 %v491_v19, 0.0  ;;  %v501_v41 = vmax.f32 %v493_v20, 0.0  ;;  %v503_v27 = vmax.f32 %v495_v21, 0.0 }
 0x296   :  { %v487_v53 = vpop.permute.xlu1 %486 }
 0x297   :  { %505 = vst.msk [vmem:[#allocation10] sm:$0xff] %vm368_vm1, %v497_v31  ;;  %507 = vst.msk [vmem:[#allocation10 + $0x10] sm:$0xff] %vm368_vm1, %v499_v26  ;;  %v490_v28 = vadd.f32 %v487_v53, %v472_v22  ;;  %v492_v44 = vadd.f32 %v487_v53, %v474_v23  ;;  %v494_v62 = vadd.f32 %v487_v53, %v476_v24 }
 0x298   :  { %509 = vst.msk [vmem:[#allocation10 + $0x20] sm:$0xff] %vm368_vm1, %v501_v41  ;;  %511 = vst.msk [vmem:[#allocation10 + $0x30] sm:$0xff] %vm368_vm1, %v503_v27  ;;  %v496_v0 = vadd.f32 %v487_v53, %v478_v25 }
 0x299   :  { %v498_v56 = vmax.f32 %v490_v28, 0.0  ;;  %v500_v29 = vmax.f32 %v492_v44, 0.0  ;;  %v502_v30 = vmax.f32 %v494_v62, 0.0 }
 0x29a   :  { %v504_v32 = vmax.f32 %v496_v0, 0.0 }
 0x29b   :  { %506 = vst.msk [vmem:[#allocation10 + $0x8] sm:$0xff] %vm368_vm1, %v498_v56  ;;  %508 = vst.msk [vmem:[#allocation10 + $0x18] sm:$0xff] %vm368_vm1, %v500_v29 }
 0x29c   :  { %510 = vst.msk [vmem:[#allocation10 + $0x28] sm:$0xff] %vm368_vm1, %v502_v30  ;;  %512 = vst.msk [vmem:[#allocation10 + $0x38] sm:$0xff] %vm368_vm1, %v504_v32 }
 0x29d   :  { %799 = shalt.err (!%p796_p8)
}
 0x29e   :  { %s800_s17 = scalar_lea.hbm %s1016_s4, 1024 }
 0x29f   :  { %p801_p9 = scmp.ne.s32.totalorder %s1016_s4, %s800_s17  ;;  %p804_p10 = scmp.lt.u32.totalorder %s800_s17, %s1016_s4 }
 0x2a1   :  { %p806_p11 = pnand %p804_p10, %p801_p9 }
 0x2a3   :  { %809 = shalt.err (!%p806_p11)
}
 0x2a4   :  { %524 = dma.vmem_to_hbm [thread:$0]  %s519_s13, 1024, %s1016_s4, [#allocation4], %s819_s25, %s819_s25, %s820_s26  }
 0x2a5   :  { %816 = dma.done.wait [#allocation4], 1024  }
 0x2a6   :  { %817 = vsyncadd [#allocation4], 4294966272 }
 0x2a7   :  { %528 = vsyncpa [#allocation3], 1 }
 0x2a8   :  { %529 = vsyncpa [#allocation6], 1 }
 0x2a9   :  { %530 = vsyncpa [#allocation9], 1 }
 0x2aa   :  { %531 = vsyncpa [#allocation4], 1 }

// kernel: generator_forward.13
= control target key start
LH: loop header
LB: loop body
LE: loop exit
PB: predicated region body
PF: predicated region fallthrough
CT: control target
= control target key end

     0   :  { %9 = vsyncpa [#allocation3], 0  ;;  %s603_s0 = inlined_call_operand.hbm [shape: f32[32,144], index: 0, kind: input, shape index: {}]   ;;  %s604_s1 = inlined_call_operand.hbm [shape: f32[144,32], index: 1, kind: input, shape index: {}]   ;;  %s605_s2 = inlined_call_operand.hbm [shape: f32[8,1], index: 2, kind: input, shape index: {}]   ;;  %s606_s3 = inlined_call_operand.hbm [shape: f32[8,1], index: 3, kind: input, shape index: {}]   ;;  %s607_s4 = inlined_call_operand.hbm [shape: f32[32,32], index: 4, kind: output, shape index: {}]  }
   0x1   :  { %10 = vsyncpa [#allocation6], 0 }
   0x2   :  { %11 = vsyncpa [#allocation9], 0 }
   0x3   :  { %12 = vsyncpa [#allocation4], 0  ;;  %s467_s15 = smov [#allocation5]   ;;  %s349_s19 = scalar_lea.hbm %s604_s1, 2304 }
   0x4   :  { %s30_s16 = sshll.u32 %s467_s15, 4  ;;  %p350_p0 = scmp.ne.s32.totalorder %s604_s1, %s349_s19  ;;  %s31_s16 = int_to_ptr.vmem [resolvable:$true] %s30_s16 }
   0x5   :  { %p353_p1 = scmp.lt.u32.totalorder %s349_s19, %s604_s1 }
   0x7   :  { %p355_p2 = pnand %p353_p1, %p350_p0 }
   0x9   :  { %358 = shalt.err (!%p355_p2)
}
   0xa   :  { %s359_s24 = scalar_lea.vmem %s31_s16, 2304  ;;  %p364_p4 = scmp.lt.s32.totalorder %s31_s16, %s31_s16 }
   0xb   :  { %p360_p3 = scmp.ne.s32.totalorder %s31_s16, %s359_s24  ;;  %p365_p5 = scmp.lt.s32.totalorder %s359_s24, %s359_s24 }
   0xd   :  { %p366_p6 = por %p365_p5, %p364_p4 }
   0xf   :  { %p367_p7 = pnand %p366_p6, %p360_p3 }
  0x11   :  { %370 = shalt.err (!%p367_p7)
}
  0x12   :  { %s468_s25 = smov 128   ;;  %s469_s26 = smov 8  }
  0x13   :  { %36 = dma.hbm_to_vmem [thread:$0]  %s604_s1, 2304, %s31_s16, [#allocation6], %s468_s25, %s468_s25, %s469_s26  }
  0x14   :  { %s470_s29 = smov [#allocation2]   ;;  %s371_s7 = scalar_lea.hbm %s603_s0, 1024 }
  0x15   :  { %s18_s30 = sshll.u32 %s470_s29, 4  ;;  %p372_p8 = scmp.ne.s32.totalorder %s603_s0, %s371_s7  ;;  %s19_s30 = int_to_ptr.vmem [resolvable:$true] %s18_s30 }
  0x16   :  { %p375_p9 = scmp.lt.u32.totalorder %s371_s7, %s603_s0 }
  0x18   :  { %p377_p10 = pnand %p375_p9, %p372_p8 }
  0x1a   :  { %380 = shalt.err (!%p377_p10)
}
  0x1b   :  { %s381_s12 = scalar_lea.vmem %s19_s30, 1024  ;;  %p386_p12 = scmp.lt.s32.totalorder %s19_s30, %s19_s30 }
  0x1c   :  { %p382_p11 = scmp.ne.s32.totalorder %s19_s30, %s381_s12  ;;  %p387_p13 = scmp.lt.s32.totalorder %s381_s12, %s381_s12 }
  0x1e   :  { %p388_p0 = por %p387_p13, %p386_p12 }
  0x20   :  { %p389_p1 = pnand %p388_p0, %p382_p11 }
  0x22   :  { %392 = shalt.err (!%p389_p1)
}
  0x23   :  { %s471_s1 = smov 256   ;;  %s472_s13 = smov 16  }
  0x24   :  { %24 = dma.hbm_to_vmem [thread:$0]  %s603_s0, 1024, %s19_s30, [#allocation3], %s471_s1, %s471_s1, %s472_s13  }
  0x25   :  { %s473_s16 = smov [#allocation7]   ;;  %s474_s18 = smov [#allocation8]  }
  0x26   :  { %s43_s17 = sshll.u32 %s473_s16, 4  ;;  %s53_s19 = sshll.u32 %s474_s18, 4  ;;  %s44_s17 = int_to_ptr.vmem [resolvable:$true] %s43_s17  ;;  %s54_s19 = int_to_ptr.vmem [resolvable:$true] %s53_s19 }
  0x27   :  { %s393_s22 = scalar_lea.hbm %s605_s2, 128 }
  0x28   :  { %p394_p2 = scmp.ne.s32.totalorder %s605_s2, %s393_s22  ;;  %p397_p3 = scmp.lt.u32.totalorder %s393_s22, %s605_s2 }
  0x2a   :  { %p399_p4 = pnand %p397_p3, %p394_p2 }
  0x2c   :  { %402 = shalt.err (!%p399_p4)
}
  0x2d   :  { %s403_s0 = scalar_lea.vmem %s44_s17, 128  ;;  %p408_p6 = scmp.lt.s32.totalorder %s44_s17, %s44_s17 }
  0x2e   :  { %p404_p5 = scmp.ne.s32.totalorder %s44_s17, %s403_s0  ;;  %p409_p7 = scmp.lt.s32.totalorder %s403_s0, %s403_s0 }
  0x30   :  { %p410_p8 = por %p409_p7, %p408_p6 }
  0x32   :  { %p411_p9 = pnand %p410_p8, %p404_p5 }
  0x34   :  { %414 = shalt.err (!%p411_p9)
}
  0x35   :  { %46 = dma.hbm_to_vmem [thread:$0]  %s605_s2, 128, %s44_s17, [#allocation6]  }
  0x36   :  { %s415_s7 = scalar_lea.hbm %s606_s3, 128 }
  0x37   :  { %p416_p10 = scmp.ne.s32.totalorder %s606_s3, %s415_s7  ;;  %p419_p11 = scmp.lt.u32.totalorder %s415_s7, %s606_s3 }
  0x39   :  { %p421_p12 = pnand %p419_p11, %p416_p10 }
  0x3b   :  { %424 = shalt.err (!%p421_p12)
}
  0x3c   :  { %s425_s12 = scalar_lea.vmem %s54_s19, 128  ;;  %p430_p0 = scmp.lt.s32.totalorder %s54_s19, %s54_s19 }
  0x3d   :  { %p426_p13 = scmp.ne.s32.totalorder %s54_s19, %s425_s12  ;;  %p431_p1 = scmp.lt.s32.totalorder %s425_s12, %s425_s12 }
  0x3f   :  { %p432_p2 = por %p431_p1, %p430_p0 }
  0x41   :  { %p433_p3 = pnand %p432_p2, %p426_p13 }
  0x43   :  { %436 = shalt.err (!%p433_p3)
}
  0x44   :  { %56 = dma.hbm_to_vmem [thread:$0]  %s606_s3, 128, %s54_s19, [#allocation9]  }
  0x45   :  { %459 = dma.done.wait [#allocation3], 1024  }
  0x46   :  { %460 = vsyncadd [#allocation3], 4294966272 }
  0x47   :  { %461 = dma.done.wait [#allocation6], 2432  }
  0x48   :  { %462 = vsyncadd [#allocation6], 4294964864 }
  0x49   :  { %463 = dma.done.wait [#allocation9], 128  }
  0x4a   :  { %464 = vsyncadd [#allocation9], 4294967168  ;;  %v475_v0 = vmov 0.0|0.0   ;;  %v77_v1 = vld [vmem:[#allocation5] sm:$0xff]  ;;  %v78_v2 = vld [vmem:[#allocation5 + $0x8] sm:$0xff]  ;;  %vm95_vm0 = vcmask 130048  }
  0x4b   :  { %289 = vmatprep.subr.bf16.mxu0 %v475_v0  ;;  %316 = vmatprep.subr.bf16.mxu1 %v475_v0  ;;  %v79_v3 = vld [vmem:[#allocation5 + $0x10] sm:$0xff]  ;;  %v290_v4 = vpack.c.bf16 %v78_v2, %v77_v1  ;;  %v80_v5 = vld [vmem:[#allocation5 + $0x18] sm:$0xff]  ;;  %v81_v7 = vld [vmem:[#allocation5 + $0x20] sm:$0xff]  ;;  %vm193_vm1 = vcmask 261120   ;;  %v476_v56 = vmov 0   ;;  %s477_s3 = smov [#allocation10]  }
  0x4c   :  { %v293_v6 = vpack.c.bf16 %v80_v5, %v79_v3  ;;  %v82_v8 = vld [vmem:[#allocation5 + $0x28] sm:$0xff]  ;;  %v83_v12 = vld [vmem:[#allocation5 + $0x30] sm:$0xff]  ;;  %v84_v13 = vld [vmem:[#allocation5 + $0x38] sm:$0xff]  ;;  %345 = vset.pattern.permute.xlu0 %v476_v56  ;;  %346 = vset.pattern.permute.xlu1 %v476_v56  ;;  %s271_s13 = sshll.u32 %s477_s3, 4  ;;  %s272_s13 = int_to_ptr.vmem [resolvable:$true] %s271_s13 }
  0x4d   :  { %291 = vmatpush1.bf16.msra.mxu0 %v290_v4  ;;  %325 = vmatpush1.bf16.msra.mxu1 %v290_v4  ;;  %v70_v9 = vld [vmem:[#allocation2 + $0x8] sm:$0xff]  ;;  %v296_v11 = vpack.c.bf16 %v82_v8, %v81_v7  ;;  %v299_v14 = vpack.c.bf16 %v84_v13, %v83_v12  ;;  %v85_v15 = vld [vmem:[#allocation5 + $0x40] sm:$0xff]  ;;  %v87_v18 = vld [vmem:[#allocation5 + $0x50] sm:$0xff]  ;;  %s437_s14 = scalar_lea.vmem %s272_s13, 512  ;;  %p442_p5 = scmp.lt.s32.totalorder %s272_s13, %s272_s13 }
  0x4e   :  { %292 = vmatprep.subr.bf16.mxu0 %v475_v0  ;;  %317 = vmatprep.subr.bf16.mxu1 %v475_v0  ;;  %v74_v10 = vld [vmem:[#allocation2 + $0x28] sm:$0xff]  ;;  %v88_v19 = vld [vmem:[#allocation5 + $0x58] sm:$0xff]  ;;  %v89_v21 = vld [vmem:[#allocation5 + $0x60] sm:$0xff]  ;;  %p438_p4 = scmp.ne.s32.totalorder %s272_s13, %s437_s14  ;;  %p443_p6 = scmp.lt.s32.totalorder %s437_s14, %s437_s14 }
  0x4f   :  { %285 = vmatprep.mubr.msk.f32.mxu0 %vm95_vm0, %v70_v9  ;;  %287 = vmatprep.mubr.msk.f32.mxu1 %vm95_vm0, %v74_v10  ;;  %v86_v16 = vld [vmem:[#allocation5 + $0x48] sm:$0xff]  ;;  %v305_v20 = vpack.c.bf16 %v88_v19, %v87_v18  ;;  %v91_v24 = vld [vmem:[#allocation5 + $0x70] sm:$0xff]  ;;  %v92_v25 = vld [vmem:[#allocation5 + $0x78] sm:$0xff] }
  0x50   :  { %v302_v17 = vpack.c.bf16 %v86_v16, %v85_v15  ;;  %v90_v22 = vld [vmem:[#allocation5 + $0x68] sm:$0xff]  ;;  %v311_v26 = vpack.c.bf16 %v92_v25, %v91_v24  ;;  %v93_v27 = vld [vmem:[#allocation5 + $0x80] sm:$0xff]  ;;  %v72_v32 = vld [vmem:[#allocation2 + $0x18] sm:$0xff]  ;;  %p444_p7 = por %p443_p6, %p442_p5 }
  0x51   :  { %294 = vmatpush1.bf16.msra.mxu0 %v293_v6  ;;  %326 = vmatpush1.bf16.msra.mxu1 %v293_v6  ;;  %v308_v23 = vpack.c.bf16 %v90_v22, %v89_v21  ;;  %v94_v28 = vld [vmem:[#allocation5 + $0x88] sm:$0xff]  ;;  %v69_v30 = vld [vmem:[#allocation2] sm:$0xff]  ;;  %v76_v33 = vld [vmem:[#allocation2 + $0x38] sm:$0xff] }
  0x52   :  { %295 = vmatprep.subr.bf16.mxu0 %v475_v0  ;;  %318 = vmatprep.subr.bf16.mxu1 %v475_v0  ;;  %v314_v29 = vpack.c.bf16 %v94_v28, %v93_v27  ;;  %v73_v31 = vld [vmem:[#allocation2 + $0x20] sm:$0xff]  ;;  %v71_v34 = vld [vmem:[#allocation2 + $0x10] sm:$0xff]  ;;  %v237_v16 = vld [vmem:[#allocation8] sm:$0xff]  ;;  %p445_p8 = pnand %p444_p7, %p438_p4 }
  0x53   :  { %v75_v35 = vld [vmem:[#allocation2 + $0x30] sm:$0xff] }
  0x54   :  { %v233_v13 = vld [vmem:[#allocation7] sm:$0xff] }
  0x55   :  { %297 = vmatpush1.bf16.msra.mxu0 %v296_v11  ;;  %327 = vmatpush1.bf16.msra.mxu1 %v296_v11 }
  0x56   :  { %298 = vmatprep.subr.bf16.mxu0 %v475_v0  ;;  %319 = vmatprep.subr.bf16.mxu1 %v475_v0 }
  0x59   :  { %300 = vmatpush1.bf16.msra.mxu0 %v299_v14  ;;  %328 = vmatpush1.bf16.msra.mxu1 %v299_v14 }
  0x5a   :  { %301 = vmatprep.subr.bf16.mxu0 %v475_v0  ;;  %320 = vmatprep.subr.bf16.mxu1 %v475_v0 }
  0x5d   :  { %303 = vmatpush1.bf16.msra.mxu0 %v302_v17  ;;  %329 = vmatpush1.bf16.msra.mxu1 %v302_v17 }
  0x5e   :  { %304 = vmatprep.subr.bf16.mxu0 %v475_v0  ;;  %321 = vmatprep.subr.bf16.mxu1 %v475_v0 }
  0x61   :  { %306 = vmatpush1.bf16.msra.mxu0 %v305_v20  ;;  %330 = vmatpush1.bf16.msra.mxu1 %v305_v20 }
  0x62   :  { %307 = vmatprep.subr.bf16.mxu0 %v475_v0  ;;  %322 = vmatprep.subr.bf16.mxu1 %v475_v0 }
  0x65   :  { %309 = vmatpush1.bf16.msra.mxu0 %v308_v23  ;;  %331 = vmatpush1.bf16.msra.mxu1 %v308_v23 }
  0x66   :  { %310 = vmatprep.subr.bf16.mxu0 %v475_v0  ;;  %323 = vmatprep.subr.bf16.mxu1 %v475_v0 }
  0x69   :  { %312 = vmatpush1.bf16.msra.mxu0 %v311_v26  ;;  %332 = vmatpush1.bf16.msra.mxu1 %v311_v26 }
  0x6a   :  { %313 = vmatprep.subr.bf16.mxu0 %v475_v0  ;;  %324 = vmatprep.subr.bf16.mxu1 %v475_v0 }
  0x6d   :  { %315 = vmatpush1.bf16.msra.mxu0 %v314_v29  ;;  %333 = vmatpush1.bf16.msra.mxu1 %v314_v29 }
  0x70   :  { %173 = vmatmul.mubr.f32.vlgmr.msra.gmra.mrb[0].mxu0 %v69_v30  ;;  %183 = vmatmul.mubr.f32.vlgmr.msra.gmra.mrb[0].mxu1 %v73_v31 }
  0x71   :  { %286 = vmatprep.mubr.msk.f32.mxu0 %vm95_vm0, %v72_v32  ;;  %288 = vmatprep.mubr.msk.f32.mxu1 %vm95_vm0, %v76_v33 }
  0x74   :  { %178 = vmatmul.mubr.f32.gmra.mrb[2].mxu0 %v71_v34  ;;  %188 = vmatmul.mubr.f32.gmra.mrb[2].mxu1 %v75_v35 }
 0x143   :  { %v174_v36 = vpop.f32.mrb[0].mxu0  ;;  %v184_v37 = vpop.f32.mrb[0].mxu1 }
 0x144   :  { %v176_v38 = vpop.f32.mrb[1].mxu0  ;;  %v200_v39 = vsel %vm193_vm1, %v184_v37, 0.0  ;;  %v186_v40 = vpop.f32.mrb[1].mxu1  ;;  %v194_v41 = vsel %vm193_vm1, %v174_v36, 0.0  ;;  %v206_v42 = vmul.f32 %v174_v36, %v174_v36  ;;  %v208_v53 = vmul.f32 %v184_v37, %v184_v37 }
 0x145   :  { %201 = vadd.xlane.f32.xlu1 %v200_v39  ;;  %195 = vadd.xlane.f32.xlu0 %v194_v41 }
 0x146   :  { %v210_v46 = vsel %vm193_vm1, %v206_v42, 0.0  ;;  %v216_v55 = vsel %vm193_vm1, %v208_v53, 0.0 }
 0x147   :  { %v179_v43 = vpop.f32.mrb[2].mxu0  ;;  %v189_v44 = vpop.f32.mrb[2].mxu1 }
 0x148   :  { %v181_v45 = vpop.f32.mrb[3].mxu0  ;;  %v197_v47 = vsel %vm193_vm1, %v179_v43, 0.0  ;;  %v191_v48 = vpop.f32.mrb[3].mxu1  ;;  %v207_v49 = vmul.f32 %v179_v43, %v179_v43  ;;  %v203_v50 = vsel %vm193_vm1, %v189_v44, 0.0  ;;  %v209_v51 = vmul.f32 %v189_v44, %v189_v44 }
 0x149   :  { %211 = vadd.xlane.f32.xlu1 %v210_v46  ;;  %198 = vadd.xlane.f32.xlu0 %v197_v47 }
 0x14a   :  { %v213_v52 = vsel %vm193_vm1, %v207_v49, 0.0  ;;  %v219_v54 = vsel %vm193_vm1, %v209_v51, 0.0 }
 0x14d   :  { %204 = vadd.xlane.f32.xlu1 %v203_v50  ;;  %214 = vadd.xlane.f32.xlu0 %v213_v52 }
 0x151   :  { %220 = vadd.xlane.f32.xlu1 %v219_v54  ;;  %217 = vadd.xlane.f32.xlu0 %v216_v55 }
 0x1d2   :  { %v202_v57 = vpop.xlane.xlu1 %201  ;;  %v196_v58 = vpop.xlane.xlu0 %195 }
 0x1d6   :  { %v212_v59 = vpop.xlane.xlu1 %211  ;;  %v199_v60 = vpop.xlane.xlu0 %198 }
 0x1d7   :  { %v222_v61 = vadd.f32 %v199_v60, %v196_v58 }
 0x1d9   :  { %v223_v62 = vadd.f32 %v222_v61, %v202_v57 }
 0x1da   :  { %v205_v63 = vpop.xlane.xlu1 %204  ;;  %v215_v0 = vpop.xlane.xlu0 %214 }
 0x1db   :  { %v224_v1 = vadd.f32 %v223_v62, %v205_v63  ;;  %v225_v2 = vadd.f32 %v215_v0, %v212_v59 }
 0x1dd   :  { %v228_v4 = vmul.f32 0.0078125, %v224_v1 }
 0x1de   :  { %v218_v3 = vpop.xlane.xlu0 %217  ;;  %v221_v6 = vpop.xlane.xlu1 %220 }
 0x1df   :  { %v226_v5 = vadd.f32 %v225_v2, %v218_v3  ;;  %v230_v8 = vmul.f32 %v228_v4, %v228_v4 }
 0x1e1   :  { %v227_v7 = vadd.f32 %v226_v5, %v221_v6 }
 0x1e3   :  { %v229_v9 = vmul.f32 0.0078125, %v227_v7 }
 0x1e5   :  { %v231_v10 = vsub.f32 %v229_v9, %v230_v8 }
 0x1e7   :  { %v232_v11 = vmax.f32 %v231_v10, 0.0 }
 0x1e9   :  { %v234_v12 = vadd.f32 1e-05, %v232_v11 }
 0x1eb   :  { %347 = vrsqrt.f32 %v234_v12 }
 0x1f5   :  { %v348_v14 = vpop.eup %347 }
 0x1f6   :  { %v236_v15 = vmul.f32 %v348_v14, %v233_v13 }
 0x1f8   :  { %242 = vperm.xlu0 %345, %v236_v15   ;;  %v238_v17 = vmul.f32 %v236_v15, %v228_v4 }
 0x1fa   :  { %v239_v18 = vsub.f32 %v237_v16, %v238_v17 }
 0x1fc   :  { %251 = vperm.xlu1 %346, %v239_v18  }
 0x277   :  { %v243_v19 = vpop.permute.xlu0 %242 }
 0x278   :  { %v245_v20 = vmul.f32 %v243_v19, %v174_v36  ;;  %v246_v21 = vmul.f32 %v243_v19, %v179_v43  ;;  %v247_v22 = vmul.f32 %v243_v19, %v184_v37  ;;  %v248_v23 = vmul.f32 %v243_v19, %v189_v44 }
 0x27b   :  { %v252_v24 = vpop.permute.xlu1 %251 }
 0x27c   :  { %v254_v25 = vadd.f32 %v252_v24, %v245_v20  ;;  %v255_v26 = vadd.f32 %v252_v24, %v246_v21  ;;  %v256_v27 = vadd.f32 %v252_v24, %v247_v22  ;;  %v257_v28 = vadd.f32 %v252_v24, %v248_v23 }
 0x27e   :  { %v258_v29 = vmax.f32 %v254_v25, 0.0  ;;  %v259_v30 = vmax.f32 %v255_v26, 0.0  ;;  %v260_v31 = vmax.f32 %v256_v27, 0.0  ;;  %v261_v32 = vmax.f32 %v257_v28, 0.0 }
 0x280   :  { %262 = vst.msk [vmem:[#allocation10] sm:$0xff] %vm193_vm1, %v258_v29  ;;  %263 = vst.msk [vmem:[#allocation10 + $0x8] sm:$0xff] %vm193_vm1, %v259_v30 }
 0x281   :  { %264 = vst.msk [vmem:[#allocation10 + $0x10] sm:$0xff] %vm193_vm1, %v260_v31  ;;  %265 = vst.msk [vmem:[#allocation10 + $0x18] sm:$0xff] %vm193_vm1, %v261_v32 }
 0x282   :  { %448 = shalt.err (!%p445_p8)
}
 0x283   :  { %s449_s17 = scalar_lea.hbm %s607_s4, 512 }
 0x284   :  { %p450_p9 = scmp.ne.s32.totalorder %s607_s4, %s449_s17  ;;  %p453_p10 = scmp.lt.u32.totalorder %s449_s17, %s607_s4 }
 0x286   :  { %p455_p11 = pnand %p453_p10, %p450_p9 }
 0x288   :  { %458 = shalt.err (!%p455_p11)
}
 0x289   :  { %277 = dma.vmem_to_hbm [thread:$0]  %s272_s13, 512, %s607_s4, [#allocation4], %s468_s25, %s468_s25, %s469_s26  }
 0x28a   :  { %465 = dma.done.wait [#allocation4], 512  }
 0x28b   :  { %466 = vsyncadd [#allocation4], 4294966784 }
 0x28c   :  { %281 = vsyncpa [#allocation3], 1 }
 0x28d   :  { %282 = vsyncpa [#allocation6], 1 }
 0x28e   :  { %283 = vsyncpa [#allocation9], 1 }
 0x28f   :  { %284 = vsyncpa [#allocation4], 1 }

// kernel: generator_forward.14
= control target key start
LH: loop header
LB: loop body
LE: loop exit
PB: predicated region body
PF: predicated region fallthrough
CT: control target
= control target key end

     0   :  { %7 = vsyncpa [#allocation3], 0  ;;  %s521_s0 = inlined_call_operand.hbm [shape: f32[128,4], index: 0, kind: input, shape index: {}]   ;;  %s522_s1 = inlined_call_operand.hbm [shape: f32[4,8], index: 1, kind: input, shape index: {}]   ;;  %s523_s2 = inlined_call_operand.hbm [shape: f32[128,8], index: 2, kind: output, shape index: {}]  }
   0x1   :  { %8 = vsyncpa [#allocation6], 0 }
   0x2   :  { %9 = vsyncpa [#allocation4], 0  ;;  %s427_s9 = smov [#allocation2]   ;;  %s355_s13 = scalar_lea.hbm %s521_s0, 2048 }
   0x3   :  { %s15_s10 = sshll.u32 %s427_s9, 4  ;;  %p356_p0 = scmp.ne.s32.totalorder %s521_s0, %s355_s13  ;;  %s16_s10 = int_to_ptr.vmem [resolvable:$true] %s15_s10 }
   0x4   :  { %p359_p1 = scmp.lt.u32.totalorder %s355_s13, %s521_s0 }
   0x6   :  { %p361_p2 = pnand %p359_p1, %p356_p0 }
   0x8   :  { %364 = shalt.err (!%p361_p2)
}
   0x9   :  { %s365_s18 = scalar_lea.vmem %s16_s10, 2048  ;;  %p370_p4 = scmp.lt.s32.totalorder %s16_s10, %s16_s10 }
   0xa   :  { %p366_p3 = scmp.ne.s32.totalorder %s16_s10, %s365_s18  ;;  %p371_p5 = scmp.lt.s32.totalorder %s365_s18, %s365_s18 }
   0xc   :  { %p372_p6 = por %p371_p5, %p370_p4 }
   0xe   :  { %p373_p7 = pnand %p372_p6, %p366_p3 }
  0x10   :  { %376 = shalt.err (!%p373_p7)
}
  0x11   :  { %s428_s19 = smov 128   ;;  %s429_s20 = smov 8  }
  0x12   :  { %21 = dma.hbm_to_vmem [thread:$0]  %s521_s0, 2048, %s16_s10, [#allocation3], %s428_s19, %s428_s19, %s429_s20  }
  0x13   :  { %s430_s23 = smov [#allocation5]   ;;  %s377_s27 = scalar_lea.hbm %s522_s1, 64 }
  0x14   :  { %s28_s24 = sshll.u32 %s430_s23, 4  ;;  %p378_p8 = scmp.ne.s32.totalorder %s522_s1, %s377_s27  ;;  %s29_s24 = int_to_ptr.vmem [resolvable:$true] %s28_s24 }
  0x15   :  { %p381_p9 = scmp.lt.u32.totalorder %s377_s27, %s522_s1 }
  0x17   :  { %p383_p10 = pnand %p381_p9, %p378_p8 }
  0x19   :  { %386 = shalt.err (!%p383_p10)
}
  0x1a   :  { %s387_s4 = scalar_lea.vmem %s29_s24, 64  ;;  %p392_p12 = scmp.lt.s32.totalorder %s29_s24, %s29_s24 }
  0x1b   :  { %p388_p11 = scmp.ne.s32.totalorder %s29_s24, %s387_s4  ;;  %p393_p13 = scmp.lt.s32.totalorder %s387_s4, %s387_s4 }
  0x1d   :  { %p394_p0 = por %p393_p13, %p392_p12 }
  0x1f   :  { %p395_p1 = pnand %p394_p0, %p388_p11 }
  0x21   :  { %398 = shalt.err (!%p395_p1)
}
  0x22   :  { %31 = dma.hbm_to_vmem [thread:$0]  %s522_s1, 64, %s29_s24, [#allocation6]  }
  0x23   :  { %421 = dma.done.wait [#allocation3], 2048  }
  0x24   :  { %422 = vsyncadd [#allocation3], 4294965248 }
  0x25   :  { %423 = dma.done.wait [#allocation6], 64  }
  0x26   :  { %424 = vsyncadd [#allocation6], 4294967232  ;;  %vm104_vm0 = vcmask 1043456   ;;  %v54_v0 = vld [vmem:[#allocation5] sm:$0xf]  ;;  %vm55_vm1 = vcmask 31744  }
  0x27   :  { %v38_v1 = vld [vmem:[#allocation2] sm:$0xff]  ;;  %322 = vmatprep.subr.msk.mxu0 %vm104_vm0, %v54_v0  ;;  %348 = vmatprep.subr.msk.mxu1 %vm104_vm0, %v54_v0  ;;  %v39_v3 = vld [vmem:[#allocation2 + $0x8] sm:$0xff]  ;;  %v40_v5 = vld [vmem:[#allocation2 + $0x10] sm:$0xff]  ;;  %vm253_vm2 = vcmask 64512   ;;  %s431_s1 = smov [#allocation7]  }
  0x28   :  { %v46_v2 = vld [vmem:[#allocation2 + $0x40] sm:$0xff]  ;;  %v47_v4 = vld [vmem:[#allocation2 + $0x48] sm:$0xff]  ;;  %323 = vmatpush3.msk.msra.mxu0 %vm104_vm0, %v54_v0  ;;  %349 = vmatpush3.msk.msra.mxu1 %vm104_vm0, %v54_v0  ;;  %v48_v6 = vld [vmem:[#allocation2 + $0x50] sm:$0xff]  ;;  %s275_s6 = sshll.u32 %s431_s1, 4  ;;  %s276_s6 = int_to_ptr.vmem [resolvable:$true] %s275_s6 }
  0x29   :  { %324 = vmatprep.mubr.msk.f32.mxu0 %vm55_vm1, %v38_v1  ;;  %336 = vmatprep.mubr.msk.f32.mxu1 %vm55_vm1, %v46_v2  ;;  %v41_v7 = vld [vmem:[#allocation2 + $0x18] sm:$0xff]  ;;  %v42_v9 = vld [vmem:[#allocation2 + $0x20] sm:$0xff]  ;;  %v43_v11 = vld [vmem:[#allocation2 + $0x28] sm:$0xff]  ;;  %s399_s7 = scalar_lea.vmem %s276_s6, 2048  ;;  %p404_p3 = scmp.lt.s32.totalorder %s276_s6, %s276_s6 }
  0x2a   :  { %325 = vmatmul.mubr.msk.f32.vlgmr.msra.gmra.mrb[0].mxu0 %vm55_vm1, %v39_v3  ;;  %337 = vmatmul.mubr.msk.f32.vlgmr.msra.gmra.mrb[0].mxu1 %vm55_vm1, %v47_v4  ;;  %v49_v8 = vld [vmem:[#allocation2 + $0x58] sm:$0xff]  ;;  %v50_v10 = vld [vmem:[#allocation2 + $0x60] sm:$0xff]  ;;  %v51_v12 = vld [vmem:[#allocation2 + $0x68] sm:$0xff]  ;;  %p400_p2 = scmp.ne.s32.totalorder %s276_s6, %s399_s7  ;;  %p405_p4 = scmp.lt.s32.totalorder %s399_s7, %s399_s7 }
  0x2b   :  { %327 = vmatprep.mubr.msk.f32.mxu0 %vm55_vm1, %v40_v5  ;;  %339 = vmatprep.mubr.msk.f32.mxu1 %vm55_vm1, %v48_v6  ;;  %v44_v13 = vld [vmem:[#allocation2 + $0x30] sm:$0xff]  ;;  %v45_v15 = vld [vmem:[#allocation2 + $0x38] sm:$0xff] }
  0x2c   :  { %v52_v14 = vld [vmem:[#allocation2 + $0x70] sm:$0xff]  ;;  %v53_v16 = vld [vmem:[#allocation2 + $0x78] sm:$0xff]  ;;  %p406_p5 = por %p405_p4, %p404_p3 }
  0x2e   :  { %328 = vmatmul.mubr.msk.f32.gmra.mrb[2].mxu0 %vm55_vm1, %v41_v7  ;;  %340 = vmatmul.mubr.msk.f32.gmra.mrb[2].mxu1 %vm55_vm1, %v49_v8  ;;  %p407_p6 = pnand %p406_p5, %p400_p2 }
  0x2f   :  { %330 = vmatprep.mubr.msk.f32.mxu0 %vm55_vm1, %v42_v9  ;;  %342 = vmatprep.mubr.msk.f32.mxu1 %vm55_vm1, %v50_v10 }
  0x32   :  { %331 = vmatmul.mubr.msk.f32.gmra.mrb[4].mxu0 %vm55_vm1, %v43_v11  ;;  %343 = vmatmul.mubr.msk.f32.gmra.mrb[4].mxu1 %vm55_vm1, %v51_v12 }
  0x33   :  { %333 = vmatprep.mubr.msk.f32.mxu0 %vm55_vm1, %v44_v13  ;;  %345 = vmatprep.mubr.msk.f32.mxu1 %vm55_vm1, %v52_v14 }
  0x36   :  { %334 = vmatmul.mubr.msk.f32.gmra.mrb[6].mxu0 %vm55_vm1, %v45_v15  ;;  %346 = vmatmul.mubr.msk.f32.gmra.mrb[6].mxu1 %vm55_vm1, %v53_v16 }
  0xfd   :  { %v326_v17 = vpop.f32.mrb[0].mxu0  ;;  %v338_v18 = vpop.f32.mrb[0].mxu1 }
  0xfe   :  { %255 = vst.msk [vmem:[#allocation7 + $0x8] sm:$0xff] %vm253_vm2, %v326_v17  ;;  %263 = vst.msk [vmem:[#allocation7 + $0x48] sm:$0xff] %vm253_vm2, %v338_v18  ;;  %v174_v19 = vpop.f32.mrb[1].mxu0  ;;  %v214_v20 = vpop.f32.mrb[1].mxu1 }
  0xff   :  { %254 = vst.msk [vmem:[#allocation7] sm:$0xff] %vm253_vm2, %v174_v19  ;;  %262 = vst.msk [vmem:[#allocation7 + $0x40] sm:$0xff] %vm253_vm2, %v214_v20 }
 0x101   :  { %v329_v21 = vpop.f32.mrb[2].mxu0  ;;  %v341_v22 = vpop.f32.mrb[2].mxu1 }
 0x102   :  { %257 = vst.msk [vmem:[#allocation7 + $0x18] sm:$0xff] %vm253_vm2, %v329_v21  ;;  %265 = vst.msk [vmem:[#allocation7 + $0x58] sm:$0xff] %vm253_vm2, %v341_v22  ;;  %v184_v23 = vpop.f32.mrb[3].mxu0  ;;  %v224_v24 = vpop.f32.mrb[3].mxu1 }
 0x103   :  { %256 = vst.msk [vmem:[#allocation7 + $0x10] sm:$0xff] %vm253_vm2, %v184_v23  ;;  %264 = vst.msk [vmem:[#allocation7 + $0x50] sm:$0xff] %vm253_vm2, %v224_v24 }
 0x105   :  { %v332_v25 = vpop.f32.mrb[4].mxu0  ;;  %v344_v26 = vpop.f32.mrb[4].mxu1 }
 0x106   :  { %259 = vst.msk [vmem:[#allocation7 + $0x28] sm:$0xff] %vm253_vm2, %v332_v25  ;;  %267 = vst.msk [vmem:[#allocation7 + $0x68] sm:$0xff] %vm253_vm2, %v344_v26  ;;  %v194_v27 = vpop.f32.mrb[5].mxu0  ;;  %v234_v28 = vpop.f32.mrb[5].mxu1 }
 0x107   :  { %258 = vst.msk [vmem:[#allocation7 + $0x20] sm:$0xff] %vm253_vm2, %v194_v27  ;;  %266 = vst.msk [vmem:[#allocation7 + $0x60] sm:$0xff] %vm253_vm2, %v234_v28 }
 0x109   :  { %v335_v29 = vpop.f32.mrb[6].mxu0  ;;  %v347_v30 = vpop.f32.mrb[6].mxu1 }
 0x10a   :  { %261 = vst.msk [vmem:[#allocation7 + $0x38] sm:$0xff] %vm253_vm2, %v335_v29  ;;  %269 = vst.msk [vmem:[#allocation7 + $0x78] sm:$0xff] %vm253_vm2, %v347_v30  ;;  %v204_v31 = vpop.f32.mrb[7].mxu0  ;;  %v244_v32 = vpop.f32.mrb[7].mxu1 }
 0x10b   :  { %260 = vst.msk [vmem:[#allocation7 + $0x30] sm:$0xff] %vm253_vm2, %v204_v31  ;;  %268 = vst.msk [vmem:[#allocation7 + $0x70] sm:$0xff] %vm253_vm2, %v244_v32 }
 0x10c   :  { %410 = shalt.err (!%p407_p6)
}
 0x10d   :  { %s411_s10 = scalar_lea.hbm %s523_s2, 2048 }
 0x10e   :  { %p412_p7 = scmp.ne.s32.totalorder %s523_s2, %s411_s10  ;;  %p415_p8 = scmp.lt.u32.totalorder %s411_s10, %s523_s2 }
 0x110   :  { %p417_p9 = pnand %p415_p8, %p412_p7 }
 0x112   :  { %420 = shalt.err (!%p417_p9)
}
 0x113   :  { %281 = dma.vmem_to_hbm [thread:$0]  %s276_s6, 2048, %s523_s2, [#allocation4], %s428_s19, %s428_s19, %s429_s20  }
 0x114   :  { %425 = dma.done.wait [#allocation4], 2048  }
 0x115   :  { %426 = vsyncadd [#allocation4], 4294965248 }
 0x116   :  { %285 = vsyncpa [#allocation3], 1 }
 0x117   :  { %286 = vsyncpa [#allocation6], 1 }
 0x118   :  { %287 = vsyncpa [#allocation4], 1 }

// kernel: generator_forward.15
= control target key start
LH: loop header
LB: loop body
LE: loop exit
PB: predicated region body
PF: predicated region fallthrough
CT: control target
= control target key end

     0   :  { %7 = vsyncpa [#allocation3], 0  ;;  %s769_s0 = inlined_call_operand.hbm [shape: f32[256,4], index: 0, kind: input, shape index: {}]   ;;  %s770_s1 = inlined_call_operand.hbm [shape: f32[4,8], index: 1, kind: input, shape index: {}]   ;;  %s771_s2 = inlined_call_operand.hbm [shape: f32[256,8], index: 2, kind: output, shape index: {}]  }
   0x1   :  { %8 = vsyncpa [#allocation6], 0 }
   0x2   :  { %9 = vsyncpa [#allocation4], 0  ;;  %s643_s9 = smov [#allocation2]   ;;  %s571_s13 = scalar_lea.hbm %s769_s0, 4096 }
   0x3   :  { %s15_s10 = sshll.u32 %s643_s9, 4  ;;  %p572_p0 = scmp.ne.s32.totalorder %s769_s0, %s571_s13  ;;  %s16_s10 = int_to_ptr.vmem [resolvable:$true] %s15_s10 }
   0x4   :  { %p575_p1 = scmp.lt.u32.totalorder %s571_s13, %s769_s0 }
   0x6   :  { %p577_p2 = pnand %p575_p1, %p572_p0 }
   0x8   :  { %580 = shalt.err (!%p577_p2)
}
   0x9   :  { %s581_s18 = scalar_lea.vmem %s16_s10, 4096  ;;  %p586_p4 = scmp.lt.s32.totalorder %s16_s10, %s16_s10 }
   0xa   :  { %p582_p3 = scmp.ne.s32.totalorder %s16_s10, %s581_s18  ;;  %p587_p5 = scmp.lt.s32.totalorder %s581_s18, %s581_s18 }
   0xc   :  { %p588_p6 = por %p587_p5, %p586_p4 }
   0xe   :  { %p589_p7 = pnand %p588_p6, %p582_p3 }
  0x10   :  { %592 = shalt.err (!%p589_p7)
}
  0x11   :  { %s644_s19 = smov 128   ;;  %s645_s20 = smov 8  }
  0x12   :  { %21 = dma.hbm_to_vmem [thread:$0]  %s769_s0, 4096, %s16_s10, [#allocation3], %s644_s19, %s644_s19, %s645_s20  }
  0x13   :  { %s646_s23 = smov [#allocation5]   ;;  %s593_s27 = scalar_lea.hbm %s770_s1, 64 }
  0x14   :  { %s28_s24 = sshll.u32 %s646_s23, 4  ;;  %p594_p8 = scmp.ne.s32.totalorder %s770_s1, %s593_s27  ;;  %s29_s24 = int_to_ptr.vmem [resolvable:$true] %s28_s24 }
  0x15   :  { %p597_p9 = scmp.lt.u32.totalorder %s593_s27, %s770_s1 }
  0x17   :  { %p599_p10 = pnand %p597_p9, %p594_p8 }
  0x19   :  { %602 = shalt.err (!%p599_p10)
}
  0x1a   :  { %s603_s4 = scalar_lea.vmem %s29_s24, 64  ;;  %p608_p12 = scmp.lt.s32.totalorder %s29_s24, %s29_s24 }
  0x1b   :  { %p604_p11 = scmp.ne.s32.totalorder %s29_s24, %s603_s4  ;;  %p609_p13 = scmp.lt.s32.totalorder %s603_s4, %s603_s4 }
  0x1d   :  { %p610_p0 = por %p609_p13, %p608_p12 }
  0x1f   :  { %p611_p1 = pnand %p610_p0, %p604_p11 }
  0x21   :  { %614 = shalt.err (!%p611_p1)
}
  0x22   :  { %31 = dma.hbm_to_vmem [thread:$0]  %s770_s1, 64, %s29_s24, [#allocation6]  }
  0x23   :  { %637 = dma.done.wait [#allocation3], 4096  }
  0x24   :  { %638 = vsyncadd [#allocation3], 4294963200 }
  0x25   :  { %639 = dma.done.wait [#allocation6], 64  }
  0x26   :  { %640 = vsyncadd [#allocation6], 4294967232  ;;  %vm168_vm0 = vcmask 1043456   ;;  %v70_v0 = vld [vmem:[#allocation5] sm:$0xf]  ;;  %vm71_vm1 = vcmask 31744  }
  0x27   :  { %v38_v1 = vld [vmem:[#allocation2] sm:$0xff]  ;;  %514 = vmatprep.subr.msk.mxu0 %vm168_vm0, %v70_v0  ;;  %564 = vmatprep.subr.msk.mxu1 %vm168_vm0, %v70_v0  ;;  %v39_v3 = vld [vmem:[#allocation2 + $0x8] sm:$0xff]  ;;  %v40_v5 = vld [vmem:[#allocation2 + $0x10] sm:$0xff]  ;;  %vm397_vm2 = vcmask 64512   ;;  %s647_s1 = smov [#allocation7]  }
  0x28   :  { %v54_v2 = vld [vmem:[#allocation2 + $0x80] sm:$0xff]  ;;  %v55_v4 = vld [vmem:[#allocation2 + $0x88] sm:$0xff]  ;;  %515 = vmatpush3.msk.msra.mxu0 %vm168_vm0, %v70_v0  ;;  %565 = vmatpush3.msk.msra.mxu1 %vm168_vm0, %v70_v0  ;;  %v56_v6 = vld [vmem:[#allocation2 + $0x90] sm:$0xff]  ;;  %s435_s6 = sshll.u32 %s647_s1, 4  ;;  %s436_s6 = int_to_ptr.vmem [resolvable:$true] %s435_s6 }
  0x29   :  { %516 = vmatprep.mubr.msk.f32.mxu0 %vm71_vm1, %v38_v1  ;;  %540 = vmatprep.mubr.msk.f32.mxu1 %vm71_vm1, %v54_v2  ;;  %v41_v7 = vld [vmem:[#allocation2 + $0x18] sm:$0xff]  ;;  %v42_v9 = vld [vmem:[#allocation2 + $0x20] sm:$0xff]  ;;  %v43_v11 = vld [vmem:[#allocation2 + $0x28] sm:$0xff]  ;;  %s615_s7 = scalar_lea.vmem %s436_s6, 4096  ;;  %p620_p3 = scmp.lt.s32.totalorder %s436_s6, %s436_s6 }
  0x2a   :  { %517 = vmatmul.mubr.msk.f32.vlgmr.msra.gmra.mrb[0].mxu0 %vm71_vm1, %v39_v3  ;;  %541 = vmatmul.mubr.msk.f32.vlgmr.msra.gmra.mrb[0].mxu1 %vm71_vm1, %v55_v4  ;;  %v57_v8 = vld [vmem:[#allocation2 + $0x98] sm:$0xff]  ;;  %v58_v10 = vld [vmem:[#allocation2 + $0xa0] sm:$0xff]  ;;  %v59_v12 = vld [vmem:[#allocation2 + $0xa8] sm:$0xff]  ;;  %p616_p2 = scmp.ne.s32.totalorder %s436_s6, %s615_s7  ;;  %p621_p4 = scmp.lt.s32.totalorder %s615_s7, %s615_s7 }
  0x2b   :  { %519 = vmatprep.mubr.msk.f32.mxu0 %vm71_vm1, %v40_v5  ;;  %543 = vmatprep.mubr.msk.f32.mxu1 %vm71_vm1, %v56_v6  ;;  %v44_v13 = vld [vmem:[#allocation2 + $0x30] sm:$0xff]  ;;  %v45_v15 = vld [vmem:[#allocation2 + $0x38] sm:$0xff]  ;;  %v46_v17 = vld [vmem:[#allocation2 + $0x40] sm:$0xff] }
  0x2c   :  { %v60_v14 = vld [vmem:[#allocation2 + $0xb0] sm:$0xff]  ;;  %v61_v16 = vld [vmem:[#allocation2 + $0xb8] sm:$0xff]  ;;  %v62_v18 = vld [vmem:[#allocation2 + $0xc0] sm:$0xff]  ;;  %p622_p5 = por %p621_p4, %p620_p3 }
  0x2d   :  { %v47_v19 = vld [vmem:[#allocation2 + $0x48] sm:$0xff]  ;;  %v48_v21 = vld [vmem:[#allocation2 + $0x50] sm:$0xff]  ;;  %v49_v23 = vld [vmem:[#allocation2 + $0x58] sm:$0xff] }
  0x2e   :  { %520 = vmatmul.mubr.msk.f32.gmra.mrb[2].mxu0 %vm71_vm1, %v41_v7  ;;  %544 = vmatmul.mubr.msk.f32.gmra.mrb[2].mxu1 %vm71_vm1, %v57_v8  ;;  %v63_v20 = vld [vmem:[#allocation2 + $0xc8] sm:$0xff]  ;;  %v64_v22 = vld [vmem:[#allocation2 + $0xd0] sm:$0xff]  ;;  %v65_v24 = vld [vmem:[#allocation2 + $0xd8] sm:$0xff]  ;;  %p623_p6 = pnand %p622_p5, %p616_p2 }
  0x2f   :  { %522 = vmatprep.mubr.msk.f32.mxu0 %vm71_vm1, %v42_v9  ;;  %546 = vmatprep.mubr.msk.f32.mxu1 %vm71_vm1, %v58_v10  ;;  %v50_v25 = vld [vmem:[#allocation2 + $0x60] sm:$0xff]  ;;  %v51_v27 = vld [vmem:[#allocation2 + $0x68] sm:$0xff]  ;;  %v52_v29 = vld [vmem:[#allocation2 + $0x70] sm:$0xff] }
  0x30   :  { %v66_v26 = vld [vmem:[#allocation2 + $0xe0] sm:$0xff]  ;;  %v67_v28 = vld [vmem:[#allocation2 + $0xe8] sm:$0xff]  ;;  %v68_v30 = vld [vmem:[#allocation2 + $0xf0] sm:$0xff] }
  0x31   :  { %v53_v31 = vld [vmem:[#allocation2 + $0x78] sm:$0xff] }
  0x32   :  { %523 = vmatmul.mubr.msk.f32.gmra.mrb[4].mxu0 %vm71_vm1, %v43_v11  ;;  %547 = vmatmul.mubr.msk.f32.gmra.mrb[4].mxu1 %vm71_vm1, %v59_v12  ;;  %v69_v32 = vld [vmem:[#allocation2 + $0xf8] sm:$0xff] }
  0x33   :  { %525 = vmatprep.mubr.msk.f32.mxu0 %vm71_vm1, %v44_v13  ;;  %549 = vmatprep.mubr.msk.f32.mxu1 %vm71_vm1, %v60_v14 }
  0x36   :  { %526 = vmatmul.mubr.msk.f32.gmra.mrb[6].mxu0 %vm71_vm1, %v45_v15  ;;  %550 = vmatmul.mubr.msk.f32.gmra.mrb[6].mxu1 %vm71_vm1, %v61_v16 }
  0x37   :  { %528 = vmatprep.mubr.msk.f32.mxu0 %vm71_vm1, %v46_v17  ;;  %552 = vmatprep.mubr.msk.f32.mxu1 %vm71_vm1, %v62_v18 }
  0x3a   :  { %529 = vmatmul.mubr.msk.f32.gmra.mrb[8].mxu0 %vm71_vm1, %v47_v19  ;;  %553 = vmatmul.mubr.msk.f32.gmra.mrb[8].mxu1 %vm71_vm1, %v63_v20 }
  0x3b   :  { %531 = vmatprep.mubr.msk.f32.mxu0 %vm71_vm1, %v48_v21  ;;  %555 = vmatprep.mubr.msk.f32.mxu1 %vm71_vm1, %v64_v22 }
  0x3e   :  { %532 = vmatmul.mubr.msk.f32.gmra.mrb[10].mxu0 %vm71_vm1, %v49_v23  ;;  %556 = vmatmul.mubr.msk.f32.gmra.mrb[10].mxu1 %vm71_vm1, %v65_v24 }
  0x3f   :  { %534 = vmatprep.mubr.msk.f32.mxu0 %vm71_vm1, %v50_v25  ;;  %558 = vmatprep.mubr.msk.f32.mxu1 %vm71_vm1, %v66_v26 }
  0x42   :  { %535 = vmatmul.mubr.msk.f32.gmra.mrb[12].mxu0 %vm71_vm1, %v51_v27  ;;  %559 = vmatmul.mubr.msk.f32.gmra.mrb[12].mxu1 %vm71_vm1, %v67_v28 }
  0x43   :  { %537 = vmatprep.mubr.msk.f32.mxu0 %vm71_vm1, %v52_v29  ;;  %561 = vmatprep.mubr.msk.f32.mxu1 %vm71_vm1, %v68_v30 }
  0x46   :  { %538 = vmatmul.mubr.msk.f32.gmra.mrb[14].mxu0 %vm71_vm1, %v53_v31  ;;  %562 = vmatmul.mubr.msk.f32.gmra.mrb[14].mxu1 %vm71_vm1, %v69_v32 }
  0xfd   :  { %v518_v33 = vpop.f32.mrb[0].mxu0  ;;  %v542_v34 = vpop.f32.mrb[0].mxu1 }
  0xfe   :  { %399 = vst.msk [vmem:[#allocation7 + $0x8] sm:$0xff] %vm397_vm2, %v518_v33  ;;  %415 = vst.msk [vmem:[#allocation7 + $0x88] sm:$0xff] %vm397_vm2, %v542_v34  ;;  %v238_v35 = vpop.f32.mrb[1].mxu0  ;;  %v318_v36 = vpop.f32.mrb[1].mxu1 }
  0xff   :  { %398 = vst.msk [vmem:[#allocation7] sm:$0xff] %vm397_vm2, %v238_v35  ;;  %414 = vst.msk [vmem:[#allocation7 + $0x80] sm:$0xff] %vm397_vm2, %v318_v36 }
 0x101   :  { %v521_v37 = vpop.f32.mrb[2].mxu0  ;;  %v545_v38 = vpop.f32.mrb[2].mxu1 }
 0x102   :  { %401 = vst.msk [vmem:[#allocation7 + $0x18] sm:$0xff] %vm397_vm2, %v521_v37  ;;  %417 = vst.msk [vmem:[#allocation7 + $0x98] sm:$0xff] %vm397_vm2, %v545_v38  ;;  %v248_v39 = vpop.f32.mrb[3].mxu0  ;;  %v328_v40 = vpop.f32.mrb[3].mxu1 }
 0x103   :  { %400 = vst.msk [vmem:[#allocation7 + $0x10] sm:$0xff] %vm397_vm2, %v248_v39  ;;  %416 = vst.msk [vmem:[#allocation7 + $0x90] sm:$0xff] %vm397_vm2, %v328_v40 }
 0x105   :  { %v524_v41 = vpop.f32.mrb[4].mxu0  ;;  %v548_v42 = vpop.f32.mrb[4].mxu1 }
 0x106   :  { %403 = vst.msk [vmem:[#allocation7 + $0x28] sm:$0xff] %vm397_vm2, %v524_v41  ;;  %419 = vst.msk [vmem:[#allocation7 + $0xa8] sm:$0xff] %vm397_vm2, %v548_v42  ;;  %v258_v43 = vpop.f32.mrb[5].mxu0  ;;  %v338_v44 = vpop.f32.mrb[5].mxu1 }
 0x107   :  { %402 = vst.msk [vmem:[#allocation7 + $0x20] sm:$0xff] %vm397_vm2, %v258_v43  ;;  %418 = vst.msk [vmem:[#allocation7 + $0xa0] sm:$0xff] %vm397_vm2, %v338_v44 }
 0x109   :  { %v527_v45 = vpop.f32.mrb[6].mxu0  ;;  %v551_v46 = vpop.f32.mrb[6].mxu1 }
 0x10a   :  { %405 = vst.msk [vmem:[#allocation7 + $0x38] sm:$0xff] %vm397_vm2, %v527_v45  ;;  %421 = vst.msk [vmem:[#allocation7 + $0xb8] sm:$0xff] %vm397_vm2, %v551_v46  ;;  %v268_v47 = vpop.f32.mrb[7].mxu0  ;;  %v348_v48 = vpop.f32.mrb[7].mxu1 }
 0x10b   :  { %404 = vst.msk [vmem:[#allocation7 + $0x30] sm:$0xff] %vm397_vm2, %v268_v47  ;;  %420 = vst.msk [vmem:[#allocation7 + $0xb0] sm:$0xff] %vm397_vm2, %v348_v48 }
 0x10d   :  { %v530_v49 = vpop.f32.mrb[8].mxu0  ;;  %v554_v50 = vpop.f32.mrb[8].mxu1 }
 0x10e   :  { %407 = vst.msk [vmem:[#allocation7 + $0x48] sm:$0xff] %vm397_vm2, %v530_v49  ;;  %423 = vst.msk [vmem:[#allocation7 + $0xc8] sm:$0xff] %vm397_vm2, %v554_v50  ;;  %v278_v51 = vpop.f32.mrb[9].mxu0  ;;  %v358_v52 = vpop.f32.mrb[9].mxu1 }
 0x10f   :  { %406 = vst.msk [vmem:[#allocation7 + $0x40] sm:$0xff] %vm397_vm2, %v278_v51  ;;  %422 = vst.msk [vmem:[#allocation7 + $0xc0] sm:$0xff] %vm397_vm2, %v358_v52 }
 0x111   :  { %v533_v53 = vpop.f32.mrb[10].mxu0  ;;  %v557_v54 = vpop.f32.mrb[10].mxu1 }
 0x112   :  { %409 = vst.msk [vmem:[#allocation7 + $0x58] sm:$0xff] %vm397_vm2, %v533_v53  ;;  %425 = vst.msk [vmem:[#allocation7 + $0xd8] sm:$0xff] %vm397_vm2, %v557_v54  ;;  %v288_v55 = vpop.f32.mrb[11].mxu0  ;;  %v368_v56 = vpop.f32.mrb[11].mxu1 }
 0x113   :  { %408 = vst.msk [vmem:[#allocation7 + $0x50] sm:$0xff] %vm397_vm2, %v288_v55  ;;  %424 = vst.msk [vmem:[#allocation7 + $0xd0] sm:$0xff] %vm397_vm2, %v368_v56 }
 0x115   :  { %v536_v57 = vpop.f32.mrb[12].mxu0  ;;  %v560_v58 = vpop.f32.mrb[12].mxu1 }
 0x116   :  { %411 = vst.msk [vmem:[#allocation7 + $0x68] sm:$0xff] %vm397_vm2, %v536_v57  ;;  %427 = vst.msk [vmem:[#allocation7 + $0xe8] sm:$0xff] %vm397_vm2, %v560_v58  ;;  %v298_v59 = vpop.f32.mrb[13].mxu0  ;;  %v378_v60 = vpop.f32.mrb[13].mxu1 }
 0x117   :  { %410 = vst.msk [vmem:[#allocation7 + $0x60] sm:$0xff] %vm397_vm2, %v298_v59  ;;  %426 = vst.msk [vmem:[#allocation7 + $0xe0] sm:$0xff] %vm397_vm2, %v378_v60 }
 0x119   :  { %v539_v61 = vpop.f32.mrb[14].mxu0  ;;  %v563_v62 = vpop.f32.mrb[14].mxu1 }
 0x11a   :  { %413 = vst.msk [vmem:[#allocation7 + $0x78] sm:$0xff] %vm397_vm2, %v539_v61  ;;  %429 = vst.msk [vmem:[#allocation7 + $0xf8] sm:$0xff] %vm397_vm2, %v563_v62  ;;  %v308_v63 = vpop.f32.mrb[15].mxu0  ;;  %v388_v0 = vpop.f32.mrb[15].mxu1 }
 0x11b   :  { %412 = vst.msk [vmem:[#allocation7 + $0x70] sm:$0xff] %vm397_vm2, %v308_v63  ;;  %428 = vst.msk [vmem:[#allocation7 + $0xf0] sm:$0xff] %vm397_vm2, %v388_v0 }
 0x11c   :  { %626 = shalt.err (!%p623_p6)
}
 0x11d   :  { %s627_s10 = scalar_lea.hbm %s771_s2, 4096 }
 0x11e   :  { %p628_p7 = scmp.ne.s32.totalorder %s771_s2, %s627_s10  ;;  %p631_p8 = scmp.lt.u32.totalorder %s627_s10, %s771_s2 }
 0x120   :  { %p633_p9 = pnand %p631_p8, %p628_p7 }
 0x122   :  { %636 = shalt.err (!%p633_p9)
}
 0x123   :  { %441 = dma.vmem_to_hbm [thread:$0]  %s436_s6, 4096, %s771_s2, [#allocation4], %s644_s19, %s644_s19, %s645_s20  }
 0x124   :  { %641 = dma.done.wait [#allocation4], 4096  }
 0x125   :  { %642 = vsyncadd [#allocation4], 4294963200 }
 0x126   :  { %445 = vsyncpa [#allocation3], 1 }
 0x127   :  { %446 = vsyncpa [#allocation6], 1 }
 0x128   :  { %447 = vsyncpa [#allocation4], 1 }

// kernel: generator_forward.16
= control target key start
LH: loop header
LB: loop body
LE: loop exit
PB: predicated region body
PF: predicated region fallthrough
CT: control target
= control target key end

     0   :  { %9 = vsyncpa [#allocation3], 0  ;;  %s623_s0 = inlined_call_operand.hbm [shape: f32[32,216], index: 0, kind: input, shape index: {}]   ;;  %s624_s1 = inlined_call_operand.hbm [shape: f32[216,128], index: 1, kind: input, shape index: {}]   ;;  %s625_s2 = inlined_call_operand.hbm [shape: f32[8,1], index: 2, kind: input, shape index: {}]   ;;  %s626_s3 = inlined_call_operand.hbm [shape: f32[8,1], index: 3, kind: input, shape index: {}]   ;;  %s627_s4 = inlined_call_operand.hbm [shape: f32[32,128], index: 4, kind: output, shape index: {}]  }
   0x1   :  { %10 = vsyncpa [#allocation6], 0 }
   0x2   :  { %11 = vsyncpa [#allocation9], 0 }
   0x3   :  { %12 = vsyncpa [#allocation4], 0  ;;  %s490_s15 = smov [#allocation5]   ;;  %s372_s19 = scalar_lea.hbm %s624_s1, 3456 }
   0x4   :  { %s30_s16 = sshll.u32 %s490_s15, 4  ;;  %p373_p0 = scmp.ne.s32.totalorder %s624_s1, %s372_s19  ;;  %s31_s16 = int_to_ptr.vmem [resolvable:$true] %s30_s16 }
   0x5   :  { %p376_p1 = scmp.lt.u32.totalorder %s372_s19, %s624_s1 }
   0x7   :  { %p378_p2 = pnand %p376_p1, %p373_p0 }
   0x9   :  { %381 = shalt.err (!%p378_p2)
}
   0xa   :  { %s382_s24 = scalar_lea.vmem %s31_s16, 3456  ;;  %p387_p4 = scmp.lt.s32.totalorder %s31_s16, %s31_s16 }
   0xb   :  { %p383_p3 = scmp.ne.s32.totalorder %s31_s16, %s382_s24  ;;  %p388_p5 = scmp.lt.s32.totalorder %s382_s24, %s382_s24 }
   0xd   :  { %p389_p6 = por %p388_p5, %p387_p4 }
   0xf   :  { %p390_p7 = pnand %p389_p6, %p383_p3 }
  0x11   :  { %393 = shalt.err (!%p390_p7)
}
  0x12   :  { %s491_s25 = smov 128   ;;  %s492_s26 = smov 8  }
  0x13   :  { %36 = dma.hbm_to_vmem [thread:$0]  %s624_s1, 3456, %s31_s16, [#allocation6], %s491_s25, %s491_s25, %s492_s26  }
  0x14   :  { %s493_s29 = smov [#allocation2]   ;;  %s394_s7 = scalar_lea.hbm %s623_s0, 1024 }
  0x15   :  { %s18_s30 = sshll.u32 %s493_s29, 4  ;;  %p395_p8 = scmp.ne.s32.totalorder %s623_s0, %s394_s7  ;;  %s19_s30 = int_to_ptr.vmem [resolvable:$true] %s18_s30 }
  0x16   :  { %p398_p9 = scmp.lt.u32.totalorder %s394_s7, %s623_s0 }
  0x18   :  { %p400_p10 = pnand %p398_p9, %p395_p8 }
  0x1a   :  { %403 = shalt.err (!%p400_p10)
}
  0x1b   :  { %s404_s12 = scalar_lea.vmem %s19_s30, 1024  ;;  %p409_p12 = scmp.lt.s32.totalorder %s19_s30, %s19_s30 }
  0x1c   :  { %p405_p11 = scmp.ne.s32.totalorder %s19_s30, %s404_s12  ;;  %p410_p13 = scmp.lt.s32.totalorder %s404_s12, %s404_s12 }
  0x1e   :  { %p411_p0 = por %p410_p13, %p409_p12 }
  0x20   :  { %p412_p1 = pnand %p411_p0, %p405_p11 }
  0x22   :  { %415 = shalt.err (!%p412_p1)
}
  0x23   :  { %s494_s1 = smov 256   ;;  %s495_s13 = smov 16  }
  0x24   :  { %24 = dma.hbm_to_vmem [thread:$0]  %s623_s0, 1024, %s19_s30, [#allocation3], %s494_s1, %s494_s1, %s495_s13  }
  0x25   :  { %s496_s16 = smov [#allocation7]   ;;  %s497_s18 = smov [#allocation8]  }
  0x26   :  { %s43_s17 = sshll.u32 %s496_s16, 4  ;;  %s53_s19 = sshll.u32 %s497_s18, 4  ;;  %s44_s17 = int_to_ptr.vmem [resolvable:$true] %s43_s17  ;;  %s54_s19 = int_to_ptr.vmem [resolvable:$true] %s53_s19 }
  0x27   :  { %s416_s22 = scalar_lea.hbm %s625_s2, 128 }
  0x28   :  { %p417_p2 = scmp.ne.s32.totalorder %s625_s2, %s416_s22  ;;  %p420_p3 = scmp.lt.u32.totalorder %s416_s22, %s625_s2 }
  0x2a   :  { %p422_p4 = pnand %p420_p3, %p417_p2 }
  0x2c   :  { %425 = shalt.err (!%p422_p4)
}
  0x2d   :  { %s426_s0 = scalar_lea.vmem %s44_s17, 128  ;;  %p431_p6 = scmp.lt.s32.totalorder %s44_s17, %s44_s17 }
  0x2e   :  { %p427_p5 = scmp.ne.s32.totalorder %s44_s17, %s426_s0  ;;  %p432_p7 = scmp.lt.s32.totalorder %s426_s0, %s426_s0 }
  0x30   :  { %p433_p8 = por %p432_p7, %p431_p6 }
  0x32   :  { %p434_p9 = pnand %p433_p8, %p427_p5 }
  0x34   :  { %437 = shalt.err (!%p434_p9)
}
  0x35   :  { %46 = dma.hbm_to_vmem [thread:$0]  %s625_s2, 128, %s44_s17, [#allocation6]  }
  0x36   :  { %s438_s7 = scalar_lea.hbm %s626_s3, 128 }
  0x37   :  { %p439_p10 = scmp.ne.s32.totalorder %s626_s3, %s438_s7  ;;  %p442_p11 = scmp.lt.u32.totalorder %s438_s7, %s626_s3 }
  0x39   :  { %p444_p12 = pnand %p442_p11, %p439_p10 }
  0x3b   :  { %447 = shalt.err (!%p444_p12)
}
  0x3c   :  { %s448_s12 = scalar_lea.vmem %s54_s19, 128  ;;  %p453_p0 = scmp.lt.s32.totalorder %s54_s19, %s54_s19 }
  0x3d   :  { %p449_p13 = scmp.ne.s32.totalorder %s54_s19, %s448_s12  ;;  %p454_p1 = scmp.lt.s32.totalorder %s448_s12, %s448_s12 }
  0x3f   :  { %p455_p2 = por %p454_p1, %p453_p0 }
  0x41   :  { %p456_p3 = pnand %p455_p2, %p449_p13 }
  0x43   :  { %459 = shalt.err (!%p456_p3)
}
  0x44   :  { %56 = dma.hbm_to_vmem [thread:$0]  %s626_s3, 128, %s54_s19, [#allocation9]  }
  0x45   :  { %482 = dma.done.wait [#allocation3], 1024  }
  0x46   :  { %483 = vsyncadd [#allocation3], 4294966272 }
  0x47   :  { %484 = dma.done.wait [#allocation6], 3584  }
  0x48   :  { %485 = vsyncadd [#allocation6], 4294963712 }
  0x49   :  { %486 = dma.done.wait [#allocation9], 128  }
  0x4a   :  { %487 = vsyncadd [#allocation9], 4294967168  ;;  %v498_v0 = vmov 0.0|0.0   ;;  %v77_v1 = vld [vmem:[#allocation5] sm:$0xff]  ;;  %v78_v2 = vld [vmem:[#allocation5 + $0x8] sm:$0xff]  ;;  %vm104_vm0 = vcmask 719872  }
  0x4b   :  { %289 = vmatprep.subr.bf16.mxu0 %v498_v0  ;;  %328 = vmatprep.subr.bf16.mxu1 %v498_v0  ;;  %v79_v3 = vld [vmem:[#allocation5 + $0x10] sm:$0xff]  ;;  %v290_v4 = vpack.c.bf16 %v78_v2, %v77_v1  ;;  %v80_v5 = vld [vmem:[#allocation5 + $0x18] sm:$0xff]  ;;  %v81_v7 = vld [vmem:[#allocation5 + $0x20] sm:$0xff]  ;;  %v499_v42 = vmov 0.0   ;;  %v500_v62 = vmov 0   ;;  %s501_s3 = smov [#allocation10]  }
  0x4c   :  { %v293_v6 = vpack.c.bf16 %v80_v5, %v79_v3  ;;  %v82_v8 = vld [vmem:[#allocation5 + $0x28] sm:$0xff]  ;;  %v83_v10 = vld [vmem:[#allocation5 + $0x30] sm:$0xff]  ;;  %v84_v11 = vld [vmem:[#allocation5 + $0x38] sm:$0xff]  ;;  %368 = vset.pattern.permute.xlu0 %v500_v62  ;;  %369 = vset.pattern.permute.xlu1 %v500_v62  ;;  %s271_s13 = sshll.u32 %s501_s3, 4  ;;  %s272_s13 = int_to_ptr.vmem [resolvable:$true] %s271_s13 }
  0x4d   :  { %291 = vmatpush1.bf16.msra.mxu0 %v290_v4  ;;  %342 = vmatpush1.bf16.msra.mxu1 %v290_v4  ;;  %v296_v9 = vpack.c.bf16 %v82_v8, %v81_v7  ;;  %v70_v12 = vld [vmem:[#allocation2 + $0x8] sm:$0xff]  ;;  %v299_v14 = vpack.c.bf16 %v84_v11, %v83_v10  ;;  %v85_v15 = vld [vmem:[#allocation5 + $0x40] sm:$0xff]  ;;  %v87_v18 = vld [vmem:[#allocation5 + $0x50] sm:$0xff]  ;;  %s460_s14 = scalar_lea.vmem %s272_s13, 512  ;;  %p465_p5 = scmp.lt.s32.totalorder %s272_s13, %s272_s13 }
  0x4e   :  { %292 = vmatprep.subr.bf16.mxu0 %v498_v0  ;;  %329 = vmatprep.subr.bf16.mxu1 %v498_v0  ;;  %v74_v13 = vld [vmem:[#allocation2 + $0x28] sm:$0xff]  ;;  %v88_v19 = vld [vmem:[#allocation5 + $0x58] sm:$0xff]  ;;  %v89_v21 = vld [vmem:[#allocation5 + $0x60] sm:$0xff]  ;;  %p461_p4 = scmp.ne.s32.totalorder %s272_s13, %s460_s14  ;;  %p466_p6 = scmp.lt.s32.totalorder %s460_s14, %s460_s14 }
  0x4f   :  { %285 = vmatprep.mubr.msk.f32.mxu0 %vm104_vm0, %v70_v12  ;;  %287 = vmatprep.mubr.msk.f32.mxu1 %vm104_vm0, %v74_v13  ;;  %v86_v16 = vld [vmem:[#allocation5 + $0x48] sm:$0xff]  ;;  %v305_v20 = vpack.c.bf16 %v88_v19, %v87_v18  ;;  %v91_v24 = vld [vmem:[#allocation5 + $0x70] sm:$0xff]  ;;  %v92_v25 = vld [vmem:[#allocation5 + $0x78] sm:$0xff] }
  0x50   :  { %v302_v17 = vpack.c.bf16 %v86_v16, %v85_v15  ;;  %v90_v22 = vld [vmem:[#allocation5 + $0x68] sm:$0xff]  ;;  %v311_v26 = vpack.c.bf16 %v92_v25, %v91_v24  ;;  %v93_v27 = vld [vmem:[#allocation5 + $0x80] sm:$0xff]  ;;  %v95_v30 = vld [vmem:[#allocation5 + $0x90] sm:$0xff]  ;;  %p467_p7 = por %p466_p6, %p465_p5 }
  0x51   :  { %294 = vmatpush1.bf16.msra.mxu0 %v293_v6  ;;  %343 = vmatpush1.bf16.msra.mxu1 %v293_v6  ;;  %v308_v23 = vpack.c.bf16 %v90_v22, %v89_v21  ;;  %v94_v28 = vld [vmem:[#allocation5 + $0x88] sm:$0xff]  ;;  %v96_v31 = vld [vmem:[#allocation5 + $0x98] sm:$0xff]  ;;  %v97_v33 = vld [vmem:[#allocation5 + $0xa0] sm:$0xff] }
  0x52   :  { %295 = vmatprep.subr.bf16.mxu0 %v498_v0  ;;  %330 = vmatprep.subr.bf16.mxu1 %v498_v0  ;;  %v314_v29 = vpack.c.bf16 %v94_v28, %v93_v27  ;;  %v317_v32 = vpack.c.bf16 %v96_v31, %v95_v30  ;;  %v98_v34 = vld [vmem:[#allocation5 + $0xa8] sm:$0xff]  ;;  %v99_v36 = vld [vmem:[#allocation5 + $0xb0] sm:$0xff]  ;;  %v100_v37 = vld [vmem:[#allocation5 + $0xb8] sm:$0xff]  ;;  %p468_p8 = pnand %p467_p7, %p461_p4 }
  0x53   :  { %v320_v35 = vpack.c.bf16 %v98_v34, %v97_v33  ;;  %v323_v38 = vpack.c.bf16 %v100_v37, %v99_v36  ;;  %v101_v39 = vld [vmem:[#allocation5 + $0xc0] sm:$0xff]  ;;  %v102_v40 = vld [vmem:[#allocation5 + $0xc8] sm:$0xff]  ;;  %v103_v43 = vld [vmem:[#allocation5 + $0xd0] sm:$0xff] }
  0x54   :  { %v326_v41 = vpack.c.bf16 %v102_v40, %v101_v39  ;;  %v69_v44 = vld [vmem:[#allocation2] sm:$0xff]  ;;  %v72_v46 = vld [vmem:[#allocation2 + $0x18] sm:$0xff]  ;;  %v71_v48 = vld [vmem:[#allocation2 + $0x10] sm:$0xff] }
  0x55   :  { %297 = vmatpush1.bf16.msra.mxu0 %v296_v9  ;;  %344 = vmatpush1.bf16.msra.mxu1 %v296_v9  ;;  %v73_v45 = vld [vmem:[#allocation2 + $0x20] sm:$0xff]  ;;  %v76_v47 = vld [vmem:[#allocation2 + $0x38] sm:$0xff]  ;;  %v75_v49 = vld [vmem:[#allocation2 + $0x30] sm:$0xff] }
  0x56   :  { %298 = vmatprep.subr.bf16.mxu0 %v498_v0  ;;  %331 = vmatprep.subr.bf16.mxu1 %v498_v0  ;;  %v233_v19 = vld [vmem:[#allocation7] sm:$0xff]  ;;  %v237_v22 = vld [vmem:[#allocation8] sm:$0xff] }
  0x59   :  { %300 = vmatpush1.bf16.msra.mxu0 %v299_v14  ;;  %345 = vmatpush1.bf16.msra.mxu1 %v299_v14 }
  0x5a   :  { %301 = vmatprep.subr.bf16.mxu0 %v498_v0  ;;  %332 = vmatprep.subr.bf16.mxu1 %v498_v0 }
  0x5d   :  { %303 = vmatpush1.bf16.msra.mxu0 %v302_v17  ;;  %346 = vmatpush1.bf16.msra.mxu1 %v302_v17 }
  0x5e   :  { %304 = vmatprep.subr.bf16.mxu0 %v498_v0  ;;  %333 = vmatprep.subr.bf16.mxu1 %v498_v0 }
  0x61   :  { %306 = vmatpush1.bf16.msra.mxu0 %v305_v20  ;;  %347 = vmatpush1.bf16.msra.mxu1 %v305_v20 }
  0x62   :  { %307 = vmatprep.subr.bf16.mxu0 %v498_v0  ;;  %334 = vmatprep.subr.bf16.mxu1 %v498_v0 }
  0x65   :  { %309 = vmatpush1.bf16.msra.mxu0 %v308_v23  ;;  %348 = vmatpush1.bf16.msra.mxu1 %v308_v23 }
  0x66   :  { %310 = vmatprep.subr.bf16.mxu0 %v498_v0  ;;  %335 = vmatprep.subr.bf16.mxu1 %v498_v0 }
  0x69   :  { %312 = vmatpush1.bf16.msra.mxu0 %v311_v26  ;;  %349 = vmatpush1.bf16.msra.mxu1 %v311_v26 }
  0x6a   :  { %313 = vmatprep.subr.bf16.mxu0 %v498_v0  ;;  %336 = vmatprep.subr.bf16.mxu1 %v498_v0 }
  0x6d   :  { %315 = vmatpush1.bf16.msra.mxu0 %v314_v29  ;;  %350 = vmatpush1.bf16.msra.mxu1 %v314_v29 }
  0x6e   :  { %316 = vmatprep.subr.bf16.mxu0 %v498_v0  ;;  %337 = vmatprep.subr.bf16.mxu1 %v498_v0 }
  0x71   :  { %318 = vmatpush1.bf16.msra.mxu0 %v317_v32  ;;  %351 = vmatpush1.bf16.msra.mxu1 %v317_v32 }
  0x72   :  { %319 = vmatprep.subr.bf16.mxu0 %v498_v0  ;;  %338 = vmatprep.subr.bf16.mxu1 %v498_v0 }
  0x75   :  { %321 = vmatpush1.bf16.msra.mxu0 %v320_v35  ;;  %352 = vmatpush1.bf16.msra.mxu1 %v320_v35 }
  0x76   :  { %322 = vmatprep.subr.bf16.mxu0 %v498_v0  ;;  %339 = vmatprep.subr.bf16.mxu1 %v498_v0 }
  0x79   :  { %324 = vmatpush1.bf16.msra.mxu0 %v323_v38  ;;  %353 = vmatpush1.bf16.msra.mxu1 %v323_v38 }
  0x7a   :  { %325 = vmatprep.subr.bf16.mxu0 %v498_v0  ;;  %340 = vmatprep.subr.bf16.mxu1 %v498_v0 }
  0x7d   :  { %327 = vmatpush1.bf16.msra.mxu0 %v326_v41  ;;  %354 = vmatpush1.bf16.msra.mxu1 %v326_v41 }
  0x7e   :  { %169 = vmatprep.subr.mxu0 %v499_v42  ;;  %341 = vmatprep.subr.mxu1 %v499_v42 }
  0x81   :  { %170 = vmatpush1.msra.mxu0 %v103_v43  ;;  %355 = vmatpush1.msra.mxu1 %v103_v43 }
  0x82   :  { %182 = vmatmul.mubr.f32.vlgmr.msra.gmra.mrb[0].mxu0 %v69_v44  ;;  %192 = vmatmul.mubr.f32.vlgmr.msra.gmra.mrb[0].mxu1 %v73_v45 }
  0x83   :  { %286 = vmatprep.mubr.msk.f32.mxu0 %vm104_vm0, %v72_v46  ;;  %288 = vmatprep.mubr.msk.f32.mxu1 %vm104_vm0, %v76_v47 }
  0x86   :  { %187 = vmatmul.mubr.f32.gmra.mrb[2].mxu0 %v71_v48  ;;  %197 = vmatmul.mubr.f32.gmra.mrb[2].mxu1 %v75_v49 }
 0x155   :  { %v183_v50 = vpop.f32.mrb[0].mxu0  ;;  %v193_v51 = vpop.f32.mrb[0].mxu1 }
 0x156   :  { %206 = vadd.xlane.f32.xlu1 %v193_v51  ;;  %202 = vadd.xlane.f32.xlu0 %v183_v50  ;;  %v185_v52 = vpop.f32.mrb[1].mxu0  ;;  %v195_v53 = vpop.f32.mrb[1].mxu1  ;;  %v210_v54 = vmul.f32 %v183_v50, %v183_v50  ;;  %v212_v61 = vmul.f32 %v193_v51, %v193_v51 }
 0x159   :  { %v188_v55 = vpop.f32.mrb[2].mxu0  ;;  %v198_v56 = vpop.f32.mrb[2].mxu1 }
 0x15a   :  { %214 = vadd.xlane.f32.xlu1 %v210_v54  ;;  %204 = vadd.xlane.f32.xlu0 %v188_v55  ;;  %v190_v57 = vpop.f32.mrb[3].mxu0  ;;  %v200_v58 = vpop.f32.mrb[3].mxu1  ;;  %v211_v59 = vmul.f32 %v188_v55, %v188_v55  ;;  %v213_v60 = vmul.f32 %v198_v56, %v198_v56 }
 0x15e   :  { %208 = vadd.xlane.f32.xlu1 %v198_v56  ;;  %216 = vadd.xlane.f32.xlu0 %v211_v59 }
 0x162   :  { %220 = vadd.xlane.f32.xlu1 %v213_v60  ;;  %218 = vadd.xlane.f32.xlu0 %v212_v61 }
 0x1e3   :  { %v207_v63 = vpop.xlane.xlu1 %206  ;;  %v203_v0 = vpop.xlane.xlu0 %202 }
 0x1e7   :  { %v215_v1 = vpop.xlane.xlu1 %214  ;;  %v205_v2 = vpop.xlane.xlu0 %204 }
 0x1e8   :  { %v222_v3 = vadd.f32 %v205_v2, %v203_v0 }
 0x1ea   :  { %v223_v4 = vadd.f32 %v222_v3, %v207_v63 }
 0x1eb   :  { %v209_v5 = vpop.xlane.xlu1 %208  ;;  %v217_v6 = vpop.xlane.xlu0 %216 }
 0x1ec   :  { %v224_v7 = vadd.f32 %v223_v4, %v209_v5  ;;  %v225_v8 = vadd.f32 %v217_v6, %v215_v1 }
 0x1ee   :  { %v228_v10 = vmul.f32 0.001953125, %v224_v7 }
 0x1ef   :  { %v219_v9 = vpop.xlane.xlu0 %218  ;;  %v221_v12 = vpop.xlane.xlu1 %220 }
 0x1f0   :  { %v226_v11 = vadd.f32 %v225_v8, %v219_v9  ;;  %v230_v14 = vmul.f32 %v228_v10, %v228_v10 }
 0x1f2   :  { %v227_v13 = vadd.f32 %v226_v11, %v221_v12 }
 0x1f4   :  { %v229_v15 = vmul.f32 0.001953125, %v227_v13 }
 0x1f6   :  { %v231_v16 = vsub.f32 %v229_v15, %v230_v14 }
 0x1f8   :  { %v232_v17 = vmax.f32 %v231_v16, 0.0 }
 0x1fa   :  { %v234_v18 = vadd.f32 1e-05, %v232_v17 }
 0x1fc   :  { %370 = vrsqrt.f32 %v234_v18 }
 0x206   :  { %v371_v20 = vpop.eup %370 }
 0x207   :  { %v236_v21 = vmul.f32 %v371_v20, %v233_v19 }
 0x209   :  { %242 = vperm.xlu0 %368, %v236_v21   ;;  %v238_v23 = vmul.f32 %v236_v21, %v228_v10 }
 0x20b   :  { %v239_v24 = vsub.f32 %v237_v22, %v238_v23 }
 0x20d   :  { %251 = vperm.xlu1 %369, %v239_v24  }
 0x288   :  { %v243_v25 = vpop.permute.xlu0 %242 }
 0x289   :  { %v245_v26 = vmul.f32 %v243_v25, %v183_v50  ;;  %v246_v27 = vmul.f32 %v243_v25, %v188_v55  ;;  %v247_v28 = vmul.f32 %v243_v25, %v193_v51  ;;  %v248_v29 = vmul.f32 %v243_v25, %v198_v56 }
 0x28c   :  { %v252_v30 = vpop.permute.xlu1 %251 }
 0x28d   :  { %v254_v31 = vadd.f32 %v252_v30, %v245_v26  ;;  %v255_v32 = vadd.f32 %v252_v30, %v246_v27  ;;  %v256_v33 = vadd.f32 %v252_v30, %v247_v28  ;;  %v257_v34 = vadd.f32 %v252_v30, %v248_v29 }
 0x28f   :  { %v258_v35 = vmax.f32 %v254_v31, 0.0  ;;  %v259_v36 = vmax.f32 %v255_v32, 0.0  ;;  %v260_v37 = vmax.f32 %v256_v33, 0.0  ;;  %v261_v38 = vmax.f32 %v257_v34, 0.0 }
 0x291   :  { %262 = vst [vmem:[#allocation10] sm:$0xff] %v258_v35  ;;  %263 = vst [vmem:[#allocation10 + $0x8] sm:$0xff] %v259_v36 }
 0x292   :  { %264 = vst [vmem:[#allocation10 + $0x10] sm:$0xff] %v260_v37  ;;  %265 = vst [vmem:[#allocation10 + $0x18] sm:$0xff] %v261_v38 }
 0x293   :  { %471 = shalt.err (!%p468_p8)
}
 0x294   :  { %s472_s17 = scalar_lea.hbm %s627_s4, 512 }
 0x295   :  { %p473_p9 = scmp.ne.s32.totalorder %s627_s4, %s472_s17  ;;  %p476_p10 = scmp.lt.u32.totalorder %s472_s17, %s627_s4 }
 0x297   :  { %p478_p11 = pnand %p476_p10, %p473_p9 }
 0x299   :  { %481 = shalt.err (!%p478_p11)
}
 0x29a   :  { %277 = dma.vmem_to_hbm [thread:$0]  %s272_s13, 512, %s627_s4, [#allocation4], %s491_s25, %s491_s25, %s492_s26  }
 0x29b   :  { %488 = dma.done.wait [#allocation4], 512  }
 0x29c   :  { %489 = vsyncadd [#allocation4], 4294966784 }
 0x29d   :  { %281 = vsyncpa [#allocation3], 1 }
 0x29e   :  { %282 = vsyncpa [#allocation6], 1 }
 0x29f   :  { %283 = vsyncpa [#allocation9], 1 }
 0x2a0   :  { %284 = vsyncpa [#allocation4], 1 }

// kernel: generator_forward.17
= control target key start
LH: loop header
LB: loop body
LE: loop exit
PB: predicated region body
PF: predicated region fallthrough
CT: control target
= control target key end

     0   :  { %7 = vsyncpa [#allocation3], 0  ;;  %s474_s0 = inlined_call_operand.hbm [shape: f32[12,72], index: 0, kind: input, shape index: {}]   ;;  %s475_s1 = inlined_call_operand.hbm [shape: f32[72,512], index: 1, kind: input, shape index: {}]   ;;  %s476_s2 = inlined_call_operand.hbm [shape: f32[12,512], index: 2, kind: output, shape index: {}]  }
   0x1   :  { %8 = vsyncpa [#allocation6], 0 }
   0x2   :  { %9 = vsyncpa [#allocation4], 0  ;;  %s405_s9 = smov [#allocation2]   ;;  %s333_s13 = scalar_lea.hbm %s474_s0, 256 }
   0x3   :  { %s15_s10 = sshll.u32 %s405_s9, 4  ;;  %p334_p0 = scmp.ne.s32.totalorder %s474_s0, %s333_s13  ;;  %s16_s10 = int_to_ptr.vmem [resolvable:$true] %s15_s10 }
   0x4   :  { %p337_p1 = scmp.lt.u32.totalorder %s333_s13, %s474_s0 }
   0x6   :  { %p339_p2 = pnand %p337_p1, %p334_p0 }
   0x8   :  { %342 = shalt.err (!%p339_p2)
}
   0x9   :  { %s343_s18 = scalar_lea.vmem %s16_s10, 256  ;;  %p348_p4 = scmp.lt.s32.totalorder %s16_s10, %s16_s10 }
   0xa   :  { %p344_p3 = scmp.ne.s32.totalorder %s16_s10, %s343_s18  ;;  %p349_p5 = scmp.lt.s32.totalorder %s343_s18, %s343_s18 }
   0xc   :  { %p350_p6 = por %p349_p5, %p348_p4 }
   0xe   :  { %p351_p7 = pnand %p350_p6, %p344_p3 }
  0x10   :  { %354 = shalt.err (!%p351_p7)
}
  0x11   :  { %s406_s19 = smov 128   ;;  %s407_s20 = smov 8  }
  0x12   :  { %21 = dma.hbm_to_vmem [thread:$0]  %s474_s0, 256, %s16_s10, [#allocation3], %s406_s19, %s406_s19, %s407_s20  }
  0x13   :  { %s408_s23 = smov [#allocation5]   ;;  %s355_s27 = scalar_lea.hbm %s475_s1, 4608 }
  0x14   :  { %s27_s24 = sshll.u32 %s408_s23, 4  ;;  %p356_p8 = scmp.ne.s32.totalorder %s475_s1, %s355_s27  ;;  %s28_s24 = int_to_ptr.vmem [resolvable:$true] %s27_s24 }
  0x15   :  { %p359_p9 = scmp.lt.u32.totalorder %s355_s27, %s475_s1 }
  0x17   :  { %p361_p10 = pnand %p359_p9, %p356_p8 }
  0x19   :  { %364 = shalt.err (!%p361_p10)
}
  0x1a   :  { %s365_s4 = scalar_lea.vmem %s28_s24, 4608  ;;  %p370_p12 = scmp.lt.s32.totalorder %s28_s24, %s28_s24 }
  0x1b   :  { %p366_p11 = scmp.ne.s32.totalorder %s28_s24, %s365_s4  ;;  %p371_p13 = scmp.lt.s32.totalorder %s365_s4, %s365_s4 }
  0x1d   :  { %p372_p0 = por %p371_p13, %p370_p12 }
  0x1f   :  { %p373_p1 = pnand %p372_p0, %p366_p11 }
  0x21   :  { %376 = shalt.err (!%p373_p1)
}
  0x22   :  { %s409_s0 = smov 512   ;;  %s410_s5 = smov 32  }
  0x23   :  { %33 = dma.hbm_to_vmem [thread:$0]  %s475_s1, 4608, %s28_s24, [#allocation6], %s409_s0, %s409_s0, %s410_s5  }
  0x24   :  { %399 = dma.done.wait [#allocation3], 256  }
  0x25   :  { %400 = vsyncadd [#allocation3], 4294967040 }
  0x26   :  { %401 = dma.done.wait [#allocation6], 4608  }
  0x27   :  { %402 = vsyncadd [#allocation6], 4294962688  ;;  %v411_v0 = vmov 0.0   ;;  %v43_v1 = vld [vmem:[#allocation5 + $0x8] sm:$0xff]  ;;  %v45_v3 = vld [vmem:[#allocation5 + $0x18] sm:$0xff]  ;;  %vm78_vm0 = vcmask 588800  }
  0x28   :  { %149 = vmatprep.mubr.f32.mxu0 %v411_v0  ;;  %226 = vmatprep.mubr.f32.mxu1 %v411_v0  ;;  %v47_v2 = vld [vmem:[#allocation5 + $0x28] sm:$0xff]  ;;  %v49_v5 = vld [vmem:[#allocation5 + $0x38] sm:$0xff]  ;;  %v42_v6 = vld [vmem:[#allocation5] sm:$0xff]  ;;  %s412_s1 = smov [#allocation7]  }
  0x29   :  { %v277_v4 = vpack.c.bf16 %v47_v2, %v43_v1  ;;  %v46_v7 = vld [vmem:[#allocation5 + $0x20] sm:$0xff]  ;;  %v293_v8 = vpack.c.bf16 %v49_v5, %v45_v3  ;;  %v44_v10 = vld [vmem:[#allocation5 + $0x10] sm:$0xff]  ;;  %v51_v12 = vld [vmem:[#allocation5 + $0x48] sm:$0xff]  ;;  %s260_s8 = sshll.u32 %s412_s1, 4  ;;  %s261_s8 = int_to_ptr.vmem [resolvable:$true] %s260_s8 }
  0x2a   :  { %v279_v9 = vpack.c.bf16 %v46_v7, %v42_v6  ;;  %v48_v11 = vld [vmem:[#allocation5 + $0x30] sm:$0xff]  ;;  %v55_v14 = vld [vmem:[#allocation5 + $0x68] sm:$0xff]  ;;  %v53_v15 = vld [vmem:[#allocation5 + $0x58] sm:$0xff]  ;;  %s377_s9 = scalar_lea.vmem %s261_s8, 1024  ;;  %p382_p3 = scmp.lt.s32.totalorder %s261_s8, %s261_s8 }
  0x2b   :  { %278 = vmatprep.subr.bf16.mxu0 %v277_v4  ;;  %v295_v13 = vpack.c.bf16 %v48_v11, %v44_v10  ;;  %v57_v16 = vld [vmem:[#allocation5 + $0x78] sm:$0xff]  ;;  %294 = vmatprep.subr.bf16.mxu1 %v293_v8  ;;  %v281_v17 = vpack.c.bf16 %v55_v14, %v51_v12  ;;  %v50_v19 = vld [vmem:[#allocation5 + $0x40] sm:$0xff]  ;;  %v52_v21 = vld [vmem:[#allocation5 + $0x50] sm:$0xff]  ;;  %p378_p2 = scmp.ne.s32.totalorder %s261_s8, %s377_s9  ;;  %p383_p4 = scmp.lt.s32.totalorder %s377_s9, %s377_s9 }
  0x2c   :  { %280 = vmatpush1.bf16.msra.mxu0 %v279_v9  ;;  %v297_v18 = vpack.c.bf16 %v57_v16, %v53_v15  ;;  %v54_v20 = vld [vmem:[#allocation5 + $0x60] sm:$0xff]  ;;  %v56_v23 = vld [vmem:[#allocation5 + $0x70] sm:$0xff]  ;;  %v59_v24 = vld [vmem:[#allocation5 + $0x88] sm:$0xff] }
  0x2d   :  { %296 = vmatpush1.bf16.msra.mxu1 %v295_v13  ;;  %v283_v22 = vpack.c.bf16 %v54_v20, %v50_v19  ;;  %v63_v25 = vld [vmem:[#allocation5 + $0xa8] sm:$0xff]  ;;  %282 = vmatprep.subr.bf16.mxu0 %v281_v17  ;;  %v299_v26 = vpack.c.bf16 %v56_v23, %v52_v21  ;;  %v61_v28 = vld [vmem:[#allocation5 + $0x98] sm:$0xff]  ;;  %v58_v30 = vld [vmem:[#allocation5 + $0x80] sm:$0xff]  ;;  %p384_p5 = por %p383_p4, %p382_p3 }
  0x2e   :  { %298 = vmatprep.subr.bf16.mxu1 %v297_v18  ;;  %v285_v27 = vpack.c.bf16 %v63_v25, %v59_v24  ;;  %v65_v29 = vld [vmem:[#allocation5 + $0xb8] sm:$0xff]  ;;  %v62_v32 = vld [vmem:[#allocation5 + $0xa0] sm:$0xff]  ;;  %v60_v33 = vld [vmem:[#allocation5 + $0x90] sm:$0xff] }
  0x2f   :  { %v301_v31 = vpack.c.bf16 %v65_v29, %v61_v28  ;;  %v64_v34 = vld [vmem:[#allocation5 + $0xb0] sm:$0xff]  ;;  %v287_v35 = vpack.c.bf16 %v62_v32, %v58_v30  ;;  %v67_v36 = vld [vmem:[#allocation5 + $0xc8] sm:$0xff]  ;;  %v69_v38 = vld [vmem:[#allocation5 + $0xd8] sm:$0xff]  ;;  %p385_p6 = pnand %p384_p5, %p378_p2 }
  0x30   :  { %284 = vmatpush1.bf16.msra.mxu0 %v283_v22  ;;  %v71_v37 = vld [vmem:[#allocation5 + $0xe8] sm:$0xff]  ;;  %v303_v39 = vpack.c.bf16 %v64_v34, %v60_v33  ;;  %v73_v41 = vld [vmem:[#allocation5 + $0xf8] sm:$0xff]  ;;  %v66_v42 = vld [vmem:[#allocation5 + $0xc0] sm:$0xff] }
  0x31   :  { %300 = vmatpush1.bf16.msra.mxu1 %v299_v26  ;;  %286 = vmatprep.subr.bf16.mxu0 %v285_v27  ;;  %v289_v40 = vpack.c.bf16 %v71_v37, %v67_v36  ;;  %v70_v43 = vld [vmem:[#allocation5 + $0xe0] sm:$0xff]  ;;  %v305_v44 = vpack.c.bf16 %v73_v41, %v69_v38  ;;  %v68_v45 = vld [vmem:[#allocation5 + $0xd0] sm:$0xff]  ;;  %v75_v49 = vld [vmem:[#allocation5 + $0x108] sm:$0xff] }
  0x32   :  { %302 = vmatprep.subr.bf16.mxu1 %v301_v31  ;;  %v72_v46 = vld [vmem:[#allocation5 + $0xf0] sm:$0xff]  ;;  %v291_v47 = vpack.c.bf16 %v70_v43, %v66_v42  ;;  %v77_v50 = vld [vmem:[#allocation5 + $0x118] sm:$0xff]  ;;  %v74_v51 = vld [vmem:[#allocation5 + $0x100] sm:$0xff] }
  0x33   :  { %v307_v48 = vpack.c.bf16 %v72_v46, %v68_v45  ;;  %v76_v52 = vld [vmem:[#allocation5 + $0x110] sm:$0xff]  ;;  %v41_v54 = vld [vmem:[#allocation2 + $0x8] sm:$0xf] }
  0x34   :  { %288 = vmatpush1.bf16.msra.mxu0 %v287_v35  ;;  %v40_v53 = vld [vmem:[#allocation2] sm:$0xff] }
  0x35   :  { %304 = vmatpush1.bf16.msra.mxu1 %v303_v39  ;;  %290 = vmatprep.subr.bf16.mxu0 %v289_v40 }
  0x36   :  { %306 = vmatprep.subr.bf16.mxu1 %v305_v44 }
  0x38   :  { %292 = vmatpush1.bf16.msra.mxu0 %v291_v47 }
  0x39   :  { %308 = vmatpush1.bf16.msra.mxu1 %v307_v48  ;;  %101 = vmatprep.subr.mxu0 %v75_v49 }
  0x3a   :  { %178 = vmatprep.subr.mxu1 %v77_v50 }
  0x3c   :  { %102 = vmatpush1.msra.mxu0 %v74_v51 }
  0x3d   :  { %179 = vmatpush1.msra.mxu1 %v76_v52  ;;  %273 = vmatmul.mubr.msk.f32.vlgmr.msra.gmra.mrb[0].mxu0 %vm78_vm0, %v40_v53 }
  0x3e   :  { %275 = vmatmul.mubr.msk.f32.vlgmr.msra.gmra.mrb[0].mxu1 %vm78_vm0, %v40_v53  ;;  %155 = vmatprep.mubr.f32.mxu0 %v411_v0 }
  0x3f   :  { %232 = vmatprep.mubr.f32.mxu1 %v411_v0 }
  0x41   :  { %274 = vmatmul.mubr.msk.f32.gmra.mrb[2].mxu0 %vm78_vm0, %v41_v54 }
  0x42   :  { %276 = vmatmul.mubr.msk.f32.gmra.mrb[2].mxu1 %vm78_vm0, %v41_v54 }
 0x110   :  { %v151_v55 = vpop.f32.mrb[0].mxu0 }
 0x111   :  { %317 = vtanh.f32 %v151_v55  ;;  %v228_v56 = vpop.f32.mrb[0].mxu1  ;;  %v153_v57 = vpop.f32.mrb[1].mxu0 }
 0x112   :  { %319 = vtanh.f32 %v228_v56  ;;  %v230_v58 = vpop.f32.mrb[1].mxu1 }
 0x113   :  { %321 = vtanh.f32 %v153_v57 }
 0x114   :  { %323 = vtanh.f32 %v230_v58  ;;  %v157_v59 = vpop.f32.mrb[2].mxu0 }
 0x115   :  { %325 = vtanh.f32 %v157_v59  ;;  %v234_v60 = vpop.f32.mrb[2].mxu1  ;;  %v159_v61 = vpop.f32.mrb[3].mxu0 }
 0x116   :  { %327 = vtanh.f32 %v234_v60  ;;  %v236_v62 = vpop.f32.mrb[3].mxu1 }
 0x117   :  { %329 = vtanh.f32 %v159_v61 }
 0x118   :  { %331 = vtanh.f32 %v236_v62 }
 0x11b   :  { %v318_v63 = vpop.eup %317 }
 0x11c   :  { %v320_v0 = vpop.eup %319  ;;  %247 = vst [vmem:[#allocation7] sm:$0xff] %v318_v63 }
 0x11d   :  { %v322_v1 = vpop.eup %321  ;;  %249 = vst [vmem:[#allocation7 + $0x10] sm:$0xff] %v320_v0 }
 0x11e   :  { %v324_v2 = vpop.eup %323  ;;  %248 = vst [vmem:[#allocation7 + $0x8] sm:$0xff] %v322_v1 }
 0x11f   :  { %v326_v3 = vpop.eup %325  ;;  %250 = vst [vmem:[#allocation7 + $0x18] sm:$0xff] %v324_v2 }
 0x120   :  { %v328_v4 = vpop.eup %327  ;;  %251 = vst [vmem:[#allocation7 + $0x20] sm:$0xf] %v326_v3 }
 0x121   :  { %v330_v5 = vpop.eup %329  ;;  %253 = vst [vmem:[#allocation7 + $0x30] sm:$0xf] %v328_v4 }
 0x122   :  { %v332_v6 = vpop.eup %331  ;;  %252 = vst [vmem:[#allocation7 + $0x28] sm:$0xf] %v330_v5 }
 0x123   :  { %254 = vst [vmem:[#allocation7 + $0x38] sm:$0xf] %v332_v6 }
 0x124   :  { %388 = shalt.err (!%p385_p6)
}
 0x125   :  { %s389_s12 = scalar_lea.hbm %s476_s2, 1024 }
 0x126   :  { %p390_p7 = scmp.ne.s32.totalorder %s476_s2, %s389_s12  ;;  %p393_p8 = scmp.lt.u32.totalorder %s389_s12, %s476_s2 }
 0x128   :  { %p395_p9 = pnand %p393_p8, %p390_p7 }
 0x12a   :  { %398 = shalt.err (!%p395_p9)
}
 0x12b   :  { %266 = dma.vmem_to_hbm [thread:$0]  %s261_s8, 1024, %s476_s2, [#allocation4], %s409_s0, %s409_s0, %s410_s5  }
 0x12c   :  { %403 = dma.done.wait [#allocation4], 1024  }
 0x12d   :  { %404 = vsyncadd [#allocation4], 4294966272 }
 0x12e   :  { %270 = vsyncpa [#allocation3], 1 }
 0x12f   :  { %271 = vsyncpa [#allocation6], 1 }
 0x130   :  { %272 = vsyncpa [#allocation4], 1 }

// kernel: generator_forward.18
= control target key start
LH: loop header
LB: loop body
LE: loop exit
PB: predicated region body
PF: predicated region fallthrough
CT: control target
= control target key end

     0   :  { %7 = vsyncpa [#allocation3], 0  ;;  %s1030_s0 = inlined_call_operand.hbm [shape: f32[192,32], index: 0, kind: input, shape index: {}]   ;;  %s1031_s1 = inlined_call_operand.hbm [shape: f32[32,64], index: 1, kind: input, shape index: {}]   ;;  %s1032_s2 = inlined_call_operand.hbm [shape: f32[192,64], index: 2, kind: output, shape index: {}]  }
   0x1   :  { %9 = vsyncpa [#allocation3 + $0x1], 0 }
   0x2   :  { %10 = vsyncpa [#allocation6], 0 }
   0x3   :  { %11 = vsyncpa [#allocation4], 0 }
   0x4   :  { %13 = vsyncpa [#allocation4 + $0x1], 0  ;;  %s777_s9 = smov 0   ;;  %s779_s10 = smov 0  }
   0x5   :  { %s781_s11 = smov 0   ;;  %s783_s12 = smov 0  }
   0x6   :  { %s785_s13 = smov 0   ;;  %s787_s14 = smov 0  }
   0x7 LB: > { %s461_s15 = sadd.s32 4294967295, %s753_s14   ;;  %s462_s16 = sadd.s32 4294967294, %s753_s14   ;;  %s753_s14 = sphi %s787_s14, %s19_s14   ;;  %s749_s13 = sphi %s785_s13, %s1055_s13   ;;  %s745_s12 = sphi %s783_s12, %s1054_s12   ;;  %s741_s11 = sphi %s781_s11, %s1053_s11   ;;  %s737_s10 = sphi %s779_s10, %s1052_s10   ;;  %s733_s9 = sphi %s777_s9, %s1051_s9  }
   0x8   : > { %p51_p0 = scmp.ne.s32.totalorder %s737_s10, %s733_s9  ;;  %p811_p1 = scmp.eq.s32.totalorder %s461_s15, 0 }
   0x9   : > { %p815_p2 = scmp.eq.s32.totalorder %s461_s15, 2  ;;  %p109_p3 = scmp.eq.s32.totalorder %s462_s16, 2 }
   0xa   : > { %s1037_s17 = scalar_select %p811_p1, 1, 0 }
   0xb   : > { %s1038_s18 = scalar_select %p815_p2, 1, 0 }
   0xc   : > { %p821_p4 = por %p811_p1, %p51_p0  ;;  %p463_p5 = scmp.ge.s32.totalorder %s753_s14, 1 }
   0xd   : > { %p826_p6 = por %p109_p3, %p51_p0  ;;  %p116_p7 = scmp.lt.s32.totalorder %s753_s14, 4 }
   0xe   : > { %s1039_s19 = scalar_select %p821_p4, 1, 0 }
   0xf   : > { %s1040_s20 = scalar_select %p826_p6, 1, 0 }
  0x10   : > { %p831_p8 = pnand %p463_p5, %p116_p7  ;;  %s755_s22 = smov [#allocation5]  }
  0x11   : > { %s130_s23 = sshll.u32 %s755_s22, 4  ;;  %s31_s25 = sadd.s32 1, %s749_s13  ;;  %s131_s23 = int_to_ptr.vmem [resolvable:$true] %s130_s23 }
  0x12   : > { %s1041_s21 = scalar_select %p831_p8, 1, 0 }
  0x13   : > { %p540_p9 = pneg %p831_p8  ;;  %s609_s28 = scalar_lea.hbm %s1031_s1, 512 }
  0x14   : > { %p610_p11 = scmp.ne.s32.totalorder %s1031_s1, %s609_s28  ;;  %p616_p3 = scmp.lt.u32.totalorder %s609_s28, %s1031_s1 }
  0x15   : > { %p839_p10 = pnand %p540_p9, %p811_p1 }
  0x17   : > { %p611_p12 = pneg %p839_p10 }
  0x19   : > { %p612_p13 = pnand %p611_p12, %p610_p11 }
  0x1b   : > { %p613_p0 = pneg %p612_p13 }
  0x1d   : > { %p618_p5 = pnand %p616_p3, %p613_p0 }
  0x1f   : > { %621 = shalt.err (!%p618_p5)
}
  0x20   : > { %s622_s5 = scalar_lea.vmem %s131_s23, 512  ;;  %p630_p1 = scmp.lt.s32.totalorder %s131_s23, %s131_s23 }
  0x21   : > { %p623_p7 = scmp.ne.s32.totalorder %s131_s23, %s622_s5  ;;  %p631_p4 = scmp.lt.s32.totalorder %s622_s5, %s622_s5 }
  0x23   : > { %p625_p9 = pnand %p623_p7, %p611_p12  ;;  %p632_p8 = por %p631_p4, %p630_p1 }
  0x25   : > { %p626_p6 = pneg %p625_p9 }
  0x27   : > { %p633_p2 = pnand %p632_p8, %p626_p6 }
  0x29   : > { %636 = shalt.err (!%p633_p2)
}
  0x2a   : > { %s756_s6 = smov 128   ;;  %s757_s7 = smov 8  }
  0x2b   : > { %543 = dma.hbm_to_vmem [thread:$0]  (!%p839_p10), %s1031_s1, 512, %s131_s23, [#allocation6], %s756_s6, %s756_s6, %s757_s7  }
  0x2c   : > { %p33_p1 = scmp.ge.s32.totalorder %s31_s25, 3  ;;  %s38_s16 = sadd.s32 1, %s741_s11 }
  0x2d   : > { %p45_p2 = scmp.ne.s32.totalorder %s741_s11, %s737_s10  ;;  %p46_p4 = scmp.eq.s32.totalorder %s753_s14, 0 }
  0x2e   : > { %s1057_s25 = smov (%p33_p1, %s31_s25), 0  ;;  %p1044_p8 = scmp.ne.s32.totalorder %s1038_s18, 0 }
  0x2f   : > { %p869_p6 = por %p46_p4, %p45_p2  ;;  %s35_s26 = ssub.s32 %s749_s13, %s1057_s25 }
  0x30   : > { %p875_p11 = por %p1044_p8, %p45_p2  ;;  %p553_p12 = scmp.lt.s32.totalorder %s753_s14, 3 }
  0x31   : > { %p36_p10 = scmp.eq.s32.totalorder %s35_s26, 0  ;;  %s144_s23 = sand.u32 1, %s741_s11  }
  0x32   : > { %s466_s27 = sshll.u32 %s144_s23, 6  ;;  %s486_s29 = sshll.u32 %s749_s13, 10 }
  0x33   : > { %s884_s28 = scalar_select %p36_p10, %s741_s11, %s38_s16  }
  0x34   : > { %s890_s4 = scalar_lea.hbm %s1030_s0, %s486_s29  ;;  %s148_s18 = scalar_lea.vmem [#allocation2], %s466_s27 }
  0x35   : > { %s155_s5 = sshll.u32 %s148_s18, 4  ;;  %p896_p13 = pnand %p553_p12, %p869_p6  ;;  %s892_s5 = int_to_ptr.vmem [resolvable:$true] %s155_s5 }
  0x36   : > { %s900_s15 = scalar_lea.sflag [#allocation3], %s144_s23  ;;  %s637_s16 = scalar_lea.hbm %s890_s4, 1024 }
  0x37   : > { %p638_p0 = scmp.ne.s32.totalorder %s890_s4, %s637_s16  ;;  %p639_p3 = pneg %p896_p13 }
  0x38   : > { %s642_s22 = scalar_lea.hbm %s1030_s0, 3072  ;;  %p643_p9 = scmp.lt.u32.totalorder %s890_s4, %s1030_s0 }
  0x39   : > { %p640_p5 = pnand %p639_p3, %p638_p0  ;;  %p644_p1 = scmp.lt.u32.totalorder %s642_s22, %s637_s16 }
  0x3a   : > { %p646_p4 = scmp.lt.u32.totalorder %s637_s16, %s890_s4 }
  0x3b   : > { %p641_p7 = pneg %p640_p5  ;;  %p645_p2 = por %p644_p1, %p643_p9 }
  0x3d   : > { %p647_p6 = por %p646_p4, %p645_p2 }
  0x3f   : > { %p648_p8 = pnand %p647_p6, %p641_p7 }
  0x41   : > { %651 = shalt.err (!%p648_p8)
}
  0x42   : > { %s652_s23 = scalar_lea.vmem %s892_s5, 1024  ;;  %s758_s3 = smov [#allocation2]  }
  0x43   : > { %p653_p12 = scmp.ne.s32.totalorder %s892_s5, %s652_s23  ;;  %s657_s18 = sshll.u32 %s758_s3, 4  ;;  %s658_s18 = int_to_ptr.vmem [resolvable:$false] %s657_s18 }
  0x44   : > { %s659_s26 = scalar_lea.vmem %s658_s18, 2048  ;;  %p660_p5 = scmp.lt.s32.totalorder %s892_s5, %s658_s18 }
  0x45   : > { %p655_p10 = pnand %p653_p12, %p639_p3  ;;  %p661_p9 = scmp.lt.s32.totalorder %s659_s26, %s652_s23 }
  0x47   : > { %p656_p0 = pneg %p655_p10  ;;  %p662_p1 = por %p661_p9, %p660_p5 }
  0x49   : > { %p663_p2 = pnand %p662_p1, %p656_p0 }
  0x4b   : > { %666 = shalt.err (!%p663_p2)
}
  0x4c   : > { %547 = dma.hbm_to_vmem [thread:$0]  (!%p896_p13), %s890_s4, 1024, %s892_s5, %s900_s15, %s756_s6, %s756_s6, %s757_s7  }
  0x4d   : > { %p1047_p3 = scmp.ne.s32.totalorder %s1041_s21, 0 }
  0x4e   : > { %s934_s16 = sand.u32 (!%p1047_p3), 1, %s737_s10   ;;  %p1048_p7 = scmp.ne.s32.totalorder (!%p1047_p3), %s1039_s19, 0 }
  0x4f   : > { %167 = sbr.rel (%p1047_p3) target bundleno = 334 (0x14e), region = 28  ;;  %s470_s27 = sshll.u32 (!%p1047_p3), %s934_s16, 6 }
  0x50   : > { %s170_s22 = scalar_lea.sflag (!%p1047_p3), [#allocation3], %s934_s16  ;;  %s940_s8 = scalar_lea.vmem (!%p1047_p3), [#allocation2], %s470_s27 }
  0x56   : > { %720 = dma.done.wait (%p1048_p7), %s170_s22, 1024  }
  0x57   : > { %722 = vsyncadd (%p1048_p7), %s170_s22, 4294966272  ;;  %p1049_p13 = scmp.ne.s32.totalorder %s1037_s17, 0 }
  0x59   : > { %724 = dma.done.wait (%p1049_p13), [#allocation6], 512  }
  0x5a   : > { %726 = vsyncadd (%p1049_p13), [#allocation6], 4294966784  ;;  %vm212_vm0 = vcmask 261120   ;;  %v208_v0 = vld [vmem:[#allocation5] sm:$0xff]  ;;  %v209_v1 = vld [vmem:[#allocation5 + $0x8] sm:$0xff]  ;;  %vm342_vm1 = vcmask 523264  }
  0x5b   : > { %v210_v2 = vld [vmem:[#allocation5 + $0x10] sm:$0xff]  ;;  %v520_v3 = vpack.c.bf16 %v209_v1, %v208_v0  ;;  %v211_v4 = vld [vmem:[#allocation5 + $0x18] sm:$0xff]  ;;  %v200_v5 = vld [vmem:[%s940_s8] sm:$0xff]  ;;  %s197_s17 = scalar_lea.vmem [#allocation7], %s470_s27  ;;  %s487_s21 = sshll.u32 %s745_s12, 10 }
  0x5c   : > { %v204_v6 = vld [vmem:[%s940_s8 + $0x20] sm:$0xff]  ;;  %v524_v7 = vpack.c.bf16 %v211_v4, %v210_v2  ;;  %508 = vmatprep.mubr.msk.f32.mxu0 %vm212_vm0, %v200_v5  ;;  %v201_v8 = vld [vmem:[%s940_s8 + $0x8] sm:$0xff]  ;;  %v202_v10 = vld [vmem:[%s940_s8 + $0x10] sm:$0xff]  ;;  %s366_s19 = sshll.u32 %s197_s17, 4  ;;  %s978_s12 = scalar_lea.hbm %s1032_s2, %s487_s21  ;;  %s971_s19 = int_to_ptr.vmem [resolvable:$true] %s366_s19 }
  0x5d   : > { %514 = vmatprep.mubr.msk.f32.mxu1 %vm212_vm0, %v204_v6  ;;  %521 = vmatprep.subr.bf16.mxu0 %v520_v3  ;;  %v205_v9 = vld [vmem:[%s940_s8 + $0x28] sm:$0xff]  ;;  %v206_v11 = vld [vmem:[%s940_s8 + $0x30] sm:$0xff]  ;;  %v203_v12 = vld [vmem:[%s940_s8 + $0x18] sm:$0xff]  ;;  %s352_s4 = scalar_lea.sflag [#allocation4], %s934_s16  ;;  %s667_s5 = scalar_lea.vmem %s971_s19, 1024 }
  0x5e   : > { %528 = vmatprep.subr.bf16.mxu1 %v520_v3  ;;  %523 = vmatpush3.bf16.msra.mxu0 %v520_v3  ;;  %v207_v13 = vld [vmem:[%s940_s8 + $0x38] sm:$0xff]  ;;  %p668_p4 = scmp.ne.s32.totalorder %s971_s19, %s667_s5  ;;  %s759_s15 = smov [#allocation7]  }
  0x5f   : > { %530 = vmatpush3.bf16.msra.mxu1 %v520_v3  ;;  %525 = vmatprep.subr.bf16.mxu0 %v524_v7  ;;  %s671_s29 = sshll.u32 %s759_s15, 4  ;;  %s672_s29 = int_to_ptr.vmem [resolvable:$false] %s671_s29 }
  0x60   : > { %529 = vmatprep.subr.bf16.mxu1 %v524_v7  ;;  %p669_p6 = pnand %p668_p4, %p875_p11  ;;  %s673_s30 = scalar_lea.vmem %s672_s29, 2048 }
  0x61   : > { %p674_p12 = scmp.lt.s32.totalorder %s971_s19, %s672_s29  ;;  %p675_p10 = scmp.lt.s32.totalorder %s673_s30, %s667_s5 }
  0x62   : > { %527 = vmatpush3.bf16.msra.mxu0 %v524_v7  ;;  %p670_p8 = pneg %p669_p6 }
  0x63   : > { %531 = vmatpush3.bf16.msra.mxu1 %v524_v7  ;;  %p676_p0 = por %p675_p10, %p674_p12 }
  0x65   : > { %509 = vmatmul.mubr.msk.f32.vlgmr.msra.gmra.mrb[0].mxu0 %vm212_vm0, %v201_v8  ;;  %p677_p5 = pnand %p676_p0, %p670_p8 }
  0x66   : > { %515 = vmatmul.mubr.msk.f32.vlgmr.msra.gmra.mrb[0].mxu1 %vm212_vm0, %v205_v9  ;;  %511 = vmatprep.mubr.msk.f32.mxu0 %vm212_vm0, %v202_v10 }
  0x67   : > { %517 = vmatprep.mubr.msk.f32.mxu1 %vm212_vm0, %v206_v11 }
  0x69   : > { %512 = vmatmul.mubr.msk.f32.gmra.mrb[2].mxu0 %vm212_vm0, %v203_v12 }
  0x6a   : > { %518 = vmatmul.mubr.msk.f32.gmra.mrb[2].mxu1 %vm212_vm0, %v207_v13 }
 0x138   : > { %v510_v14 = vpop.f32.mrb[0].mxu0 }
 0x139   : > { %v516_v15 = vpop.f32.mrb[0].mxu1  ;;  %344 = vst.msk [vmem:[%s197_s17 + $0x8] sm:$0xff] %vm342_vm1, %v510_v14  ;;  %v303_v16 = vpop.f32.mrb[1].mxu0 }
 0x13a   : > { %348 = vst.msk [vmem:[%s197_s17 + $0x28] sm:$0xff] %vm342_vm1, %v516_v15  ;;  %v323_v17 = vpop.f32.mrb[1].mxu1  ;;  %343 = vst.msk [vmem:[%s197_s17] sm:$0xff] %vm342_vm1, %v303_v16 }
 0x13b   : > { %347 = vst.msk [vmem:[%s197_s17 + $0x20] sm:$0xff] %vm342_vm1, %v323_v17 }
 0x13c   : > { %v513_v18 = vpop.f32.mrb[2].mxu0 }
 0x13d   : > { %v519_v19 = vpop.f32.mrb[2].mxu1  ;;  %346 = vst.msk [vmem:[%s197_s17 + $0x18] sm:$0xff] %vm342_vm1, %v513_v18  ;;  %v313_v20 = vpop.f32.mrb[3].mxu0 }
 0x13e   : > { %350 = vst.msk [vmem:[%s197_s17 + $0x38] sm:$0xff] %vm342_vm1, %v519_v19  ;;  %v333_v21 = vpop.f32.mrb[3].mxu1  ;;  %345 = vst.msk [vmem:[%s197_s17 + $0x10] sm:$0xff] %vm342_vm1, %v313_v20 }
 0x13f   : > { %349 = vst.msk [vmem:[%s197_s17 + $0x30] sm:$0xff] %vm342_vm1, %v333_v21 }
 0x140   : > { %680 = shalt.err (!%p677_p5)
}
 0x141   : > { %s681_s23 = scalar_lea.hbm %s978_s12, 1024  ;;  %s685_s26 = scalar_lea.hbm %s1032_s2, 3072 }
 0x142   : > { %p682_p9 = scmp.ne.s32.totalorder %s978_s12, %s681_s23  ;;  %p686_p3 = scmp.lt.u32.totalorder %s978_s12, %s1032_s2 }
 0x143   : > { %p687_p7 = scmp.lt.u32.totalorder %s685_s26, %s681_s23  ;;  %p689_p4 = scmp.lt.u32.totalorder %s681_s23, %s978_s12 }
 0x144   : > { %p683_p1 = pnand %p682_p9, %p875_p11 }
 0x145   : > { %p688_p13 = por %p687_p7, %p686_p3 }
 0x146   : > { %p684_p2 = pneg %p683_p1 }
 0x147   : > { %p690_p6 = por %p689_p4, %p688_p13 }
 0x149   : > { %p691_p8 = pnand %p690_p6, %p684_p2 }
 0x14b   : > { %694 = shalt.err (!%p691_p8)
}
 0x14c   : > { %s760_s8 = smov 128   ;;  %s761_s17 = smov 8  }
 0x14d   : > { %538 = dma.vmem_to_hbm [thread:$0]  (%p875_p11), %s971_s19, 1024, %s978_s12, %s352_s4, %s760_s8, %s760_s8, %s761_s17  }
 0x14e PF: > { %p555_p12 = scmp.ge.s32.totalorder %s753_s14, 2  ;;  %s381_s21 = sand.u32 1, %s733_s9  }
 0x14f   : > { %p1050_p10 = scmp.ne.s32.totalorder %s1040_s20, 0  ;;  %s382_s6 = scalar_lea.sflag [#allocation4], %s381_s21 }
 0x151   : > { %p549_p0 = pnand %p555_p12, %p1050_p10 }
 0x153   : > { %728 = dma.done.wait (!%p549_p0), %s382_s6, 1024  }
 0x154   : > { %730 = vsyncadd (!%p549_p0), %s382_s6, 4294966272  ;;  %s19_s14 = sadd.s32 1, %s753_s14   ;;  %s1051_s9 = smov %s737_s10 }
 0x155   : > { %p16_p5 = scmp.ge.s32.totalorder %s19_s14, 5   ;;  %s1052_s10 = smov %s741_s11 }
 0x156   : > { %s1053_s11 = smov %s884_s28  ;;  %s1054_s12 = smov %s749_s13 }
 0x157   : > { %s1055_s13 = smov %s1057_s25  ;;  %18 = sbr.rel (!%p16_p5) target bundleno = 7 (0x7), region = 78 }
 0x15e   :  { %387 = vsyncpa [#allocation3], 1 }
 0x15f   :  { %389 = vsyncpa [#allocation3 + $0x1], 1 }
 0x160   :  { %390 = vsyncpa [#allocation6], 1 }
 0x161   :  { %391 = vsyncpa [#allocation4], 1 }
 0x162   :  { %393 = vsyncpa [#allocation4 + $0x1], 1 }

// kernel: generator_forward.19
= control target key start
LH: loop header
LB: loop body
LE: loop exit
PB: predicated region body
PF: predicated region fallthrough
CT: control target
= control target key end

     0   :  { %7 = vsyncpa [#allocation3], 0  ;;  %s1181_s0 = inlined_call_operand.hbm [shape: f32[384,32], index: 0, kind: input, shape index: {}]   ;;  %s1182_s1 = inlined_call_operand.hbm [shape: f32[32,64], index: 1, kind: input, shape index: {}]   ;;  %s1183_s2 = inlined_call_operand.hbm [shape: f32[384,64], index: 2, kind: output, shape index: {}]  }
   0x1   :  { %9 = vsyncpa [#allocation3 + $0x1], 0 }
   0x2   :  { %10 = vsyncpa [#allocation6], 0 }
   0x3   :  { %11 = vsyncpa [#allocation4], 0 }
   0x4   :  { %13 = vsyncpa [#allocation4 + $0x1], 0  ;;  %s885_s9 = smov 0   ;;  %s887_s10 = smov 0  }
   0x5   :  { %s889_s11 = smov 0   ;;  %s891_s12 = smov 0  }
   0x6   :  { %s893_s13 = smov 0   ;;  %s895_s14 = smov 0  }
   0x7 LB: > { %s541_s15 = sadd.s32 4294967295, %s861_s14   ;;  %s542_s16 = sadd.s32 4294967294, %s861_s14   ;;  %s861_s14 = sphi %s895_s14, %s19_s14   ;;  %s857_s13 = sphi %s893_s13, %s1206_s13   ;;  %s853_s12 = sphi %s891_s12, %s1205_s12   ;;  %s849_s11 = sphi %s889_s11, %s1204_s11   ;;  %s845_s10 = sphi %s887_s10, %s1203_s10   ;;  %s841_s9 = sphi %s885_s9, %s1202_s9  }
   0x8   : > { %p51_p0 = scmp.ne.s32.totalorder %s845_s10, %s841_s9  ;;  %p919_p1 = scmp.eq.s32.totalorder %s541_s15, 0 }
   0x9   : > { %p923_p2 = scmp.eq.s32.totalorder %s541_s15, 2  ;;  %p109_p3 = scmp.eq.s32.totalorder %s542_s16, 2 }
   0xa   : > { %s1188_s17 = scalar_select %p919_p1, 1, 0 }
   0xb   : > { %s1189_s18 = scalar_select %p923_p2, 1, 0 }
   0xc   : > { %p929_p4 = por %p919_p1, %p51_p0  ;;  %p543_p5 = scmp.ge.s32.totalorder %s861_s14, 1 }
   0xd   : > { %p934_p6 = por %p109_p3, %p51_p0  ;;  %p116_p7 = scmp.lt.s32.totalorder %s861_s14, 4 }
   0xe   : > { %s1190_s19 = scalar_select %p929_p4, 1, 0 }
   0xf   : > { %s1191_s20 = scalar_select %p934_p6, 1, 0 }
  0x10   : > { %p939_p8 = pnand %p543_p5, %p116_p7  ;;  %s863_s22 = smov [#allocation5]  }
  0x11   : > { %s130_s23 = sshll.u32 %s863_s22, 4  ;;  %s31_s25 = sadd.s32 1, %s857_s13  ;;  %s131_s23 = int_to_ptr.vmem [resolvable:$true] %s130_s23 }
  0x12   : > { %s1192_s21 = scalar_select %p939_p8, 1, 0 }
  0x13   : > { %p648_p9 = pneg %p939_p8  ;;  %s717_s28 = scalar_lea.hbm %s1182_s1, 512 }
  0x14   : > { %p718_p11 = scmp.ne.s32.totalorder %s1182_s1, %s717_s28  ;;  %p724_p3 = scmp.lt.u32.totalorder %s717_s28, %s1182_s1 }
  0x15   : > { %p947_p10 = pnand %p648_p9, %p919_p1 }
  0x17   : > { %p719_p12 = pneg %p947_p10 }
  0x19   : > { %p720_p13 = pnand %p719_p12, %p718_p11 }
  0x1b   : > { %p721_p0 = pneg %p720_p13 }
  0x1d   : > { %p726_p5 = pnand %p724_p3, %p721_p0 }
  0x1f   : > { %729 = shalt.err (!%p726_p5)
}
  0x20   : > { %s730_s5 = scalar_lea.vmem %s131_s23, 512  ;;  %p738_p1 = scmp.lt.s32.totalorder %s131_s23, %s131_s23 }
  0x21   : > { %p731_p7 = scmp.ne.s32.totalorder %s131_s23, %s730_s5  ;;  %p739_p4 = scmp.lt.s32.totalorder %s730_s5, %s730_s5 }
  0x23   : > { %p733_p9 = pnand %p731_p7, %p719_p12  ;;  %p740_p8 = por %p739_p4, %p738_p1 }
  0x25   : > { %p734_p6 = pneg %p733_p9 }
  0x27   : > { %p741_p2 = pnand %p740_p8, %p734_p6 }
  0x29   : > { %744 = shalt.err (!%p741_p2)
}
  0x2a   : > { %s864_s6 = smov 128   ;;  %s865_s7 = smov 8  }
  0x2b   : > { %651 = dma.hbm_to_vmem [thread:$0]  (!%p947_p10), %s1182_s1, 512, %s131_s23, [#allocation6], %s864_s6, %s864_s6, %s865_s7  }
  0x2c   : > { %p33_p1 = scmp.ge.s32.totalorder %s31_s25, 3  ;;  %s38_s16 = sadd.s32 1, %s849_s11 }
  0x2d   : > { %p45_p2 = scmp.ne.s32.totalorder %s849_s11, %s845_s10  ;;  %p46_p4 = scmp.eq.s32.totalorder %s861_s14, 0 }
  0x2e   : > { %s1208_s25 = smov (%p33_p1, %s31_s25), 0  ;;  %p1195_p8 = scmp.ne.s32.totalorder %s1189_s18, 0 }
  0x2f   : > { %p977_p6 = por %p46_p4, %p45_p2  ;;  %s35_s26 = ssub.s32 %s857_s13, %s1208_s25 }
  0x30   : > { %p983_p11 = por %p1195_p8, %p45_p2  ;;  %p661_p12 = scmp.lt.s32.totalorder %s861_s14, 3 }
  0x31   : > { %p36_p10 = scmp.eq.s32.totalorder %s35_s26, 0  ;;  %s144_s23 = sand.u32 1, %s849_s11  }
  0x32   : > { %s546_s27 = sshll.u32 %s144_s23, 7  ;;  %s574_s29 = sshll.u32 %s857_s13, 11 }
  0x33   : > { %s992_s28 = scalar_select %p36_p10, %s849_s11, %s38_s16  }
  0x34   : > { %s998_s4 = scalar_lea.hbm %s1181_s0, %s574_s29  ;;  %s148_s18 = scalar_lea.vmem [#allocation2], %s546_s27 }
  0x35   : > { %s155_s5 = sshll.u32 %s148_s18, 4  ;;  %p1004_p13 = pnand %p661_p12, %p977_p6  ;;  %s1000_s5 = int_to_ptr.vmem [resolvable:$true] %s155_s5 }
  0x36   : > { %s1008_s15 = scalar_lea.sflag [#allocation3], %s144_s23  ;;  %s745_s16 = scalar_lea.hbm %s998_s4, 2048 }
  0x37   : > { %p746_p0 = scmp.ne.s32.totalorder %s998_s4, %s745_s16  ;;  %p747_p3 = pneg %p1004_p13 }
  0x38   : > { %s750_s22 = scalar_lea.hbm %s1181_s0, 6144  ;;  %p751_p9 = scmp.lt.u32.totalorder %s998_s4, %s1181_s0 }
  0x39   : > { %p748_p5 = pnand %p747_p3, %p746_p0  ;;  %p752_p1 = scmp.lt.u32.totalorder %s750_s22, %s745_s16 }
  0x3a   : > { %p754_p4 = scmp.lt.u32.totalorder %s745_s16, %s998_s4 }
  0x3b   : > { %p749_p7 = pneg %p748_p5  ;;  %p753_p2 = por %p752_p1, %p751_p9 }
  0x3d   : > { %p755_p6 = por %p754_p4, %p753_p2 }
  0x3f   : > { %p756_p8 = pnand %p755_p6, %p749_p7 }
  0x41   : > { %759 = shalt.err (!%p756_p8)
}
  0x42   : > { %s760_s23 = scalar_lea.vmem %s1000_s5, 2048  ;;  %s866_s3 = smov [#allocation2]  }
  0x43   : > { %p761_p12 = scmp.ne.s32.totalorder %s1000_s5, %s760_s23  ;;  %s765_s18 = sshll.u32 %s866_s3, 4  ;;  %s766_s18 = int_to_ptr.vmem [resolvable:$false] %s765_s18 }
  0x44   : > { %s767_s26 = scalar_lea.vmem %s766_s18, 4096  ;;  %p768_p5 = scmp.lt.s32.totalorder %s1000_s5, %s766_s18 }
  0x45   : > { %p763_p10 = pnand %p761_p12, %p747_p3  ;;  %p769_p9 = scmp.lt.s32.totalorder %s767_s26, %s760_s23 }
  0x47   : > { %p764_p0 = pneg %p763_p10  ;;  %p770_p1 = por %p769_p9, %p768_p5 }
  0x49   : > { %p771_p2 = pnand %p770_p1, %p764_p0 }
  0x4b   : > { %774 = shalt.err (!%p771_p2)
}
  0x4c   : > { %655 = dma.hbm_to_vmem [thread:$0]  (!%p1004_p13), %s998_s4, 2048, %s1000_s5, %s1008_s15, %s864_s6, %s864_s6, %s865_s7  }
  0x4d   : > { %p1198_p3 = scmp.ne.s32.totalorder %s1192_s21, 0 }
  0x4e   : > { %s1042_s16 = sand.u32 (!%p1198_p3), 1, %s845_s10   ;;  %p1199_p7 = scmp.ne.s32.totalorder (!%p1198_p3), %s1190_s19, 0 }
  0x4f   : > { %167 = sbr.rel (%p1198_p3) target bundleno = 342 (0x156), region = 28  ;;  %s550_s27 = sshll.u32 (!%p1198_p3), %s1042_s16, 7 }
  0x50   : > { %s170_s22 = scalar_lea.sflag (!%p1198_p3), [#allocation3], %s1042_s16  ;;  %s1048_s8 = scalar_lea.vmem (!%p1198_p3), [#allocation2], %s550_s27 }
  0x56   : > { %828 = dma.done.wait (%p1199_p7), %s170_s22, 2048  }
  0x57   : > { %830 = vsyncadd (%p1199_p7), %s170_s22, 4294965248  ;;  %p1200_p13 = scmp.ne.s32.totalorder %s1188_s17, 0 }
  0x59   : > { %832 = dma.done.wait (%p1200_p13), [#allocation6], 512  }
  0x5a   : > { %834 = vsyncadd (%p1200_p13), [#allocation6], 4294966784  ;;  %vm220_vm0 = vcmask 261120   ;;  %v216_v0 = vld [vmem:[#allocation5] sm:$0xff]  ;;  %v217_v1 = vld [vmem:[#allocation5 + $0x8] sm:$0xff]  ;;  %vm414_vm1 = vcmask 523264  }
  0x5b   : > { %v218_v2 = vld [vmem:[#allocation5 + $0x10] sm:$0xff]  ;;  %v628_v3 = vpack.c.bf16 %v217_v1, %v216_v0  ;;  %v219_v4 = vld [vmem:[#allocation5 + $0x18] sm:$0xff]  ;;  %v200_v5 = vld [vmem:[%s1048_s8] sm:$0xff]  ;;  %s1092_s17 = scalar_lea.vmem [#allocation7], %s550_s27  ;;  %s575_s19 = sshll.u32 %s853_s12, 11 }
  0x5c   : > { %v208_v6 = vld [vmem:[%s1048_s8 + $0x40] sm:$0xff]  ;;  %v632_v7 = vpack.c.bf16 %v219_v4, %v218_v2  ;;  %604 = vmatprep.mubr.msk.f32.mxu0 %vm220_vm0, %v200_v5  ;;  %v201_v8 = vld [vmem:[%s1048_s8 + $0x8] sm:$0xff]  ;;  %v202_v10 = vld [vmem:[%s1048_s8 + $0x10] sm:$0xff]  ;;  %s446_s21 = sshll.u32 %s1092_s17, 4  ;;  %s1123_s4 = scalar_lea.hbm %s1183_s2, %s575_s19  ;;  %s1125_s21 = int_to_ptr.vmem [resolvable:$true] %s446_s21 }
  0x5d   : > { %616 = vmatprep.mubr.msk.f32.mxu1 %vm220_vm0, %v208_v6  ;;  %629 = vmatprep.subr.bf16.mxu0 %v628_v3  ;;  %v209_v9 = vld [vmem:[%s1048_s8 + $0x48] sm:$0xff]  ;;  %v210_v11 = vld [vmem:[%s1048_s8 + $0x50] sm:$0xff]  ;;  %v203_v12 = vld [vmem:[%s1048_s8 + $0x18] sm:$0xff]  ;;  %s432_s12 = scalar_lea.sflag [#allocation4], %s1042_s16  ;;  %s775_s5 = scalar_lea.vmem %s1125_s21, 2048 }
  0x5e   : > { %636 = vmatprep.subr.bf16.mxu1 %v628_v3  ;;  %631 = vmatpush3.bf16.msra.mxu0 %v628_v3  ;;  %v211_v13 = vld [vmem:[%s1048_s8 + $0x58] sm:$0xff]  ;;  %v204_v14 = vld [vmem:[%s1048_s8 + $0x20] sm:$0xff]  ;;  %v205_v16 = vld [vmem:[%s1048_s8 + $0x28] sm:$0xff]  ;;  %p776_p4 = scmp.ne.s32.totalorder %s1125_s21, %s775_s5  ;;  %s867_s15 = smov [#allocation7]  }
  0x5f   : > { %638 = vmatpush3.bf16.msra.mxu1 %v628_v3  ;;  %633 = vmatprep.subr.bf16.mxu0 %v632_v7  ;;  %v212_v15 = vld [vmem:[%s1048_s8 + $0x60] sm:$0xff]  ;;  %v213_v17 = vld [vmem:[%s1048_s8 + $0x68] sm:$0xff]  ;;  %v206_v18 = vld [vmem:[%s1048_s8 + $0x30] sm:$0xff]  ;;  %s779_s29 = sshll.u32 %s867_s15, 4  ;;  %s780_s29 = int_to_ptr.vmem [resolvable:$false] %s779_s29 }
  0x60   : > { %637 = vmatprep.subr.bf16.mxu1 %v632_v7  ;;  %v214_v19 = vld [vmem:[%s1048_s8 + $0x70] sm:$0xff]  ;;  %v207_v20 = vld [vmem:[%s1048_s8 + $0x38] sm:$0xff]  ;;  %p777_p6 = pnand %p776_p4, %p983_p11  ;;  %s781_s30 = scalar_lea.vmem %s780_s29, 4096 }
  0x61   : > { %v215_v21 = vld [vmem:[%s1048_s8 + $0x78] sm:$0xff]  ;;  %p782_p12 = scmp.lt.s32.totalorder %s1125_s21, %s780_s29  ;;  %p783_p10 = scmp.lt.s32.totalorder %s781_s30, %s775_s5 }
  0x62   : > { %635 = vmatpush3.bf16.msra.mxu0 %v632_v7  ;;  %p778_p8 = pneg %p777_p6 }
  0x63   : > { %639 = vmatpush3.bf16.msra.mxu1 %v632_v7  ;;  %p784_p0 = por %p783_p10, %p782_p12 }
  0x65   : > { %605 = vmatmul.mubr.msk.f32.vlgmr.msra.gmra.mrb[0].mxu0 %vm220_vm0, %v201_v8  ;;  %p785_p5 = pnand %p784_p0, %p778_p8 }
  0x66   : > { %617 = vmatmul.mubr.msk.f32.vlgmr.msra.gmra.mrb[0].mxu1 %vm220_vm0, %v209_v9  ;;  %607 = vmatprep.mubr.msk.f32.mxu0 %vm220_vm0, %v202_v10 }
  0x67   : > { %619 = vmatprep.mubr.msk.f32.mxu1 %vm220_vm0, %v210_v11 }
  0x69   : > { %608 = vmatmul.mubr.msk.f32.gmra.mrb[2].mxu0 %vm220_vm0, %v203_v12 }
  0x6a   : > { %620 = vmatmul.mubr.msk.f32.gmra.mrb[2].mxu1 %vm220_vm0, %v211_v13  ;;  %610 = vmatprep.mubr.msk.f32.mxu0 %vm220_vm0, %v204_v14 }
  0x6b   : > { %622 = vmatprep.mubr.msk.f32.mxu1 %vm220_vm0, %v212_v15 }
  0x6d   : > { %611 = vmatmul.mubr.msk.f32.gmra.mrb[4].mxu0 %vm220_vm0, %v205_v16 }
  0x6e   : > { %623 = vmatmul.mubr.msk.f32.gmra.mrb[4].mxu1 %vm220_vm0, %v213_v17  ;;  %613 = vmatprep.mubr.msk.f32.mxu0 %vm220_vm0, %v206_v18 }
  0x6f   : > { %625 = vmatprep.mubr.msk.f32.mxu1 %vm220_vm0, %v214_v19 }
  0x71   : > { %614 = vmatmul.mubr.msk.f32.gmra.mrb[6].mxu0 %vm220_vm0, %v207_v20 }
  0x72   : > { %626 = vmatmul.mubr.msk.f32.gmra.mrb[6].mxu1 %vm220_vm0, %v215_v21 }
 0x138   : > { %v606_v22 = vpop.f32.mrb[0].mxu0 }
 0x139   : > { %v618_v23 = vpop.f32.mrb[0].mxu1  ;;  %416 = vst.msk [vmem:[%s1092_s17 + $0x8] sm:$0xff] %vm414_vm1, %v606_v22  ;;  %v335_v24 = vpop.f32.mrb[1].mxu0 }
 0x13a   : > { %424 = vst.msk [vmem:[%s1092_s17 + $0x48] sm:$0xff] %vm414_vm1, %v618_v23  ;;  %v375_v25 = vpop.f32.mrb[1].mxu1  ;;  %415 = vst.msk [vmem:[%s1092_s17] sm:$0xff] %vm414_vm1, %v335_v24 }
 0x13b   : > { %423 = vst.msk [vmem:[%s1092_s17 + $0x40] sm:$0xff] %vm414_vm1, %v375_v25 }
 0x13c   : > { %v609_v26 = vpop.f32.mrb[2].mxu0 }
 0x13d   : > { %v621_v27 = vpop.f32.mrb[2].mxu1  ;;  %418 = vst.msk [vmem:[%s1092_s17 + $0x18] sm:$0xff] %vm414_vm1, %v609_v26  ;;  %v345_v28 = vpop.f32.mrb[3].mxu0 }
 0x13e   : > { %426 = vst.msk [vmem:[%s1092_s17 + $0x58] sm:$0xff] %vm414_vm1, %v621_v27  ;;  %v385_v29 = vpop.f32.mrb[3].mxu1  ;;  %417 = vst.msk [vmem:[%s1092_s17 + $0x10] sm:$0xff] %vm414_vm1, %v345_v28 }
 0x13f   : > { %425 = vst.msk [vmem:[%s1092_s17 + $0x50] sm:$0xff] %vm414_vm1, %v385_v29 }
 0x140   : > { %v612_v30 = vpop.f32.mrb[4].mxu0 }
 0x141   : > { %v624_v31 = vpop.f32.mrb[4].mxu1  ;;  %420 = vst.msk [vmem:[%s1092_s17 + $0x28] sm:$0xff] %vm414_vm1, %v612_v30  ;;  %v355_v32 = vpop.f32.mrb[5].mxu0 }
 0x142   : > { %428 = vst.msk [vmem:[%s1092_s17 + $0x68] sm:$0xff] %vm414_vm1, %v624_v31  ;;  %v395_v33 = vpop.f32.mrb[5].mxu1  ;;  %419 = vst.msk [vmem:[%s1092_s17 + $0x20] sm:$0xff] %vm414_vm1, %v355_v32 }
 0x143   : > { %427 = vst.msk [vmem:[%s1092_s17 + $0x60] sm:$0xff] %vm414_vm1, %v395_v33 }
 0x144   : > { %v615_v34 = vpop.f32.mrb[6].mxu0 }
 0x145   : > { %v627_v35 = vpop.f32.mrb[6].mxu1  ;;  %422 = vst.msk [vmem:[%s1092_s17 + $0x38] sm:$0xff] %vm414_vm1, %v615_v34  ;;  %v365_v36 = vpop.f32.mrb[7].mxu0 }
 0x146   : > { %430 = vst.msk [vmem:[%s1092_s17 + $0x78] sm:$0xff] %vm414_vm1, %v627_v35  ;;  %v405_v37 = vpop.f32.mrb[7].mxu1  ;;  %421 = vst.msk [vmem:[%s1092_s17 + $0x30] sm:$0xff] %vm414_vm1, %v365_v36 }
 0x147   : > { %429 = vst.msk [vmem:[%s1092_s17 + $0x70] sm:$0xff] %vm414_vm1, %v405_v37 }
 0x148   : > { %788 = shalt.err (!%p785_p5)
}
 0x149   : > { %s789_s23 = scalar_lea.hbm %s1123_s4, 2048  ;;  %s793_s26 = scalar_lea.hbm %s1183_s2, 6144 }
 0x14a   : > { %p790_p9 = scmp.ne.s32.totalorder %s1123_s4, %s789_s23  ;;  %p794_p3 = scmp.lt.u32.totalorder %s1123_s4, %s1183_s2 }
 0x14b   : > { %p795_p7 = scmp.lt.u32.totalorder %s793_s26, %s789_s23  ;;  %p797_p4 = scmp.lt.u32.totalorder %s789_s23, %s1123_s4 }
 0x14c   : > { %p791_p1 = pnand %p790_p9, %p983_p11 }
 0x14d   : > { %p796_p13 = por %p795_p7, %p794_p3 }
 0x14e   : > { %p792_p2 = pneg %p791_p1 }
 0x14f   : > { %p798_p6 = por %p797_p4, %p796_p13 }
 0x151   : > { %p799_p8 = pnand %p798_p6, %p792_p2 }
 0x153   : > { %802 = shalt.err (!%p799_p8)
}
 0x154   : > { %s868_s8 = smov 128   ;;  %s869_s17 = smov 8  }
 0x155   : > { %646 = dma.vmem_to_hbm [thread:$0]  (%p983_p11), %s1125_s21, 2048, %s1123_s4, %s432_s12, %s868_s8, %s868_s8, %s869_s17  }
 0x156 PF: > { %p663_p12 = scmp.ge.s32.totalorder %s861_s14, 2  ;;  %s461_s19 = sand.u32 1, %s841_s9  }
 0x157   : > { %p1201_p10 = scmp.ne.s32.totalorder %s1191_s20, 0  ;;  %s462_s6 = scalar_lea.sflag [#allocation4], %s461_s19 }
 0x159   : > { %p657_p0 = pnand %p663_p12, %p1201_p10 }
 0x15b   : > { %836 = dma.done.wait (!%p657_p0), %s462_s6, 2048  }
 0x15c   : > { %838 = vsyncadd (!%p657_p0), %s462_s6, 4294965248  ;;  %s19_s14 = sadd.s32 1, %s861_s14   ;;  %s1202_s9 = smov %s845_s10 }
 0x15d   : > { %p16_p5 = scmp.ge.s32.totalorder %s19_s14, 5   ;;  %s1203_s10 = smov %s849_s11 }
 0x15e   : > { %s1204_s11 = smov %s992_s28  ;;  %s1205_s12 = smov %s857_s13 }
 0x15f   : > { %s1206_s13 = smov %s1208_s25  ;;  %18 = sbr.rel (!%p16_p5) target bundleno = 7 (0x7), region = 78 }
 0x166   :  { %467 = vsyncpa [#allocation3], 1 }
 0x167   :  { %469 = vsyncpa [#allocation3 + $0x1], 1 }
 0x168   :  { %470 = vsyncpa [#allocation6], 1 }
 0x169   :  { %471 = vsyncpa [#allocation4], 1 }
 0x16a   :  { %473 = vsyncpa [#allocation4 + $0x1], 1 }

</bundles_post_ra>
